<compile_context>
chip_gen: v7x
topology: tpu7x:2x2x1
jax: 0.10.0
libtpu: 0.0.40
codegen_flags: <defaults>
</compile_context>

<pallas_src>
import jax
import jax.numpy as jnp
from jax import lax
from jax.experimental import pallas as pl
from jax.experimental.pallas import tpu as pltpu


def _round_up(x, m):
    return (x + m - 1) // m * m


def _make_fused_kernel(H, W, C, CL, PADR, dtype):
    """Fused BasicBlock kernel for static (H, W, C, CL, PADR, dtype)."""
    HW = H * W

    def kernel(x_ref, w1_ref, w2_ref, s1_ref, b1_ref, s2_ref, b2_ref,
               o_ref, xpad_ref):
        # ---- stage 0: refresh halo rows (cheap) + lay x into the interior ----
        xpad_ref[pl.ds(0, PADR), :] = jnp.zeros((PADR, CL), dtype)
        xpad_ref[pl.ds(PADR + HW, PADR), :] = jnp.zeros((PADR, CL), dtype)
        xpad_ref[pl.ds(PADR, HW), pl.ds(0, C)] = x_ref[0]
        if CL > C:
            # Keep padded input lanes finite (zero): their weight rows are zero
            # so they never reach the output, but stale VMEM could hold NaN/Inf.
            xpad_ref[pl.ds(PADR, HW), pl.ds(C, CL - C)] = (
                jnp.zeros((HW, CL - C), dtype))

        # dx wraparound masks for the flattened spatial axis (row pitch = W);
        # dy out-of-bounds taps are handled by the zero halo rows.
        w_idx = lax.broadcasted_iota(jnp.int32, (HW, 1), 0) % W
        left_ok = w_idx >= 1          # tap dx = -1 valid
        right_ok = w_idx <= W - 2     # tap dx = +1 valid

        def conv3x3(w_ref):
            # 9 per-tap accumulated matmuls; K = CL per tap, f32 accumulation.
            acc = None
            for ky in range(3):
                for kx in range(3):
                    d = (ky - 1) * W + (kx - 1)
                    win = xpad_ref[pl.ds(PADR + d, HW), :]      # (HW, CL)
                    if kx == 0:
                        win = jnp.where(left_ok, win, jnp.zeros_like(win))
                    elif kx == 2:
                        win = jnp.where(right_ok, win, jnp.zeros_like(win))
                    p = jnp.dot(win, w_ref[3 * ky + kx],
                                preferred_element_type=jnp.float32)
                    acc = p if acc is None else acc + p
            return acc                                          # (HW, CL) f32

        # ---- conv1 + bn1 + relu (stays entirely in VMEM) ----
        h = conv3x3(w1_ref)
        h = jnp.maximum(h * s1_ref[...] + b1_ref[...], 0.0)
        # Feed h back through the halo scratch for conv2; padded lanes of h are
        # exactly zero (weights / bn params zero-padded), halos stay zero.
        xpad_ref[pl.ds(PADR, HW), :] = h.astype(dtype)

        # ---- conv2 + bn2 + residual add + relu, stored at true width C ----
        y = conv3x3(w2_ref)
        y = y[:, :C] * s2_ref[...] + b2_ref[...] + x_ref[0].astype(jnp.float32)
        o_ref[0] = jnp.maximum(y, 0.0).astype(o_ref.dtype)

    return kernel


def _pack_conv_weight(w_hwio, CL, dtype):
    """(3,3,Cin,Cout) HWIO -> (9, CL, CL), zero padded to the lane width."""
    kh, kw, cin, cout = w_hwio.shape
    w = jnp.zeros((kh * kw, CL, CL), dtype)
    w = w.at[:, :cin, :cout].set(
        w_hwio.reshape(kh * kw, cin, cout).astype(dtype))
    return w


def _fold_bn(gamma, beta, mean, var, width, eps=1e-5):
    """Eval-mode BN folded to per-channel scale/bias, zero padded to `width`."""
    scale = gamma / jnp.sqrt(var + eps)
    bias = beta - mean * scale
    c = scale.shape[0]
    s = jnp.zeros((1, width), jnp.float32).at[0, :c].set(scale.astype(jnp.float32))
    b = jnp.zeros((1, width), jnp.float32).at[0, :c].set(bias.astype(jnp.float32))
    return s, b


def basic_block_forward(x_nchw, params):
    """Fused Pallas BasicBlock forward (eval BN, stride=1, no downsample)."""
    N, C, H, W = x_nchw.shape
    HW = H * W
    dtype = x_nchw.dtype
    itemsize = jnp.dtype(dtype).itemsize
    CL = _round_up(C, 128)                       # lane-dense channel padding
    sub = 16 if itemsize < 4 else 8              # bf16 packs 16 sublanes/vreg
    PADR = _round_up(W + 1, sub)                 # halo rows each side
    R = HW + 2 * PADR                            # halo-scratch rows

    # NCHW -> (N, H*W, C): spatial on sublanes, channels on lanes.
    x_flat = jnp.transpose(x_nchw, (0, 2, 3, 1)).reshape(N, HW, C)

    w1 = _pack_conv_weight(params["w1"], CL, dtype)
    w2 = _pack_conv_weight(params["w2"], CL, dtype)
    s1, b1 = _fold_bn(*params["bn1"], CL)        # padded: keeps h pad lanes 0
    s2, b2 = _fold_bn(*params["bn2"], C)         # true-channel epilogue

    kernel = _make_fused_kernel(H, W, C, CL, PADR, dtype)

    # Per-step VMEM budget (halo scratch + double-buffered x/out blocks +
    # weights + f32 intermediates), clamped to a chip-safe range.
    budget = (R * CL * itemsize
              + 2 * 2 * HW * C * itemsize
              + 2 * 2 * 9 * CL * CL * itemsize
              + 3 * HW * CL * 4
              + (1 << 20))
    vmem_limit = int(min(max(2 * budget, 32 << 20), 64 << 20))

    out = pl.pallas_call(
        kernel,
        out_shape=jax.ShapeDtypeStruct((N, HW, C), dtype),
        grid=(N,),
        in_specs=[
            pl.BlockSpec((1, HW, C), lambda n: (n, 0, 0)),      # x
            pl.BlockSpec((9, CL, CL), lambda n: (0, 0, 0)),     # w1 (per tap)
            pl.BlockSpec((9, CL, CL), lambda n: (0, 0, 0)),     # w2 (per tap)
            pl.BlockSpec((1, CL), lambda n: (0, 0)),            # bn1 scale
            pl.BlockSpec((1, CL), lambda n: (0, 0)),            # bn1 bias
            pl.BlockSpec((1, C), lambda n: (0, 0)),             # bn2 scale
            pl.BlockSpec((1, C), lambda n: (0, 0)),             # bn2 bias
        ],
        out_specs=pl.BlockSpec((1, HW, C), lambda n: (n, 0, 0)),
        scratch_shapes=[
            pltpu.VMEM((R, CL), dtype),   # zero-haloed activation buffer
        ],
        compiler_params=pltpu.CompilerParams(
            dimension_semantics=("parallel",),
            vmem_limit_bytes=vmem_limit,
        ),
    )(x_flat, w1, w2, s1, b1, s2, b2)

    # (N, HW, C) -> NCHW only for the PyTorch-interface test; fused block chains
    # should stay in (N, HW, C) / NHWC and skip this transpose.
    out = out.reshape(N, H, W, C)
    return jnp.transpose(out, (0, 3, 1, 2))


# ----------------------------- reference (pure JAX) -----------------------------
def _ref_forward(x_nchw, params):
    x = jnp.transpose(x_nchw, (0, 2, 3, 1))
    dn = lax.conv_dimension_numbers(x.shape, params["w1"].shape,
                                    ("NHWC", "HWIO", "NHWC"))

    def conv(v, w):
        return lax.conv_general_dilated(v, w, (1, 1), ((1, 1), (1, 1)),
                                        dimension_numbers=dn)

    def fold(gamma, beta, mean, var, eps=1e-5):
        s = gamma / jnp.sqrt(var + eps)
        return s, beta - mean * s

    s1, b1 = fold(*params["bn1"])
    s2, b2 = fold(*params["bn2"])
    h = jnp.maximum(conv(x, params["w1"]) * s1 + b1, 0.0)
    o = conv(h, params["w2"]) * s2 + b2 + x
    o = jnp.maximum(o, 0.0)
    return jnp.transpose(o, (0, 3, 1, 2))


if __name__ == "__main__":
    key = jax.random.PRNGKey(0)
    (k_x, k_w1, k_w2, k_g1, k_b1, k_m1, k_v1,
     k_g2, k_b2, k_m2, k_v2) = jax.random.split(key, 11)

    N, C, H, W = 2, 4, 16, 16          # num_input_channels == num_block_channels
    x = jax.random.normal(k_x, (N, C, H, W), jnp.float32)

    # conv weights: PyTorch (Cout, Cin, 3, 3) -> HWIO (3, 3, Cin, Cout)
    w1_oihw = jax.random.normal(k_w1, (C, C, 3, 3), jnp.float32) * 0.1
    w2_oihw = jax.random.normal(k_w2, (C, C, 3, 3), jnp.float32) * 0.1
    params = {
        "w1": jnp.transpose(w1_oihw, (2, 3, 1, 0)),
        "w2": jnp.transpose(w2_oihw, (2, 3, 1, 0)),
        "bn1": (jax.random.normal(k_g1, (C,)) * 0.1 + 1.0,
                jax.random.normal(k_b1, (C,)) * 0.1,
                jax.random.normal(k_m1, (C,)) * 0.1,
                jax.random.uniform(k_v1, (C,), minval=0.5, maxval=1.5)),
        "bn2": (jax.random.normal(k_g2, (C,)) * 0.1 + 1.0,
                jax.random.normal(k_b2, (C,)) * 0.1,
                jax.random.normal(k_m2, (C,)) * 0.1,
                jax.random.uniform(k_v2, (C,), minval=0.5, maxval=1.5)),
    }

    fwd = jax.jit(basic_block_forward)
    out = jax.block_until_ready(fwd(x, params))
    ref = jax.block_until_ready(_ref_forward(x, params))
    assert out.shape == (N, C, H, W)
    assert jnp.allclose(out, ref, atol=1e-3, rtol=1e-3), "mismatch vs reference"
    print("KERNEL_OK")
</pallas_src>

<mosaic_0001>
module attributes {stable_mosaic.version = 11 : i64} {
  func.func @kernel(%arg0: i32, %arg1: memref<1x256x4xf32, #tpu.memory_space<vmem>>, %arg2: memref<9x128x128xf32, #tpu.memory_space<vmem>>, %arg3: memref<9x128x128xf32, #tpu.memory_space<vmem>>, %arg4: memref<1x128xf32, #tpu.memory_space<vmem>>, %arg5: memref<1x128xf32, #tpu.memory_space<vmem>>, %arg6: memref<1x4xf32, #tpu.memory_space<vmem>>, %arg7: memref<1x4xf32, #tpu.memory_space<vmem>>, %arg8: memref<1x256x4xf32, #tpu.memory_space<vmem>>, %arg9: memref<304x128xf32, #tpu.memory_space<vmem>>) attributes {dimension_semantics = [#tpu.dimension_semantics<parallel>], iteration_bounds = array<i64: 2>, scalar_prefetch = 0 : i64, scratch_operands = 1 : i64, tpu.core_type = #tpu.core_type<tc>, window_params = [{transform_indices = @transform_0, window_bounds = array<i64: 1, 256, 4>}, {pipeline_mode = #tpu.pipeline_mode<synchronous>, transform_indices = @transform_1, window_bounds = array<i64: 9, 128, 128>}, {pipeline_mode = #tpu.pipeline_mode<synchronous>, transform_indices = @transform_2, window_bounds = array<i64: 9, 128, 128>}, {pipeline_mode = #tpu.pipeline_mode<synchronous>, transform_indices = @transform_3, window_bounds = array<i64: 1, 128>}, {pipeline_mode = #tpu.pipeline_mode<synchronous>, transform_indices = @transform_4, window_bounds = array<i64: 1, 128>}, {pipeline_mode = #tpu.pipeline_mode<synchronous>, transform_indices = @transform_5, window_bounds = array<i64: 1, 4>}, {pipeline_mode = #tpu.pipeline_mode<synchronous>, transform_indices = @transform_6, window_bounds = array<i64: 1, 4>}, {transform_indices = @transform_7, window_bounds = array<i64: 1, 256, 4>}]} {
    %cst = arith.constant 0.000000e+00 : f32
    %0 = vector.broadcast %cst : f32 to vector<24x128xf32>
    %c0 = arith.constant 0 : index
    %c0_0 = arith.constant 0 : index
    %1 = vector.load %arg9[%c0, %c0_0] : memref<304x128xf32, #tpu.memory_space<vmem>>, vector<24x128xf32>
    tpu.vector_store %arg9[%c0, %c0_0], %0 {strides = array<i32>} : memref<304x128xf32, #tpu.memory_space<vmem>>, vector<24x128xf32>,
    %cst_1 = arith.constant 0.000000e+00 : f32
    %2 = vector.broadcast %cst_1 : f32 to vector<24x128xf32>
    %c280 = arith.constant 280 : index
    %c0_2 = arith.constant 0 : index
    %3 = vector.load %arg9[%c280, %c0_2] : memref<304x128xf32, #tpu.memory_space<vmem>>, vector<24x128xf32>
    tpu.vector_store %arg9[%c280, %c0_2], %2 {strides = array<i32>} : memref<304x128xf32, #tpu.memory_space<vmem>>, vector<24x128xf32>,
    %c0_3 = arith.constant 0 : index
    %c0_4 = arith.constant 0 : index
    %c0_5 = arith.constant 0 : index
    %4 = vector.load %arg1[%c0_3, %c0_4, %c0_5] : memref<1x256x4xf32, #tpu.memory_space<vmem>>, vector<1x256x4xf32>
    %5 = vector.shape_cast %4 : vector<1x256x4xf32> to vector<256x4xf32>
    %c24 = arith.constant 24 : index
    %c0_6 = arith.constant 0 : index
    %6 = vector.load %arg9[%c24, %c0_6] : memref<304x128xf32, #tpu.memory_space<vmem>>, vector<256x4xf32>
    tpu.vector_store %arg9[%c24, %c0_6], %5 {strides = array<i32>} : memref<304x128xf32, #tpu.memory_space<vmem>>, vector<256x4xf32>,
    %cst_7 = arith.constant 0.000000e+00 : f32
    %7 = vector.broadcast %cst_7 : f32 to vector<256x124xf32>
    %c24_8 = arith.constant 24 : index
    %c4 = arith.constant 4 : index
    %8 = vector.load %arg9[%c24_8, %c4] : memref<304x128xf32, #tpu.memory_space<vmem>>, vector<256x124xf32>
    tpu.vector_store %arg9[%c24_8, %c4], %7 {strides = array<i32>} : memref<304x128xf32, #tpu.memory_space<vmem>>, vector<256x124xf32>,
    %9 = tpu.iota {dimensions = array<i32: 0>} : vector<256x1xi32>
    %c16_i32 = arith.constant 16 : i32
    %c0_i32 = arith.constant 0 : i32
    %10 = arith.cmpi eq, %c16_i32, %c0_i32 : i32
    %c1_i32 = arith.constant 1 : i32
    %11 = arith.select %10, %c1_i32, %c16_i32 : i32
    %12 = vector.broadcast %11 : i32 to vector<256x1xi32>
    %13 = arith.remsi %9, %12 : vector<256x1xi32>
    %c0_i32_9 = arith.constant 0 : i32
    %14 = vector.broadcast %c0_i32_9 : i32 to vector<256x1xi32>
    %15 = arith.cmpi ne, %13, %14 : vector<256x1xi32>
    %c0_i32_10 = arith.constant 0 : i32
    %16 = vector.broadcast %c0_i32_10 : i32 to vector<256x1xi32>
    %17 = arith.cmpi slt, %13, %16 : vector<256x1xi32>
    %c0_i32_11 = arith.constant 0 : i32
    %18 = arith.cmpi slt, %11, %c0_i32_11 : i32
    %19 = vector.broadcast %18 : i1 to vector<256x1xi1>
    %20 = vector.broadcast %19 : vector<256x1xi1> to vector<256x1xi1>
    %21 = arith.xori %17, %20 : vector<256x1xi1>
    %22 = arith.andi %21, %15 : vector<256x1xi1>
    %23 = vector.broadcast %11 : i32 to vector<256x1xi32>
    %24 = arith.addi %13, %23 : vector<256x1xi32>
    %25 = arith.select %22, %24, %13 : vector<256x1xi1>, vector<256x1xi32>
    %c1_i32_12 = arith.constant 1 : i32
    %26 = vector.broadcast %c1_i32_12 : i32 to vector<256x1xi32>
    %27 = arith.cmpi sge, %25, %26 : vector<256x1xi32>
    %c14_i32 = arith.constant 14 : i32
    %28 = vector.broadcast %c14_i32 : i32 to vector<256x1xi32>
    %29 = arith.cmpi sle, %25, %28 : vector<256x1xi32>
    %c7 = arith.constant 7 : index
    %c0_13 = arith.constant 0 : index
    %30 = vector.load %arg9[%c7, %c0_13] : memref<304x128xf32, #tpu.memory_space<vmem>>, vector<256x128xf32>
    %cst_14 = arith.constant 0.000000e+00 : f32
    %31 = vector.broadcast %cst_14 : f32 to vector<256x128xf32>
    %32 = vector.shape_cast %27 : vector<256x1xi1> to vector<256x1xi1>
    %33 = vector.broadcast %32 : vector<256x1xi1> to vector<256x128xi1>
    %34 = arith.select %33, %30, %31 : vector<256x128xi1>, vector<256x128xf32>
    %c0_15 = arith.constant 0 : index
    %c0_16 = arith.constant 0 : index
    %c0_17 = arith.constant 0 : index
    %35 = vector.load %arg2[%c0_15, %c0_16, %c0_17] : memref<9x128x128xf32, #tpu.memory_space<vmem>>, vector<1x128x128xf32>
    %36 = vector.shape_cast %35 : vector<1x128x128xf32> to vector<128x128xf32>
    %cst_18 = arith.constant dense<0.000000e+00> : vector<256x128xf32>
    %37 = tpu.matmul %34, %36, %cst_18 {dimension_numbers = #tpu.dot_dimension_numbers<[1], [0], [0], [1], [0, 0, 1, 1], [], []>} : vector<256x128xf32>, vector<128x128xf32>, vector<256x128xf32> -> vector<256x128xf32>
    %c8 = arith.constant 8 : index
    %c0_19 = arith.constant 0 : index
    %38 = vector.load %arg9[%c8, %c0_19] : memref<304x128xf32, #tpu.memory_space<vmem>>, vector<256x128xf32>
    %c1 = arith.constant 1 : index
    %c0_20 = arith.constant 0 : index
    %c0_21 = arith.constant 0 : index
    %39 = vector.load %arg2[%c1, %c0_20, %c0_21] : memref<9x128x128xf32, #tpu.memory_space<vmem>>, vector<1x128x128xf32>
    %40 = vector.shape_cast %39 : vector<1x128x128xf32> to vector<128x128xf32>
    %cst_22 = arith.constant dense<0.000000e+00> : vector<256x128xf32>
    %41 = tpu.matmul %38, %40, %cst_22 {dimension_numbers = #tpu.dot_dimension_numbers<[1], [0], [0], [1], [0, 0, 1, 1], [], []>} : vector<256x128xf32>, vector<128x128xf32>, vector<256x128xf32> -> vector<256x128xf32>
    %42 = arith.addf %37, %41 : vector<256x128xf32>
    %c9 = arith.constant 9 : index
    %c0_23 = arith.constant 0 : index
    %43 = vector.load %arg9[%c9, %c0_23] : memref<304x128xf32, #tpu.memory_space<vmem>>, vector<256x128xf32>
    %cst_24 = arith.constant 0.000000e+00 : f32
    %44 = vector.broadcast %cst_24 : f32 to vector<256x128xf32>
    %45 = vector.shape_cast %29 : vector<256x1xi1> to vector<256x1xi1>
    %46 = vector.broadcast %45 : vector<256x1xi1> to vector<256x128xi1>
    %47 = arith.select %46, %43, %44 : vector<256x128xi1>, vector<256x128xf32>
    %c2 = arith.constant 2 : index
    %c0_25 = arith.constant 0 : index
    %c0_26 = arith.constant 0 : index
    %48 = vector.load %arg2[%c2, %c0_25, %c0_26] : memref<9x128x128xf32, #tpu.memory_space<vmem>>, vector<1x128x128xf32>
    %49 = vector.shape_cast %48 : vector<1x128x128xf32> to vector<128x128xf32>
    %cst_27 = arith.constant dense<0.000000e+00> : vector<256x128xf32>
    %50 = tpu.matmul %47, %49, %cst_27 {dimension_numbers = #tpu.dot_dimension_numbers<[1], [0], [0], [1], [0, 0, 1, 1], [], []>} : vector<256x128xf32>, vector<128x128xf32>, vector<256x128xf32> -> vector<256x128xf32>
    %51 = arith.addf %42, %50 : vector<256x128xf32>
    %c23 = arith.constant 23 : index
    %c0_28 = arith.constant 0 : index
    %52 = vector.load %arg9[%c23, %c0_28] : memref<304x128xf32, #tpu.memory_space<vmem>>, vector<256x128xf32>
    %cst_29 = arith.constant 0.000000e+00 : f32
    %53 = vector.broadcast %cst_29 : f32 to vector<256x128xf32>
    %54 = vector.shape_cast %27 : vector<256x1xi1> to vector<256x1xi1>
    %55 = vector.broadcast %54 : vector<256x1xi1> to vector<256x128xi1>
    %56 = arith.select %55, %52, %53 : vector<256x128xi1>, vector<256x128xf32>
    %c3 = arith.constant 3 : index
    %c0_30 = arith.constant 0 : index
    %c0_31 = arith.constant 0 : index
    %57 = vector.load %arg2[%c3, %c0_30, %c0_31] : memref<9x128x128xf32, #tpu.memory_space<vmem>>, vector<1x128x128xf32>
    %58 = vector.shape_cast %57 : vector<1x128x128xf32> to vector<128x128xf32>
    %cst_32 = arith.constant dense<0.000000e+00> : vector<256x128xf32>
    %59 = tpu.matmul %56, %58, %cst_32 {dimension_numbers = #tpu.dot_dimension_numbers<[1], [0], [0], [1], [0, 0, 1, 1], [], []>} : vector<256x128xf32>, vector<128x128xf32>, vector<256x128xf32> -> vector<256x128xf32>
    %60 = arith.addf %51, %59 : vector<256x128xf32>
    %c24_33 = arith.constant 24 : index
    %c0_34 = arith.constant 0 : index
    %61 = vector.load %arg9[%c24_33, %c0_34] : memref<304x128xf32, #tpu.memory_space<vmem>>, vector<256x128xf32>
    %c4_35 = arith.constant 4 : index
    %c0_36 = arith.constant 0 : index
    %c0_37 = arith.constant 0 : index
    %62 = vector.load %arg2[%c4_35, %c0_36, %c0_37] : memref<9x128x128xf32, #tpu.memory_space<vmem>>, vector<1x128x128xf32>
    %63 = vector.shape_cast %62 : vector<1x128x128xf32> to vector<128x128xf32>
    %cst_38 = arith.constant dense<0.000000e+00> : vector<256x128xf32>
    %64 = tpu.matmul %61, %63, %cst_38 {dimension_numbers = #tpu.dot_dimension_numbers<[1], [0], [0], [1], [0, 0, 1, 1], [], []>} : vector<256x128xf32>, vector<128x128xf32>, vector<256x128xf32> -> vector<256x128xf32>
    %65 = arith.addf %60, %64 : vector<256x128xf32>
    %c25 = arith.constant 25 : index
    %c0_39 = arith.constant 0 : index
    %66 = vector.load %arg9[%c25, %c0_39] : memref<304x128xf32, #tpu.memory_space<vmem>>, vector<256x128xf32>
    %cst_40 = arith.constant 0.000000e+00 : f32
    %67 = vector.broadcast %cst_40 : f32 to vector<256x128xf32>
    %68 = vector.shape_cast %29 : vector<256x1xi1> to vector<256x1xi1>
    %69 = vector.broadcast %68 : vector<256x1xi1> to vector<256x128xi1>
    %70 = arith.select %69, %66, %67 : vector<256x128xi1>, vector<256x128xf32>
    %c5 = arith.constant 5 : index
    %c0_41 = arith.constant 0 : index
    %c0_42 = arith.constant 0 : index
    %71 = vector.load %arg2[%c5, %c0_41, %c0_42] : memref<9x128x128xf32, #tpu.memory_space<vmem>>, vector<1x128x128xf32>
    %72 = vector.shape_cast %71 : vector<1x128x128xf32> to vector<128x128xf32>
    %cst_43 = arith.constant dense<0.000000e+00> : vector<256x128xf32>
    %73 = tpu.matmul %70, %72, %cst_43 {dimension_numbers = #tpu.dot_dimension_numbers<[1], [0], [0], [1], [0, 0, 1, 1], [], []>} : vector<256x128xf32>, vector<128x128xf32>, vector<256x128xf32> -> vector<256x128xf32>
    %74 = arith.addf %65, %73 : vector<256x128xf32>
    %c39 = arith.constant 39 : index
    %c0_44 = arith.constant 0 : index
    %75 = vector.load %arg9[%c39, %c0_44] : memref<304x128xf32, #tpu.memory_space<vmem>>, vector<256x128xf32>
    %cst_45 = arith.constant 0.000000e+00 : f32
    %76 = vector.broadcast %cst_45 : f32 to vector<256x128xf32>
    %77 = vector.shape_cast %27 : vector<256x1xi1> to vector<256x1xi1>
    %78 = vector.broadcast %77 : vector<256x1xi1> to vector<256x128xi1>
    %79 = arith.select %78, %75, %76 : vector<256x128xi1>, vector<256x128xf32>
    %c6 = arith.constant 6 : index
    %c0_46 = arith.constant 0 : index
    %c0_47 = arith.constant 0 : index
    %80 = vector.load %arg2[%c6, %c0_46, %c0_47] : memref<9x128x128xf32, #tpu.memory_space<vmem>>, vector<1x128x128xf32>
    %81 = vector.shape_cast %80 : vector<1x128x128xf32> to vector<128x128xf32>
    %cst_48 = arith.constant dense<0.000000e+00> : vector<256x128xf32>
    %82 = tpu.matmul %79, %81, %cst_48 {dimension_numbers = #tpu.dot_dimension_numbers<[1], [0], [0], [1], [0, 0, 1, 1], [], []>} : vector<256x128xf32>, vector<128x128xf32>, vector<256x128xf32> -> vector<256x128xf32>
    %83 = arith.addf %74, %82 : vector<256x128xf32>
    %c40 = arith.constant 40 : index
    %c0_49 = arith.constant 0 : index
    %84 = vector.load %arg9[%c40, %c0_49] : memref<304x128xf32, #tpu.memory_space<vmem>>, vector<256x128xf32>
    %c7_50 = arith.constant 7 : index
    %c0_51 = arith.constant 0 : index
    %c0_52 = arith.constant 0 : index
    %85 = vector.load %arg2[%c7_50, %c0_51, %c0_52] : memref<9x128x128xf32, #tpu.memory_space<vmem>>, vector<1x128x128xf32>
    %86 = vector.shape_cast %85 : vector<1x128x128xf32> to vector<128x128xf32>
    %cst_53 = arith.constant dense<0.000000e+00> : vector<256x128xf32>
    %87 = tpu.matmul %84, %86, %cst_53 {dimension_numbers = #tpu.dot_dimension_numbers<[1], [0], [0], [1], [0, 0, 1, 1], [], []>} : vector<256x128xf32>, vector<128x128xf32>, vector<256x128xf32> -> vector<256x128xf32>
    %88 = arith.addf %83, %87 : vector<256x128xf32>
    %c41 = arith.constant 41 : index
    %c0_54 = arith.constant 0 : index
    %89 = vector.load %arg9[%c41, %c0_54] : memref<304x128xf32, #tpu.memory_space<vmem>>, vector<256x128xf32>
    %cst_55 = arith.constant 0.000000e+00 : f32
    %90 = vector.broadcast %cst_55 : f32 to vector<256x128xf32>
    %91 = vector.shape_cast %29 : vector<256x1xi1> to vector<256x1xi1>
    %92 = vector.broadcast %91 : vector<256x1xi1> to vector<256x128xi1>
    %93 = arith.select %92, %89, %90 : vector<256x128xi1>, vector<256x128xf32>
    %c8_56 = arith.constant 8 : index
    %c0_57 = arith.constant 0 : index
    %c0_58 = arith.constant 0 : index
    %94 = vector.load %arg2[%c8_56, %c0_57, %c0_58] : memref<9x128x128xf32, #tpu.memory_space<vmem>>, vector<1x128x128xf32>
    %95 = vector.shape_cast %94 : vector<1x128x128xf32> to vector<128x128xf32>
    %cst_59 = arith.constant dense<0.000000e+00> : vector<256x128xf32>
    %96 = tpu.matmul %93, %95, %cst_59 {dimension_numbers = #tpu.dot_dimension_numbers<[1], [0], [0], [1], [0, 0, 1, 1], [], []>} : vector<256x128xf32>, vector<128x128xf32>, vector<256x128xf32> -> vector<256x128xf32>
    %97 = arith.addf %88, %96 : vector<256x128xf32>
    %c0_60 = arith.constant 0 : index
    %c0_61 = arith.constant 0 : index
    %98 = vector.load %arg4[%c0_60, %c0_61] : memref<1x128xf32, #tpu.memory_space<vmem>>, vector<1x128xf32>
    %99 = vector.broadcast %98 : vector<1x128xf32> to vector<256x128xf32>
    %100 = arith.mulf %97, %99 : vector<256x128xf32>
    %c0_62 = arith.constant 0 : index
    %c0_63 = arith.constant 0 : index
    %101 = vector.load %arg5[%c0_62, %c0_63] : memref<1x128xf32, #tpu.memory_space<vmem>>, vector<1x128xf32>
    %102 = vector.broadcast %101 : vector<1x128xf32> to vector<256x128xf32>
    %103 = arith.addf %100, %102 : vector<256x128xf32>
    %cst_64 = arith.constant 0.000000e+00 : f32
    %104 = vector.broadcast %cst_64 : f32 to vector<256x128xf32>
    %105 = arith.maximumf %103, %104 : vector<256x128xf32>
    %c24_65 = arith.constant 24 : index
    %c0_66 = arith.constant 0 : index
    %106 = vector.load %arg9[%c24_65, %c0_66] : memref<304x128xf32, #tpu.memory_space<vmem>>, vector<256x128xf32>
    tpu.vector_store %arg9[%c24_65, %c0_66], %105 {strides = array<i32>} : memref<304x128xf32, #tpu.memory_space<vmem>>, vector<256x128xf32>,
    %c7_67 = arith.constant 7 : index
    %c0_68 = arith.constant 0 : index
    %107 = vector.load %arg9[%c7_67, %c0_68] : memref<304x128xf32, #tpu.memory_space<vmem>>, vector<256x128xf32>
    %cst_69 = arith.constant 0.000000e+00 : f32
    %108 = vector.broadcast %cst_69 : f32 to vector<256x128xf32>
    %109 = vector.shape_cast %27 : vector<256x1xi1> to vector<256x1xi1>
    %110 = vector.broadcast %109 : vector<256x1xi1> to vector<256x128xi1>
    %111 = arith.select %110, %107, %108 : vector<256x128xi1>, vector<256x128xf32>
    %c0_70 = arith.constant 0 : index
    %c0_71 = arith.constant 0 : index
    %c0_72 = arith.constant 0 : index
    %112 = vector.load %arg3[%c0_70, %c0_71, %c0_72] : memref<9x128x128xf32, #tpu.memory_space<vmem>>, vector<1x128x128xf32>
    %113 = vector.shape_cast %112 : vector<1x128x128xf32> to vector<128x128xf32>
    %cst_73 = arith.constant dense<0.000000e+00> : vector<256x128xf32>
    %114 = tpu.matmul %111, %113, %cst_73 {dimension_numbers = #tpu.dot_dimension_numbers<[1], [0], [0], [1], [0, 0, 1, 1], [], []>} : vector<256x128xf32>, vector<128x128xf32>, vector<256x128xf32> -> vector<256x128xf32>
    %c8_74 = arith.constant 8 : index
    %c0_75 = arith.constant 0 : index
    %115 = vector.load %arg9[%c8_74, %c0_75] : memref<304x128xf32, #tpu.memory_space<vmem>>, vector<256x128xf32>
    %c1_76 = arith.constant 1 : index
    %c0_77 = arith.constant 0 : index
    %c0_78 = arith.constant 0 : index
    %116 = vector.load %arg3[%c1_76, %c0_77, %c0_78] : memref<9x128x128xf32, #tpu.memory_space<vmem>>, vector<1x128x128xf32>
    %117 = vector.shape_cast %116 : vector<1x128x128xf32> to vector<128x128xf32>
    %cst_79 = arith.constant dense<0.000000e+00> : vector<256x128xf32>
    %118 = tpu.matmul %115, %117, %cst_79 {dimension_numbers = #tpu.dot_dimension_numbers<[1], [0], [0], [1], [0, 0, 1, 1], [], []>} : vector<256x128xf32>, vector<128x128xf32>, vector<256x128xf32> -> vector<256x128xf32>
    %119 = arith.addf %114, %118 : vector<256x128xf32>
    %c9_80 = arith.constant 9 : index
    %c0_81 = arith.constant 0 : index
    %120 = vector.load %arg9[%c9_80, %c0_81] : memref<304x128xf32, #tpu.memory_space<vmem>>, vector<256x128xf32>
    %cst_82 = arith.constant 0.000000e+00 : f32
    %121 = vector.broadcast %cst_82 : f32 to vector<256x128xf32>
    %122 = vector.shape_cast %29 : vector<256x1xi1> to vector<256x1xi1>
    %123 = vector.broadcast %122 : vector<256x1xi1> to vector<256x128xi1>
    %124 = arith.select %123, %120, %121 : vector<256x128xi1>, vector<256x128xf32>
    %c2_83 = arith.constant 2 : index
    %c0_84 = arith.constant 0 : index
    %c0_85 = arith.constant 0 : index
    %125 = vector.load %arg3[%c2_83, %c0_84, %c0_85] : memref<9x128x128xf32, #tpu.memory_space<vmem>>, vector<1x128x128xf32>
    %126 = vector.shape_cast %125 : vector<1x128x128xf32> to vector<128x128xf32>
    %cst_86 = arith.constant dense<0.000000e+00> : vector<256x128xf32>
    %127 = tpu.matmul %124, %126, %cst_86 {dimension_numbers = #tpu.dot_dimension_numbers<[1], [0], [0], [1], [0, 0, 1, 1], [], []>} : vector<256x128xf32>, vector<128x128xf32>, vector<256x128xf32> -> vector<256x128xf32>
    %128 = arith.addf %119, %127 : vector<256x128xf32>
    %c23_87 = arith.constant 23 : index
    %c0_88 = arith.constant 0 : index
    %129 = vector.load %arg9[%c23_87, %c0_88] : memref<304x128xf32, #tpu.memory_space<vmem>>, vector<256x128xf32>
    %cst_89 = arith.constant 0.000000e+00 : f32
    %130 = vector.broadcast %cst_89 : f32 to vector<256x128xf32>
    %131 = vector.shape_cast %27 : vector<256x1xi1> to vector<256x1xi1>
    %132 = vector.broadcast %131 : vector<256x1xi1> to vector<256x128xi1>
    %133 = arith.select %132, %129, %130 : vector<256x128xi1>, vector<256x128xf32>
    %c3_90 = arith.constant 3 : index
    %c0_91 = arith.constant 0 : index
    %c0_92 = arith.constant 0 : index
    %134 = vector.load %arg3[%c3_90, %c0_91, %c0_92] : memref<9x128x128xf32, #tpu.memory_space<vmem>>, vector<1x128x128xf32>
    %135 = vector.shape_cast %134 : vector<1x128x128xf32> to vector<128x128xf32>
    %cst_93 = arith.constant dense<0.000000e+00> : vector<256x128xf32>
    %136 = tpu.matmul %133, %135, %cst_93 {dimension_numbers = #tpu.dot_dimension_numbers<[1], [0], [0], [1], [0, 0, 1, 1], [], []>} : vector<256x128xf32>, vector<128x128xf32>, vector<256x128xf32> -> vector<256x128xf32>
    %137 = arith.addf %128, %136 : vector<256x128xf32>
    %c24_94 = arith.constant 24 : index
    %c0_95 = arith.constant 0 : index
    %138 = vector.load %arg9[%c24_94, %c0_95] : memref<304x128xf32, #tpu.memory_space<vmem>>, vector<256x128xf32>
    %c4_96 = arith.constant 4 : index
    %c0_97 = arith.constant 0 : index
    %c0_98 = arith.constant 0 : index
    %139 = vector.load %arg3[%c4_96, %c0_97, %c0_98] : memref<9x128x128xf32, #tpu.memory_space<vmem>>, vector<1x128x128xf32>
    %140 = vector.shape_cast %139 : vector<1x128x128xf32> to vector<128x128xf32>
    %cst_99 = arith.constant dense<0.000000e+00> : vector<256x128xf32>
    %141 = tpu.matmul %138, %140, %cst_99 {dimension_numbers = #tpu.dot_dimension_numbers<[1], [0], [0], [1], [0, 0, 1, 1], [], []>} : vector<256x128xf32>, vector<128x128xf32>, vector<256x128xf32> -> vector<256x128xf32>
    %142 = arith.addf %137, %141 : vector<256x128xf32>
    %c25_100 = arith.constant 25 : index
    %c0_101 = arith.constant 0 : index
    %143 = vector.load %arg9[%c25_100, %c0_101] : memref<304x128xf32, #tpu.memory_space<vmem>>, vector<256x128xf32>
    %cst_102 = arith.constant 0.000000e+00 : f32
    %144 = vector.broadcast %cst_102 : f32 to vector<256x128xf32>
    %145 = vector.shape_cast %29 : vector<256x1xi1> to vector<256x1xi1>
    %146 = vector.broadcast %145 : vector<256x1xi1> to vector<256x128xi1>
    %147 = arith.select %146, %143, %144 : vector<256x128xi1>, vector<256x128xf32>
    %c5_103 = arith.constant 5 : index
    %c0_104 = arith.constant 0 : index
    %c0_105 = arith.constant 0 : index
    %148 = vector.load %arg3[%c5_103, %c0_104, %c0_105] : memref<9x128x128xf32, #tpu.memory_space<vmem>>, vector<1x128x128xf32>
    %149 = vector.shape_cast %148 : vector<1x128x128xf32> to vector<128x128xf32>
    %cst_106 = arith.constant dense<0.000000e+00> : vector<256x128xf32>
    %150 = tpu.matmul %147, %149, %cst_106 {dimension_numbers = #tpu.dot_dimension_numbers<[1], [0], [0], [1], [0, 0, 1, 1], [], []>} : vector<256x128xf32>, vector<128x128xf32>, vector<256x128xf32> -> vector<256x128xf32>
    %151 = arith.addf %142, %150 : vector<256x128xf32>
    %c39_107 = arith.constant 39 : index
    %c0_108 = arith.constant 0 : index
    %152 = vector.load %arg9[%c39_107, %c0_108] : memref<304x128xf32, #tpu.memory_space<vmem>>, vector<256x128xf32>
    %cst_109 = arith.constant 0.000000e+00 : f32
    %153 = vector.broadcast %cst_109 : f32 to vector<256x128xf32>
    %154 = vector.shape_cast %27 : vector<256x1xi1> to vector<256x1xi1>
    %155 = vector.broadcast %154 : vector<256x1xi1> to vector<256x128xi1>
    %156 = arith.select %155, %152, %153 : vector<256x128xi1>, vector<256x128xf32>
    %c6_110 = arith.constant 6 : index
    %c0_111 = arith.constant 0 : index
    %c0_112 = arith.constant 0 : index
    %157 = vector.load %arg3[%c6_110, %c0_111, %c0_112] : memref<9x128x128xf32, #tpu.memory_space<vmem>>, vector<1x128x128xf32>
    %158 = vector.shape_cast %157 : vector<1x128x128xf32> to vector<128x128xf32>
    %cst_113 = arith.constant dense<0.000000e+00> : vector<256x128xf32>
    %159 = tpu.matmul %156, %158, %cst_113 {dimension_numbers = #tpu.dot_dimension_numbers<[1], [0], [0], [1], [0, 0, 1, 1], [], []>} : vector<256x128xf32>, vector<128x128xf32>, vector<256x128xf32> -> vector<256x128xf32>
    %160 = arith.addf %151, %159 : vector<256x128xf32>
    %c40_114 = arith.constant 40 : index
    %c0_115 = arith.constant 0 : index
    %161 = vector.load %arg9[%c40_114, %c0_115] : memref<304x128xf32, #tpu.memory_space<vmem>>, vector<256x128xf32>
    %c7_116 = arith.constant 7 : index
    %c0_117 = arith.constant 0 : index
    %c0_118 = arith.constant 0 : index
    %162 = vector.load %arg3[%c7_116, %c0_117, %c0_118] : memref<9x128x128xf32, #tpu.memory_space<vmem>>, vector<1x128x128xf32>
    %163 = vector.shape_cast %162 : vector<1x128x128xf32> to vector<128x128xf32>
    %cst_119 = arith.constant dense<0.000000e+00> : vector<256x128xf32>
    %164 = tpu.matmul %161, %163, %cst_119 {dimension_numbers = #tpu.dot_dimension_numbers<[1], [0], [0], [1], [0, 0, 1, 1], [], []>} : vector<256x128xf32>, vector<128x128xf32>, vector<256x128xf32> -> vector<256x128xf32>
    %165 = arith.addf %160, %164 : vector<256x128xf32>
    %c41_120 = arith.constant 41 : index
    %c0_121 = arith.constant 0 : index
    %166 = vector.load %arg9[%c41_120, %c0_121] : memref<304x128xf32, #tpu.memory_space<vmem>>, vector<256x128xf32>
    %cst_122 = arith.constant 0.000000e+00 : f32
    %167 = vector.broadcast %cst_122 : f32 to vector<256x128xf32>
    %168 = vector.shape_cast %29 : vector<256x1xi1> to vector<256x1xi1>
    %169 = vector.broadcast %168 : vector<256x1xi1> to vector<256x128xi1>
    %170 = arith.select %169, %166, %167 : vector<256x128xi1>, vector<256x128xf32>
    %c8_123 = arith.constant 8 : index
    %c0_124 = arith.constant 0 : index
    %c0_125 = arith.constant 0 : index
    %171 = vector.load %arg3[%c8_123, %c0_124, %c0_125] : memref<9x128x128xf32, #tpu.memory_space<vmem>>, vector<1x128x128xf32>
    %172 = vector.shape_cast %171 : vector<1x128x128xf32> to vector<128x128xf32>
    %cst_126 = arith.constant dense<0.000000e+00> : vector<256x128xf32>
    %173 = tpu.matmul %170, %172, %cst_126 {dimension_numbers = #tpu.dot_dimension_numbers<[1], [0], [0], [1], [0, 0, 1, 1], [], []>} : vector<256x128xf32>, vector<128x128xf32>, vector<256x128xf32> -> vector<256x128xf32>
    %174 = arith.addf %165, %173 : vector<256x128xf32>
    %175 = vector.extract_strided_slice %174 {offsets = [0, 0], sizes = [256, 4], strides = [1, 1]} : vector<256x128xf32> to vector<256x4xf32>
    %c0_127 = arith.constant 0 : index
    %c0_128 = arith.constant 0 : index
    %176 = vector.load %arg6[%c0_127, %c0_128] : memref<1x4xf32, #tpu.memory_space<vmem>>, vector<1x4xf32>
    %177 = vector.broadcast %176 : vector<1x4xf32> to vector<256x4xf32>
    %178 = arith.mulf %175, %177 : vector<256x4xf32>
    %c0_129 = arith.constant 0 : index
    %c0_130 = arith.constant 0 : index
    %179 = vector.load %arg7[%c0_129, %c0_130] : memref<1x4xf32, #tpu.memory_space<vmem>>, vector<1x4xf32>
    %180 = vector.broadcast %179 : vector<1x4xf32> to vector<256x4xf32>
    %181 = arith.addf %178, %180 : vector<256x4xf32>
    %c0_131 = arith.constant 0 : index
    %c0_132 = arith.constant 0 : index
    %c0_133 = arith.constant 0 : index
    %182 = vector.load %arg1[%c0_131, %c0_132, %c0_133] : memref<1x256x4xf32, #tpu.memory_space<vmem>>, vector<1x256x4xf32>
    %183 = vector.shape_cast %182 : vector<1x256x4xf32> to vector<256x4xf32>
    %184 = arith.addf %181, %183 : vector<256x4xf32>
    %cst_134 = arith.constant 0.000000e+00 : f32
    %185 = vector.broadcast %cst_134 : f32 to vector<256x4xf32>
    %186 = arith.maximumf %184, %185 : vector<256x4xf32>
    %c0_135 = arith.constant 0 : index
    %c0_136 = arith.constant 0 : index
    %c0_137 = arith.constant 0 : index
    %187 = vector.load %arg8[%c0_135, %c0_136, %c0_137] : memref<1x256x4xf32, #tpu.memory_space<vmem>>, vector<1x256x4xf32>
    %188 = vector.shape_cast %187 : vector<1x256x4xf32> to vector<256x4xf32>
    %189 = vector.shape_cast %186 : vector<256x4xf32> to vector<1x256x4xf32>
    tpu.vector_store %arg8[%c0_135, %c0_136, %c0_137], %189 {strides = array<i32>} : memref<1x256x4xf32, #tpu.memory_space<vmem>>, vector<1x256x4xf32>,
    return
  }
  func.func @transform_0(%arg0: i32) -> (i32, i32, i32) {
    %c0_i32 = arith.constant 0 : i32
    %c0_i32_0 = arith.constant 0 : i32
    %c0_i32_1 = arith.constant 0 : i32
    return %arg0, %c0_i32, %c0_i32_0 : i32, i32, i32
  }
  func.func @transform_1(%arg0: i32) -> (i32, i32, i32) {
    %c0_i32 = arith.constant 0 : i32
    %c0_i32_0 = arith.constant 0 : i32
    %c0_i32_1 = arith.constant 0 : i32
    %c0_i32_2 = arith.constant 0 : i32
    return %c0_i32, %c0_i32_0, %c0_i32_1 : i32, i32, i32
  }
  func.func @transform_2(%arg0: i32) -> (i32, i32, i32) {
    %c0_i32 = arith.constant 0 : i32
    %c0_i32_0 = arith.constant 0 : i32
    %c0_i32_1 = arith.constant 0 : i32
    %c0_i32_2 = arith.constant 0 : i32
    return %c0_i32, %c0_i32_0, %c0_i32_1 : i32, i32, i32
  }
  func.func @transform_3(%arg0: i32) -> (i32, i32) {
    %c0_i32 = arith.constant 0 : i32
    %c0_i32_0 = arith.constant 0 : i32
    %c0_i32_1 = arith.constant 0 : i32
    return %c0_i32, %c0_i32_0 : i32, i32
  }
  func.func @transform_4(%arg0: i32) -> (i32, i32) {
    %c0_i32 = arith.constant 0 : i32
    %c0_i32_0 = arith.constant 0 : i32
    %c0_i32_1 = arith.constant 0 : i32
    return %c0_i32, %c0_i32_0 : i32, i32
  }
  func.func @transform_5(%arg0: i32) -> (i32, i32) {
    %c0_i32 = arith.constant 0 : i32
    %c0_i32_0 = arith.constant 0 : i32
    %c0_i32_1 = arith.constant 0 : i32
    return %c0_i32, %c0_i32_0 : i32, i32
  }
  func.func @transform_6(%arg0: i32) -> (i32, i32) {
    %c0_i32 = arith.constant 0 : i32
    %c0_i32_0 = arith.constant 0 : i32
    %c0_i32_1 = arith.constant 0 : i32
    return %c0_i32, %c0_i32_0 : i32, i32
  }
  func.func @transform_7(%arg0: i32) -> (i32, i32, i32) {
    %c0_i32 = arith.constant 0 : i32
    %c0_i32_0 = arith.constant 0 : i32
    %c0_i32_1 = arith.constant 0 : i32
    return %arg0, %c0_i32, %c0_i32_0 : i32, i32, i32
  }
}

</mosaic_0001>

<bundles_post_ra>
// kernel: basic_block_forward.1
= control target key start
LH: loop header
LB: loop body
LE: loop exit
PB: predicated region body
PF: predicated region fallthrough
CT: control target
= control target key end

     0   :  { %s11074_s24 = smov 0   ;;  %s13712_s0 = inlined_call_operand.vmem [shape: f32[2,256,4], index: 0, kind: input, shape index: {}]   ;;  %s13713_s1 = inlined_call_operand.vmem [shape: f32[9,128,128], index: 1, kind: input, shape index: {}]   ;;  %s13714_s2 = inlined_call_operand.vmem [shape: f32[9,128,128], index: 2, kind: input, shape index: {}]   ;;  %s13715_s3 = inlined_call_operand.vmem [shape: f32[1,128], index: 3, kind: input, shape index: {}]   ;;  %s13716_s4 = inlined_call_operand.vmem [shape: f32[1,128], index: 4, kind: input, shape index: {}]   ;;  %s13717_s5 = inlined_call_operand.vmem [shape: f32[1,4], index: 5, kind: input, shape index: {}]   ;;  %s13718_s6 = inlined_call_operand.vmem [shape: f32[1,4], index: 6, kind: input, shape index: {}]   ;;  %s13719_s7 = inlined_call_operand.vmem [shape: f32[2,256,4], index: 7, kind: output, shape index: {}]  }
   0x1 LB: > { %s7157_s25 = sadd.s32 4294967295, %s11031_s24   ;;  %p7161_p0 = scmp.ge.s32.totalorder %s11031_s24, 1  ;;  %s11031_s24 = sphi %s11074_s24, %s17_s24  }
   0x2   : > { %p237_p1 = scmp.lt.s32.totalorder %s11031_s24, 3 }
   0x4   : > { %p238_p2 = pnand %p7161_p0, %p237_p1 }
   0x6   : > { %241 = sbr.rel (%p238_p2) target bundleno = 1570 (0x622), region = 48 }
   0xd   : > { %v7166_v0 = vld [vmem:[%s13713_s1 + $0x80] sm:$0xff]  ;;  %v7167_v1 = vld [vmem:[%s13713_s1 + $0x88] sm:$0xff]  ;;  %v7168_v2 = vld [vmem:[%s13713_s1 + $0x90] sm:$0xff]  ;;  %p11091_p3 = scmp.lt.s32.totalorder %s7157_s25, 1  ;;  %v11033_v5 = vmov 0.0   ;;  %vm13725_vm0 = vcmask 31744  }
   0xe   : > { %v9926_v3 = vpack.c.bf16 %v7167_v1, %v7166_v0  ;;  %v7169_v4 = vld [vmem:[%s13713_s1 + $0x98] sm:$0xff]  ;;  %280 = vst [vmem:[#allocation2 + $0x8] sm:$0xff] %v11033_v5  ;;  %8518 = vmatprep.mubr.f32.mxu0 %v11033_v5  ;;  %279 = vst [vmem:[#allocation2] sm:$0xff] %v11033_v5  ;;  %9238 = vmatprep.mubr.f32.mxu1 %v11033_v5  ;;  %v7170_v7 = vld [vmem:[%s13713_s1 + $0xa0] sm:$0xff]  ;;  %vm13720_vm1 = vcmask 1047584  }
   0xf   : > { %281 = vst [vmem:[#allocation2 + $0x10] sm:$0xff] %v11033_v5  ;;  %282 = vst [vmem:[#allocation2 + $0x118] sm:$0xff] %v11033_v5  ;;  %v9930_v6 = vpack.c.bf16 %v7169_v4, %v7168_v2  ;;  %v7171_v8 = vld [vmem:[%s13713_s1 + $0xa8] sm:$0xff]  ;;  %s14336_s25 = smov (!%p11091_p3, %s7157_s25), 1  ;;  %v7172_v10 = vld [vmem:[%s13713_s1 + $0xb0] sm:$0xff] }
  0x10   : > { %283 = vst [vmem:[#allocation2 + $0x120] sm:$0xff] %v11033_v5  ;;  %284 = vst [vmem:[#allocation2 + $0x128] sm:$0xff] %v11033_v5  ;;  %9927 = vmatprep.subr.bf16.mxu0 %v9926_v3  ;;  %s7620_s16 = sshll.u32 %s14336_s25, 8  ;;  %v9934_v9 = vpack.c.bf16 %v7171_v8, %v7170_v7  ;;  %v7173_v11 = vld [vmem:[%s13713_s1 + $0xb8] sm:$0xff]  ;;  %v7174_v20 = vld [vmem:[%s13713_s1 + $0xc0] sm:$0xff] }
  0x11   : > { %9929 = vmatpush3.bf16.msra.mxu0 %v9926_v3  ;;  %s11128_s23 = scalar_lea.vmem %s13712_s0, %s7620_s16  ;;  %v9938_v19 = vpack.c.bf16 %v7173_v11, %v7172_v10  ;;  %v7175_v21 = vld [vmem:[%s13713_s1 + $0xc8] sm:$0xff]  ;;  %v7176_v31 = vld [vmem:[%s13713_s1 + $0xd0] sm:$0xff]  ;;  %v7177_v32 = vld [vmem:[%s13713_s1 + $0xd8] sm:$0xff]  ;;  %s13554_s26 = scalar_lea.vmem %s13719_s7, %s7620_s16 }
  0x12   : > { %9931 = vmatprep.subr.bf16.mxu0 %v9930_v6  ;;  %v285_v12 = vld [vmem:[%s11128_s23] sm:$0xff]  ;;  %v286_v13 = vld [vmem:[%s11128_s23 + $0x8] sm:$0xff]  ;;  %v287_v14 = vld [vmem:[%s11128_s23 + $0x10] sm:$0xff]  ;;  %v9942_v30 = vpack.c.bf16 %v7175_v21, %v7174_v20  ;;  %v9946_v38 = vpack.c.bf16 %v7177_v32, %v7176_v31 }
  0x13   : > { %318 = vst.msk [vmem:[#allocation2 + $0x18] sm:$0xff] %vm13725_vm0, %v285_v12  ;;  %319 = vst.msk [vmem:[#allocation2 + $0x20] sm:$0xff] %vm13725_vm0, %v286_v13  ;;  %v288_v15 = vld [vmem:[%s11128_s23 + $0x18] sm:$0xff]  ;;  %v289_v16 = vld [vmem:[%s11128_s23 + $0x20] sm:$0xff] }
  0x14   : > { %320 = vst.msk [vmem:[#allocation2 + $0x28] sm:$0xff] %vm13725_vm0, %v287_v14  ;;  %321 = vst.msk [vmem:[#allocation2 + $0x30] sm:$0xff] %vm13725_vm0, %v288_v15  ;;  %v290_v17 = vld [vmem:[%s11128_s23 + $0x28] sm:$0xff]  ;;  %v291_v18 = vld [vmem:[%s11128_s23 + $0x30] sm:$0xff] }
  0x15   : > { %9933 = vmatpush3.bf16.msra.mxu0 %v9930_v6  ;;  %351 = vst.msk [vmem:[#allocation2 + $0x18] sm:$0xff] %vm13720_vm1, %v11033_v5  ;;  %352 = vst.msk [vmem:[#allocation2 + $0x20] sm:$0xff] %vm13720_vm1, %v11033_v5  ;;  %v292_v22 = vld [vmem:[%s11128_s23 + $0x38] sm:$0xff]  ;;  %v293_v23 = vld [vmem:[%s11128_s23 + $0x40] sm:$0xff] }
  0x16   : > { %353 = vst.msk [vmem:[#allocation2 + $0x28] sm:$0xff] %vm13720_vm1, %v11033_v5  ;;  %9935 = vmatprep.subr.bf16.mxu0 %v9934_v9  ;;  %354 = vst.msk [vmem:[#allocation2 + $0x30] sm:$0xff] %vm13720_vm1, %v11033_v5  ;;  %v294_v24 = vld [vmem:[%s11128_s23 + $0x48] sm:$0xff]  ;;  %v295_v25 = vld [vmem:[%s11128_s23 + $0x50] sm:$0xff] }
  0x17   : > { %322 = vst.msk [vmem:[#allocation2 + $0x38] sm:$0xff] %vm13725_vm0, %v289_v16  ;;  %323 = vst.msk [vmem:[#allocation2 + $0x40] sm:$0xff] %vm13725_vm0, %v290_v17  ;;  %v296_v26 = vld [vmem:[%s11128_s23 + $0x58] sm:$0xff]  ;;  %v297_v27 = vld [vmem:[%s11128_s23 + $0x60] sm:$0xff] }
  0x18   : > { %324 = vst.msk [vmem:[#allocation2 + $0x48] sm:$0xff] %vm13725_vm0, %v291_v18  ;;  %325 = vst.msk [vmem:[#allocation2 + $0x50] sm:$0xff] %vm13725_vm0, %v292_v22  ;;  %v298_v28 = vld [vmem:[%s11128_s23 + $0x68] sm:$0xff]  ;;  %v299_v29 = vld [vmem:[%s11128_s23 + $0x70] sm:$0xff] }
  0x19   : > { %355 = vst.msk [vmem:[#allocation2 + $0x38] sm:$0xff] %vm13720_vm1, %v11033_v5  ;;  %356 = vst.msk [vmem:[#allocation2 + $0x40] sm:$0xff] %vm13720_vm1, %v11033_v5  ;;  %9937 = vmatpush3.bf16.msra.mxu0 %v9934_v9  ;;  %v300_v33 = vld [vmem:[%s11128_s23 + $0x78] sm:$0xff]  ;;  %v301_v34 = vld [vmem:[%s11128_s23 + $0x80] sm:$0xff] }
  0x1a   : > { %357 = vst.msk [vmem:[#allocation2 + $0x48] sm:$0xff] %vm13720_vm1, %v11033_v5  ;;  %358 = vst.msk [vmem:[#allocation2 + $0x50] sm:$0xff] %vm13720_vm1, %v11033_v5  ;;  %9939 = vmatprep.subr.bf16.mxu0 %v9938_v19  ;;  %v302_v35 = vld [vmem:[%s11128_s23 + $0x88] sm:$0xff]  ;;  %v303_v36 = vld [vmem:[%s11128_s23 + $0x90] sm:$0xff] }
  0x1b   : > { %326 = vst.msk [vmem:[#allocation2 + $0x58] sm:$0xff] %vm13725_vm0, %v293_v23  ;;  %327 = vst.msk [vmem:[#allocation2 + $0x60] sm:$0xff] %vm13725_vm0, %v294_v24  ;;  %v304_v37 = vld [vmem:[%s11128_s23 + $0x98] sm:$0xff]  ;;  %v7178_v39 = vld [vmem:[%s13713_s1 + $0xe0] sm:$0xff] }
  0x1c   : > { %328 = vst.msk [vmem:[#allocation2 + $0x68] sm:$0xff] %vm13725_vm0, %v295_v25  ;;  %329 = vst.msk [vmem:[#allocation2 + $0x70] sm:$0xff] %vm13725_vm0, %v296_v26  ;;  %v7179_v40 = vld [vmem:[%s13713_s1 + $0xe8] sm:$0xff]  ;;  %v305_v41 = vld [vmem:[%s11128_s23 + $0xa0] sm:$0xff] }
  0x1d   : > { %359 = vst.msk [vmem:[#allocation2 + $0x58] sm:$0xff] %vm13720_vm1, %v11033_v5  ;;  %360 = vst.msk [vmem:[#allocation2 + $0x60] sm:$0xff] %vm13720_vm1, %v11033_v5  ;;  %9941 = vmatpush3.bf16.msra.mxu0 %v9938_v19  ;;  %v306_v42 = vld [vmem:[%s11128_s23 + $0xa8] sm:$0xff]  ;;  %v307_v43 = vld [vmem:[%s11128_s23 + $0xb0] sm:$0xff]  ;;  %v9950_v44 = vpack.c.bf16 %v7179_v40, %v7178_v39 }
  0x1e   : > { %361 = vst.msk [vmem:[#allocation2 + $0x68] sm:$0xff] %vm13720_vm1, %v11033_v5  ;;  %362 = vst.msk [vmem:[#allocation2 + $0x70] sm:$0xff] %vm13720_vm1, %v11033_v5  ;;  %9943 = vmatprep.subr.bf16.mxu0 %v9942_v30  ;;  %v7180_v45 = vld [vmem:[%s13713_s1 + $0xf0] sm:$0xff]  ;;  %v7181_v46 = vld [vmem:[%s13713_s1 + $0xf8] sm:$0xff] }
  0x1f   : > { %330 = vst.msk [vmem:[#allocation2 + $0x78] sm:$0xff] %vm13725_vm0, %v297_v27  ;;  %331 = vst.msk [vmem:[#allocation2 + $0x80] sm:$0xff] %vm13725_vm0, %v298_v28  ;;  %v308_v47 = vld [vmem:[%s11128_s23 + $0xb8] sm:$0xff]  ;;  %v309_v48 = vld [vmem:[%s11128_s23 + $0xc0] sm:$0xff]  ;;  %v9954_v50 = vpack.c.bf16 %v7181_v46, %v7180_v45 }
  0x20   : > { %332 = vst.msk [vmem:[#allocation2 + $0x88] sm:$0xff] %vm13725_vm0, %v299_v29  ;;  %333 = vst.msk [vmem:[#allocation2 + $0x90] sm:$0xff] %vm13725_vm0, %v300_v33  ;;  %v310_v49 = vld [vmem:[%s11128_s23 + $0xc8] sm:$0xff]  ;;  %v311_v51 = vld [vmem:[%s11128_s23 + $0xd0] sm:$0xff] }
  0x21   : > { %363 = vst.msk [vmem:[#allocation2 + $0x78] sm:$0xff] %vm13720_vm1, %v11033_v5  ;;  %364 = vst.msk [vmem:[#allocation2 + $0x80] sm:$0xff] %vm13720_vm1, %v11033_v5  ;;  %9945 = vmatpush3.bf16.msra.mxu0 %v9942_v30  ;;  %v312_v52 = vld [vmem:[%s11128_s23 + $0xd8] sm:$0xff]  ;;  %v992_v53 = vld [vmem:[%s13713_s1] sm:$0xff] }
  0x22   : > { %365 = vst.msk [vmem:[#allocation2 + $0x88] sm:$0xff] %vm13720_vm1, %v11033_v5  ;;  %366 = vst.msk [vmem:[#allocation2 + $0x90] sm:$0xff] %vm13720_vm1, %v11033_v5  ;;  %9947 = vmatprep.subr.bf16.mxu0 %v9946_v38  ;;  %v993_v54 = vld [vmem:[%s13713_s1 + $0x8] sm:$0xff]  ;;  %v313_v55 = vld [vmem:[%s11128_s23 + $0xe0] sm:$0xff] }
  0x23   : > { %334 = vst.msk [vmem:[#allocation2 + $0x98] sm:$0xff] %vm13725_vm0, %v301_v34  ;;  %335 = vst.msk [vmem:[#allocation2 + $0xa0] sm:$0xff] %vm13725_vm0, %v302_v35  ;;  %v314_v56 = vld [vmem:[%s11128_s23 + $0xe8] sm:$0xff]  ;;  %v9958_v57 = vpack.c.bf16 %v993_v54, %v992_v53  ;;  %v994_v58 = vld [vmem:[%s13713_s1 + $0x10] sm:$0xff]  ;;  %v13927_v54 = vmov 0 }
  0x24   : > { %336 = vst.msk [vmem:[#allocation2 + $0xa8] sm:$0xff] %vm13725_vm0, %v303_v36  ;;  %337 = vst.msk [vmem:[#allocation2 + $0xb0] sm:$0xff] %vm13725_vm0, %v304_v37  ;;  %v995_v59 = vld [vmem:[%s13713_s1 + $0x18] sm:$0xff]  ;;  %v996_v62 = vld [vmem:[%s13713_s1 + $0x20] sm:$0xff] }
  0x25   : > { %367 = vst.msk [vmem:[#allocation2 + $0x98] sm:$0xff] %vm13720_vm1, %v11033_v5  ;;  %368 = vst.msk [vmem:[#allocation2 + $0xa0] sm:$0xff] %vm13720_vm1, %v11033_v5  ;;  %9949 = vmatpush3.bf16.msra.mxu0 %v9946_v38  ;;  %v1010_v60 = vld [vmem:[#allocation2 + $0x18] sm:$0xff]  ;;  %v9962_v61 = vpack.c.bf16 %v995_v59, %v994_v58  ;;  %v997_v63 = vld [vmem:[%s13713_s1 + $0x28] sm:$0xff] }
  0x26   : > { %369 = vst.msk [vmem:[#allocation2 + $0xa8] sm:$0xff] %vm13720_vm1, %v11033_v5  ;;  %370 = vst.msk [vmem:[#allocation2 + $0xb0] sm:$0xff] %vm13720_vm1, %v11033_v5  ;;  %9951 = vmatprep.subr.bf16.mxu0 %v9950_v44  ;;  %v1011_v0 = vld [vmem:[#allocation2 + $0x20] sm:$0xff]  ;;  %v1012_v1 = vld [vmem:[#allocation2 + $0x28] sm:$0xff]  ;;  %v9966_v2 = vpack.c.bf16 %v997_v63, %v996_v62 }
  0x27   : > { %338 = vst.msk [vmem:[#allocation2 + $0xb8] sm:$0xff] %vm13725_vm0, %v305_v41  ;;  %339 = vst.msk [vmem:[#allocation2 + $0xc0] sm:$0xff] %vm13725_vm0, %v306_v42  ;;  %v998_v3 = vld [vmem:[%s13713_s1 + $0x30] sm:$0xff]  ;;  %v999_v4 = vld [vmem:[%s13713_s1 + $0x38] sm:$0xff] }
  0x28   : > { %371 = vst.msk [vmem:[#allocation2 + $0xb8] sm:$0xff] %vm13720_vm1, %v11033_v5  ;;  %372 = vst.msk [vmem:[#allocation2 + $0xc0] sm:$0xff] %vm13720_vm1, %v11033_v5  ;;  %v1013_v6 = vld [vmem:[#allocation2 + $0x30] sm:$0xff]  ;;  %v1014_v7 = vld [vmem:[#allocation2 + $0x38] sm:$0xff]  ;;  %v9970_v8 = vpack.c.bf16 %v999_v4, %v998_v3 }
  0x29   : > { %340 = vst.msk [vmem:[#allocation2 + $0xc8] sm:$0xff] %vm13725_vm0, %v307_v43  ;;  %341 = vst.msk [vmem:[#allocation2 + $0xd0] sm:$0xff] %vm13725_vm0, %v308_v47  ;;  %9953 = vmatpush3.bf16.msra.mxu0 %v9950_v44  ;;  %v1000_v9 = vld [vmem:[%s13713_s1 + $0x40] sm:$0xff]  ;;  %v1001_v10 = vld [vmem:[%s13713_s1 + $0x48] sm:$0xff]  ;;  %v383_v44 = vlaneseq }
  0x2a   : > { %373 = vst.msk [vmem:[#allocation2 + $0xc8] sm:$0xff] %vm13720_vm1, %v11033_v5  ;;  %374 = vst.msk [vmem:[#allocation2 + $0xd0] sm:$0xff] %vm13720_vm1, %v11033_v5  ;;  %9955 = vmatprep.subr.bf16.mxu0 %v9954_v50  ;;  %v1015_v11 = vld [vmem:[#allocation2 + $0x40] sm:$0xff]  ;;  %v1016_v12 = vld [vmem:[#allocation2 + $0x48] sm:$0xff]  ;;  %v9974_v13 = vpack.c.bf16 %v1001_v10, %v1000_v9 }
  0x2b   : > { %342 = vst.msk [vmem:[#allocation2 + $0xd8] sm:$0xff] %vm13725_vm0, %v309_v48  ;;  %343 = vst.msk [vmem:[#allocation2 + $0xe0] sm:$0xff] %vm13725_vm0, %v310_v49  ;;  %v1002_v14 = vld [vmem:[%s13713_s1 + $0x50] sm:$0xff]  ;;  %v1003_v15 = vld [vmem:[%s13713_s1 + $0x58] sm:$0xff]  ;;  %v11329_v47 = vshrl.u32 %v383_v44, 7 }
  0x2c   : > { %375 = vst.msk [vmem:[#allocation2 + $0xd8] sm:$0xff] %vm13720_vm1, %v11033_v5  ;;  %376 = vst.msk [vmem:[#allocation2 + $0xe0] sm:$0xff] %vm13720_vm1, %v11033_v5  ;;  %v1017_v16 = vld [vmem:[#allocation2 + $0x50] sm:$0xff]  ;;  %v1018_v17 = vld [vmem:[#allocation2 + $0x58] sm:$0xff]  ;;  %v9978_v18 = vpack.c.bf16 %v1003_v15, %v1002_v14  ;;  %v13933_v14 = vmov 0 }
  0x2d   : > { %344 = vst.msk [vmem:[#allocation2 + $0xe8] sm:$0xff] %vm13725_vm0, %v311_v51  ;;  %345 = vst.msk [vmem:[#allocation2 + $0xf0] sm:$0xff] %vm13725_vm0, %v312_v52  ;;  %9957 = vmatpush3.bf16.msra.mxu0 %v9954_v50  ;;  %v1004_v19 = vld [vmem:[%s13713_s1 + $0x60] sm:$0xff]  ;;  %v1005_v20 = vld [vmem:[%s13713_s1 + $0x68] sm:$0xff]  ;;  %v420_v51 = vand.u32 15, %v11329_v47  ;;  %v386_v52 = vadd.s32 16, %v11329_v47 }
  0x2e   : > { %377 = vst.msk [vmem:[#allocation2 + $0xe8] sm:$0xff] %vm13720_vm1, %v11033_v5  ;;  %378 = vst.msk [vmem:[#allocation2 + $0xf0] sm:$0xff] %vm13720_vm1, %v11033_v5  ;;  %9959 = vmatprep.subr.bf16.mxu0 %v9958_v57  ;;  %v1019_v21 = vld [vmem:[#allocation2 + $0x60] sm:$0xff]  ;;  %v1020_v22 = vld [vmem:[#allocation2 + $0x68] sm:$0xff]  ;;  %v9982_v23 = vpack.c.bf16 %v1005_v20, %v1004_v19  ;;  %v392_v9 = vadd.s32 64, %v11329_v47 }
  0x2f   : > { %346 = vst.msk [vmem:[#allocation2 + $0xf8] sm:$0xff] %vm13725_vm0, %v313_v55  ;;  %347 = vst.msk [vmem:[#allocation2 + $0x100] sm:$0xff] %vm13725_vm0, %v314_v56  ;;  %v1006_v24 = vld [vmem:[%s13713_s1 + $0x70] sm:$0xff]  ;;  %v1007_v25 = vld [vmem:[%s13713_s1 + $0x78] sm:$0xff]  ;;  %vm11339_vm2 = vcmp.ge.s32.totalorder %v420_v51, 1  ;;  %v434_v56 = vand.u32 15, %v386_v52 }
  0x30   : > { %379 = vst.msk [vmem:[#allocation2 + $0xf8] sm:$0xff] %vm13720_vm1, %v11033_v5  ;;  %380 = vst.msk [vmem:[#allocation2 + $0x100] sm:$0xff] %vm13720_vm1, %v11033_v5  ;;  %8519 = vmatmul.mubr.f32.vlgmr.msra.gmra.mrb[0].mxu0 %v11033_v5  ;;  %v1021_v26 = vld [vmem:[#allocation2 + $0x70] sm:$0xff]  ;;  %v1022_v27 = vld [vmem:[#allocation2 + $0x78] sm:$0xff]  ;;  %v9986_v28 = vpack.c.bf16 %v1007_v25, %v1006_v24  ;;  %v13928_v54 = vsel %vm11339_vm2, 4294967295, %v13927_v54  ;;  %v396_v25 = vadd.s32 96, %v11329_v47 }
  0x31   : > { %9961 = vmatpush3.bf16.msra.mxu0 %v9958_v57  ;;  %8521 = vmatprep.mubr.f32.mxu0 %v1010_v60  ;;  %v7198_v29 = vld [vmem:[%s13713_s1 + $0x100] sm:$0xff]  ;;  %v7199_v30 = vld [vmem:[%s13713_s1 + $0x108] sm:$0xff]  ;;  %v1025_v34 = vld [vmem:[#allocation2 + $0x90] sm:$0xff]  ;;  %v388_v57 = vadd.s32 32, %v11329_v47  ;;  %vm11353_vm3 = vcmp.ge.s32.totalorder %v434_v56, 1 }
  0x32   : > { %9963 = vmatprep.subr.bf16.mxu0 %v9962_v61  ;;  %v1023_v31 = vld [vmem:[#allocation2 + $0x80] sm:$0xff]  ;;  %v1024_v32 = vld [vmem:[#allocation2 + $0x88] sm:$0xff]  ;;  %v9990_v33 = vpack.c.bf16 %v7199_v30, %v7198_v29  ;;  %v1026_v35 = vld [vmem:[#allocation2 + $0x98] sm:$0xff]  ;;  %v13937_v30 = vmov 0 }
  0x33   : > { %v1027_v36 = vld [vmem:[#allocation2 + $0xa0] sm:$0xff]  ;;  %v1028_v37 = vld [vmem:[#allocation2 + $0xa8] sm:$0xff]  ;;  %v1029_v38 = vld [vmem:[#allocation2 + $0xb0] sm:$0xff]  ;;  %v448_v63 = vand.u32 15, %v388_v57  ;;  %v13944_v57 = vmov 0 }
  0x34   : > { %8522 = vmatmul.mubr.f32.gmra.mrb[2].mxu0 %v1011_v0  ;;  %v1030_v39 = vld [vmem:[#allocation2 + $0xb8] sm:$0xff]  ;;  %v1031_v40 = vld [vmem:[#allocation2 + $0xc0] sm:$0xff]  ;;  %v1032_v41 = vld [vmem:[#allocation2 + $0xc8] sm:$0xff] }
  0x35   : > { %8524 = vmatprep.mubr.f32.mxu0 %v1012_v1  ;;  %9965 = vmatpush3.bf16.msra.mxu0 %v9962_v61  ;;  %v1033_v42 = vld [vmem:[#allocation2 + $0xd0] sm:$0xff]  ;;  %v1034_v43 = vld [vmem:[#allocation2 + $0xd8] sm:$0xff]  ;;  %v1035_v45 = vld [vmem:[#allocation2 + $0xe0] sm:$0xff]  ;;  %v13929_v61 = vmov 0  ;;  %v390_v1 = vadd.s32 48, %v11329_v47  ;;  %vm11371_vm4 = vcmp.ge.s32.totalorder %v448_v63, 1 }
  0x36   : > { %9967 = vmatprep.subr.bf16.mxu0 %v9966_v2  ;;  %v1036_v46 = vld [vmem:[#allocation2 + $0xe8] sm:$0xff]  ;;  %v315_v48 = vld [vmem:[%s11128_s23 + $0xf0] sm:$0xff]  ;;  %v7201_v59 = vld [vmem:[%s13713_s1 + $0x118] sm:$0xff]  ;;  %v13930_v61 = vsel %vm11353_vm3, 4294967295, %v13929_v61 }
  0x37   : > { %348 = vst.msk [vmem:[#allocation2 + $0x108] sm:$0xff] %vm13725_vm0, %v315_v48  ;;  %v1037_v49 = vld [vmem:[#allocation2 + $0xf0] sm:$0xff]  ;;  %v1038_v50 = vld [vmem:[#allocation2 + $0xf8] sm:$0xff]  ;;  %v11337_v53 = vld [vmem:[#allocation2 + $0x100] sm:$0xff] }
  0x38   : > { %8525 = vmatmul.mubr.f32.gmra.mrb[4].mxu0 %v1013_v6  ;;  %381 = vst.msk [vmem:[#allocation2 + $0x108] sm:$0xff] %vm13720_vm1, %v11033_v5  ;;  %v864_v55 = vld [vmem:[#allocation2 + $0x7] sm:$0xff]  ;;  %v7200_v58 = vld [vmem:[%s13713_s1 + $0x110] sm:$0xff]  ;;  %v11369_v4 = vld [vmem:[#allocation2 + $0x1f] sm:$0xff]  ;;  %v13931_v6 = vmov 0 }
  0x39   : > { %8527 = vmatprep.mubr.f32.mxu0 %v1014_v7  ;;  %9969 = vmatpush3.bf16.msra.mxu0 %v9966_v2  ;;  %v865_v60 = vld [vmem:[#allocation2 + $0xf] sm:$0xff]  ;;  %v11357_v62 = vld [vmem:[#allocation2 + $0x17] sm:$0xff]  ;;  %v9994_v0 = vpack.c.bf16 %v7201_v59, %v7200_v58  ;;  %v7202_v2 = vld [vmem:[%s13713_s1 + $0x120] sm:$0xff]  ;;  %v13932_v6 = vsel %vm11371_vm4, 4294967295, %v13931_v6 }
  0x3a   : > { %9971 = vmatprep.subr.bf16.mxu0 %v9970_v8  ;;  %v7203_v3 = vld [vmem:[%s13713_s1 + $0x128] sm:$0xff]  ;;  %v11394_v15 = vld [vmem:[#allocation2 + $0x37] sm:$0xff]  ;;  %v7206_v19 = vld [vmem:[%s13713_s1 + $0x140] sm:$0xff] }
  0x3b   : > { %v11375_v7 = vld [vmem:[#allocation2 + $0x27] sm:$0xff]  ;;  %v9998_v10 = vpack.c.bf16 %v7203_v3, %v7202_v2  ;;  %v11426_v29 = vld [vmem:[#allocation2 + $0x4f] sm:$0xff]  ;;  %v7213_v44 = vld [vmem:[%s13713_s1 + $0x178] sm:$0xff] }
  0x3c   : > { %8528 = vmatmul.mubr.f32.gmra.mrb[6].mxu0 %v1015_v11  ;;  %v7204_v11 = vld [vmem:[%s13713_s1 + $0x130] sm:$0xff]  ;;  %v7207_v20 = vld [vmem:[%s13713_s1 + $0x148] sm:$0xff]  ;;  %v7230_v52 = vld [vmem:[%s13713_s1 + $0x180] sm:$0xff] }
  0x3d   : > { %8530 = vmatprep.mubr.f32.mxu0 %v1016_v12  ;;  %9973 = vmatpush3.bf16.msra.mxu0 %v9970_v8  ;;  %v462_v8 = vand.u32 15, %v390_v1  ;;  %v7205_v12 = vld [vmem:[%s13713_s1 + $0x138] sm:$0xff]  ;;  %v11489_v58 = vld [vmem:[#allocation2 + $0x87] sm:$0xff]  ;;  %v13946_v1 = vmov 0 }
  0x3e   : > { %9975 = vmatprep.subr.bf16.mxu0 %v9974_v13  ;;  %v11470_v48 = vld [vmem:[#allocation2 + $0x77] sm:$0xff]  ;;  %v11483_v56 = vld [vmem:[#allocation2 + $0x7f] sm:$0xff] }
  0x3f   : > { %vm11390_vm5 = vcmp.ge.s32.totalorder %v462_v8, 1  ;;  %v11504_v2 = vld [vmem:[#allocation2 + $0x97] sm:$0xff]  ;;  %v406_v8 = vadd.s32 176, %v11329_v47 }
  0x40   : > { %8531 = vmatmul.mubr.f32.gmra.mrb[8].mxu0 %v1017_v16  ;;  %v13934_v14 = vsel %vm11390_vm5, 4294967295, %v13933_v14  ;;  %v476_v16 = vand.u32 15, %v392_v9  ;;  %v11512_v9 = vld [vmem:[#allocation2 + $0x9f] sm:$0xff] }
  0x41   : > { %8533 = vmatprep.mubr.f32.mxu0 %v1018_v17  ;;  %9977 = vmatpush3.bf16.msra.mxu0 %v9974_v13  ;;  %v11388_v13 = vld [vmem:[#allocation2 + $0x2f] sm:$0xff]  ;;  %v394_v17 = vadd.s32 80, %v11329_v47 }
  0x42   : > { %9979 = vmatprep.subr.bf16.mxu0 %v9978_v18  ;;  %vm11409_vm6 = vcmp.ge.s32.totalorder %v476_v16, 1  ;;  %v408_v16 = vadd.s32 192, %v11329_v47 }
  0x43   : > { %v490_v24 = vand.u32 15, %v394_v17  ;;  %v11525_v17 = vld [vmem:[#allocation2 + $0xaf] sm:$0xff] }
  0x44   : > { %8534 = vmatmul.mubr.f32.gmra.mrb[10].mxu0 %v1019_v21  ;;  %v11407_v21 = vld [vmem:[#allocation2 + $0x3f] sm:$0xff] }
  0x45   : > { %8536 = vmatprep.mubr.f32.mxu0 %v1020_v22  ;;  %9981 = vmatpush3.bf16.msra.mxu0 %v9978_v18  ;;  %v10002_v18 = vpack.c.bf16 %v7205_v12, %v7204_v11  ;;  %v13935_v22 = vmov 0  ;;  %vm11428_vm7 = vcmp.ge.s32.totalorder %v490_v24, 1  ;;  %v11518_v11 = vld [vmem:[#allocation2 + $0xa7] sm:$0xff]  ;;  %v574_v12 = vand.u32 15, %v406_v8  ;;  %v7232_v8 = vld [vmem:[%s13713_s1 + $0x190] sm:$0xff] }
  0x46   : > { %9983 = vmatprep.subr.bf16.mxu0 %v9982_v23  ;;  %v13936_v22 = vsel %vm11409_vm6, 4294967295, %v13935_v22  ;;  %v13938_v30 = vsel %vm11428_vm7, 4294967295, %v13937_v30  ;;  %v410_v24 = vadd.s32 208, %v11329_v47 }
  0x47   : > { %vm11527_vm13 = vcmp.ge.s32.totalorder %v574_v12, 1  ;;  %v7233_v12 = vld [vmem:[%s13713_s1 + $0x198] sm:$0xff] }
  0x48   : > { %8537 = vmatmul.mubr.f32.gmra.mrb[12].mxu0 %v1021_v26  ;;  %v10006_v26 = vpack.c.bf16 %v7207_v20, %v7206_v19  ;;  %v11531_v19 = vld [vmem:[#allocation2 + $0xb7] sm:$0xff]  ;;  %v588_v20 = vand.u32 15, %v408_v16  ;;  %v13966_v16 = vmov 0 }
  0x49   : > { %8539 = vmatprep.mubr.f32.mxu0 %v1022_v27  ;;  %9985 = vmatpush3.bf16.msra.mxu0 %v9982_v23  ;;  %v11413_v23 = vld [vmem:[#allocation2 + $0x47] sm:$0xff]  ;;  %v7208_v27 = vld [vmem:[%s13713_s1 + $0x150] sm:$0xff] }
  0x4a   : > { %9987 = vmatprep.subr.bf16.mxu0 %v9986_v28  ;;  %vm11540_vm14 = vcmp.ge.s32.totalorder %v588_v20, 1  ;;  %v1508_v20 = vld [vmem:[#allocation2 + $0x11] sm:$0xff] }
  0x4c   : > { %8540 = vmatmul.mubr.f32.gmra.mrb[14].mxu0 %v1023_v31  ;;  %v11432_v31 = vld [vmem:[#allocation2 + $0x57] sm:$0xff] }
  0x4d   : > { %8542 = vmatprep.mubr.f32.mxu0 %v1024_v32  ;;  %9989 = vmatpush3.bf16.msra.mxu0 %v9986_v28  ;;  %v7209_v28 = vld [vmem:[%s13713_s1 + $0x158] sm:$0xff]  ;;  %v504_v32 = vand.u32 15, %v396_v25 }
  0x4e   : > { %9991 = vmatprep.subr.bf16.mxu0 %v9990_v33  ;;  %v11538_v25 = vld [vmem:[#allocation2 + $0xbf] sm:$0xff] }
  0x4f   : > { %vm11447_vm8 = vcmp.ge.s32.totalorder %v504_v32, 1  ;;  %v412_v32 = vadd.s32 224, %v11329_v47 }
  0x50   : > { %8543 = vmatmul.mubr.f32.gmra.mrb[16].mxu0 %v1025_v34  ;;  %v10010_v34 = vpack.c.bf16 %v7209_v28, %v7208_v27  ;;  %v11544_v27 = vld [vmem:[#allocation2 + $0xc7] sm:$0xff]  ;;  %v602_v28 = vand.u32 15, %v410_v24 }
  0x51   : > { %8545 = vmatprep.mubr.f32.mxu0 %v1026_v35  ;;  %v7210_v35 = vld [vmem:[%s13713_s1 + $0x160] sm:$0xff] }
  0x52   : > { %vm11553_vm15 = vcmp.ge.s32.totalorder %v602_v28, 1  ;;  %v389_v28 = vadd.s32 40, %v11329_v47 }
  0x54   : > { %8546 = vmatmul.mubr.f32.gmra.mrb[18].mxu0 %v1027_v36  ;;  %v7211_v36 = vld [vmem:[%s13713_s1 + $0x168] sm:$0xff] }
  0x55   : > { %8548 = vmatprep.mubr.f32.mxu0 %v1028_v37  ;;  %v11445_v37 = vld [vmem:[#allocation2 + $0x5f] sm:$0xff] }
  0x58   : > { %8549 = vmatmul.mubr.f32.gmra.mrb[20].mxu0 %v1029_v38  ;;  %v13939_v38 = vmov 0 }
  0x59   : > { %8551 = vmatprep.mubr.f32.mxu0 %v1030_v39  ;;  %v13940_v38 = vsel %vm11447_vm8, 4294967295, %v13939_v38  ;;  %v11451_v39 = vld [vmem:[#allocation2 + $0x67] sm:$0xff] }
  0x5c   : > { %8552 = vmatmul.mubr.f32.gmra.mrb[22].mxu0 %v1031_v40 }
  0x5d   : > { %8554 = vmatprep.mubr.f32.mxu0 %v1032_v41  ;;  %v400_v41 = vadd.s32 128, %v11329_v47 }
  0x60   : > { %8555 = vmatmul.mubr.f32.gmra.mrb[24].mxu0 %v1033_v42  ;;  %v10014_v42 = vpack.c.bf16 %v7211_v36, %v7210_v35  ;;  %v11557_v35 = vld [vmem:[#allocation2 + $0xd7] sm:$0xff]  ;;  %v616_v36 = vand.u32 15, %v412_v32 }
  0x61   : > { %8557 = vmatprep.mubr.f32.mxu0 %v1034_v43  ;;  %v7212_v43 = vld [vmem:[%s13713_s1 + $0x170] sm:$0xff]  ;;  %v11608_v32 = vld [vmem:[#allocation2 + $0x19] sm:$0xff] }
  0x62   : > { %v10018_v51 = vpack.c.bf16 %v7213_v44, %v7212_v43  ;;  %vm11566_vm1 = vcmp.ge.s32.totalorder %v616_v36, 1  ;;  %v11570_v43 = vld [vmem:[#allocation2 + $0xe7] sm:$0xff]  ;;  %v10026_v36 = vpack.c.bf16 %v7233_v12, %v7232_v8  ;;  %v7236_v12 = vld [vmem:[%s13713_s1 + $0x1b0] sm:$0xff] }
  0x64   : > { %8558 = vmatmul.mubr.f32.gmra.mrb[26].mxu0 %v1035_v45  ;;  %v11464_v45 = vld [vmem:[#allocation2 + $0x6f] sm:$0xff] }
  0x65   : > { %8560 = vmatprep.mubr.f32.mxu0 %v1036_v46  ;;  %v13941_v46 = vmov 0 }
  0x68   : > { %8561 = vmatmul.mubr.f32.gmra.mrb[28].mxu0 %v1037_v49  ;;  %v532_v49 = vand.u32 15, %v400_v41  ;;  %v11564_v41 = vld [vmem:[#allocation2 + $0xdf] sm:$0xff] }
  0x69   : > { %8563 = vmatprep.mubr.f32.mxu0 %v1038_v50  ;;  %v402_v50 = vadd.s32 144, %v11329_v47 }
  0x6a   : > { %vm11485_vm10 = vcmp.ge.s32.totalorder %v532_v49, 1  ;;  %v316_v49 = vld [vmem:[%s11128_s23 + $0xf8] sm:$0xff] }
  0x6b   : > { %v13945_v57 = vsel %vm11485_vm10, 4294967295, %v13944_v57  ;;  %v546_v59 = vand.u32 15, %v402_v50  ;;  %349 = vst.msk [vmem:[#allocation2 + $0x110] sm:$0xff] %vm13725_vm0, %v316_v49  ;;  %v11580_v50 = vld [vmem:[#allocation2 + $0xef] sm:$0xff]  ;;  %v13969_v49 = vmov 0 }
  0x6c   : > { %8564 = vmatmul.mubr.f32.gmra.mrb[30].mxu0 %v11337_v53 }
  0x6d   : > { %8598 = vmatprep.mubr.msk.f32.mxu0 %vm11339_vm2, %v864_v55  ;;  %v7231_v55 = vld [vmem:[%s13713_s1 + $0x188] sm:$0xff]  ;;  %vm11500_vm11 = vcmp.ge.s32.totalorder %v546_v59, 1 }
  0x6e   : > { %v11492_v63 = vpack.c.bf16 %v7231_v55, %v7230_v52  ;;  %v13947_v1 = vsel %vm11500_vm11, 4294967295, %v13946_v1  ;;  %v13963_v52 = vmov 0  ;;  %v11587_v55 = vld [vmem:[#allocation2 + $0xf7] sm:$0xff] }
  0x70   : > { %8599 = vmatmul.mubr.f32.vlgmr.msra.gmra.mrb[0].mxu0 %v865_v60  ;;  %v404_v60 = vadd.s32 160, %v11329_v47 }
  0x71   : > { %9993 = vmatpush3.bf16.msra.mxu0 %v9990_v33  ;;  %8601 = vmatprep.mubr.msk.f32.mxu0 %vm11353_vm3, %v11357_v62  ;;  %v398_v33 = vadd.s32 112, %v11329_v47 }
  0x72   : > { %9995 = vmatprep.subr.bf16.mxu0 %v9994_v0  ;;  %v560_v3 = vand.u32 15, %v404_v60  ;;  %v387_v60 = vadd.s32 24, %v11329_v47 }
  0x73   : > { %v518_v40 = vand.u32 15, %v398_v33  ;;  %v11551_v33 = vld [vmem:[#allocation2 + $0xcf] sm:$0xff] }
  0x74   : > { %8602 = vmatmul.mubr.f32.gmra.mrb[2].mxu0 %v11369_v4  ;;  %vm11514_vm12 = vcmp.ge.s32.totalorder %v560_v3, 1  ;;  %v1507_v3 = vld [vmem:[#allocation2 + $0x9] sm:$0xff]  ;;  %v441_v24 = vand.u32 15, %v387_v60  ;;  %v391_v60 = vadd.s32 56, %v11329_v47 }
  0x75   : > { %8604 = vmatprep.mubr.msk.f32.mxu0 %vm11371_vm4, %v11375_v7  ;;  %9997 = vmatpush3.bf16.msra.mxu0 %v9994_v0  ;;  %vm11466_vm9 = vcmp.ge.s32.totalorder %v518_v40, 1  ;;  %v11498_v0 = vld [vmem:[#allocation2 + $0x8f] sm:$0xff]  ;;  %v414_v40 = vadd.s32 240, %v11329_v47 }
  0x76   : > { %9999 = vmatprep.subr.bf16.mxu0 %v9998_v10  ;;  %v13942_v46 = vsel %vm11466_vm9, 4294967295, %v13941_v46  ;;  %vm11620_vm0 = vcmp.le.s32.totalorder %v441_v24, 14  ;;  %v11643_v24 = vld [vmem:[#allocation2 + $0x31] sm:$0xff] }
  0x77   : > { %13943 = vst [vmem:[#allocation3_spill] sm:$0xff] %v13942_v46  ;;  %v630_v44 = vand.u32 15, %v414_v40  ;;  %v7234_v40 = vld [vmem:[%s13713_s1 + $0x1a0] sm:$0xff]  ;;  %v13970_v49 = vsel %vm11620_vm0, 4294967295, %v13969_v49  ;;  %13977 = vst [vmem:[#allocation14_spill] sm:$0xff] %v11643_v24 }
  0x78   : > { %8605 = vmatmul.mubr.f32.gmra.mrb[4].mxu0 %v11388_v13  ;;  %13971 = vst [vmem:[#allocation10_spill] sm:$0xff] %v13970_v49  ;;  %v7238_v49 = vld [vmem:[%s13713_s1 + $0x1c0] sm:$0xff] }
  0x79   : > { %8607 = vmatprep.mubr.msk.f32.mxu0 %vm11390_vm5, %v11394_v15  ;;  %10001 = vmatpush3.bf16.msra.mxu0 %v9998_v10  ;;  %v13948_v10 = vmov 0  ;;  %v2911_v46 = vld [vmem:[#allocation2 + $0xc7] sm:$0xff] }
  0x7a   : > { %10003 = vmatprep.subr.bf16.mxu0 %v10002_v18  ;;  %v13949_v10 = vsel %vm11514_vm12, 4294967295, %v13948_v10 }
  0x7c   : > { %8608 = vmatmul.mubr.f32.gmra.mrb[6].mxu0 %v11407_v21 }
  0x7d   : > { %8610 = vmatprep.mubr.msk.f32.mxu0 %vm11409_vm6, %v11413_v23  ;;  %10005 = vmatpush3.bf16.msra.mxu0 %v10002_v18  ;;  %v13950_v18 = vmov 0 }
  0x7e   : > { %10007 = vmatprep.subr.bf16.mxu0 %v10006_v26  ;;  %v13951_v18 = vsel %vm11527_vm13, 4294967295, %v13950_v18 }
  0x7f   : > { %13952 = vst [vmem:[#allocation4_spill] sm:$0xff] %v13951_v18 }
  0x80   : > { %8611 = vmatmul.mubr.f32.gmra.mrb[8].mxu0 %v11426_v29 }
  0x81   : > { %8613 = vmatprep.mubr.msk.f32.mxu0 %vm11428_vm7, %v11432_v31  ;;  %10009 = vmatpush3.bf16.msra.mxu0 %v10006_v26  ;;  %v13953_v26 = vmov 0 }
  0x82   : > { %10011 = vmatprep.subr.bf16.mxu0 %v10010_v34  ;;  %v13954_v26 = vsel %vm11540_vm14, 4294967295, %v13953_v26 }
  0x83   : > { %13955 = vst [vmem:[#allocation5_spill] sm:$0xff] %v13954_v26 }
  0x84   : > { %8614 = vmatmul.mubr.f32.gmra.mrb[10].mxu0 %v11445_v37 }
  0x85   : > { %8616 = vmatprep.mubr.msk.f32.mxu0 %vm11447_vm8, %v11451_v39  ;;  %10013 = vmatpush3.bf16.msra.mxu0 %v10010_v34  ;;  %v13956_v34 = vmov 0 }
  0x86   : > { %10015 = vmatprep.subr.bf16.mxu0 %v10014_v42  ;;  %v13957_v34 = vsel %vm11553_vm15, 4294967295, %v13956_v34 }
  0x87   : > { %13958 = vst [vmem:[#allocation6_spill] sm:$0xff] %v13957_v34 }
  0x88   : > { %8617 = vmatmul.mubr.f32.gmra.mrb[12].mxu0 %v11464_v45 }
  0x89   : > { %8619 = vmatprep.mubr.msk.f32.mxu0 %vm11466_vm9, %v11470_v48  ;;  %10017 = vmatpush3.bf16.msra.mxu0 %v10014_v42  ;;  %v13959_v42 = vmov 0 }
  0x8a   : > { %10019 = vmatprep.subr.bf16.mxu0 %v10018_v51  ;;  %v13960_v42 = vsel %vm11566_vm1, 4294967295, %v13959_v42 }
  0x8b   : > { %13961 = vst [vmem:[#allocation7_spill] sm:$0xff] %v13960_v42 }
  0x8c   : > { %8620 = vmatmul.mubr.f32.gmra.mrb[14].mxu0 %v11483_v56 }
  0x8d   : > { %8622 = vmatprep.mubr.msk.f32.mxu0 %vm11485_vm10, %v11489_v58  ;;  %10021 = vmatpush3.bf16.msra.mxu0 %v10018_v51  ;;  %v385_v51 = vadd.s32 8, %v11329_v47 }
  0x8e   : > { %10023 = vmatprep.subr.bf16.mxu0 %v11492_v63 }
  0x8f   : > { %v427_v59 = vand.u32 15, %v385_v51  ;;  %v11624_v51 = vld [vmem:[#allocation2 + $0x21] sm:$0xff] }
  0x90   : > { %8623 = vmatmul.mubr.f32.gmra.mrb[16].mxu0 %v11498_v0  ;;  %13972 = vst [vmem:[#allocation11_spill] sm:$0xff] %v11624_v51 }
  0x91   : > { %8625 = vmatprep.mubr.msk.f32.mxu0 %vm11500_vm11, %v11504_v2 }
  0x94   : > { %8626 = vmatmul.mubr.f32.gmra.mrb[18].mxu0 %v11512_v9 }
  0x95   : > { %8628 = vmatprep.mubr.msk.f32.mxu0 %vm11514_vm12, %v11518_v11 }
  0x98   : > { %8629 = vmatmul.mubr.f32.gmra.mrb[20].mxu0 %v11525_v17 }
  0x99   : > { %8631 = vmatprep.mubr.msk.f32.mxu0 %vm11527_vm13, %v11531_v19 }
  0x9c   : > { %8632 = vmatmul.mubr.f32.gmra.mrb[22].mxu0 %v11538_v25 }
  0x9d   : > { %8634 = vmatprep.mubr.msk.f32.mxu0 %vm11540_vm14, %v11544_v27  ;;  %vm13962_vm14 = vcmask 1047584  }
  0x9e   : > { %382 = vst.msk [vmem:[#allocation2 + $0x110] sm:$0xff] %vm13962_vm14, %v11033_v5  ;;  %v11593_v5 = vld [vmem:[#allocation2 + $0xff] sm:$0xff]  ;;  %vm11603_vm14 = vcmp.le.s32.totalorder %v427_v59, 14  ;;  %v455_v59 = vand.u32 15, %v389_v28  ;;  %v469_v28 = vand.u32 15, %v391_v60 }
  0x9f   : > { %v13967_v16 = vsel %vm11603_vm14, 4294967295, %v13966_v16  ;;  %v11662_v60 = vld [vmem:[#allocation2 + $0x41] sm:$0xff] }
  0xa0   : > { %8635 = vmatmul.mubr.f32.gmra.mrb[24].mxu0 %v11551_v33  ;;  %13968 = vst [vmem:[#allocation9_spill] sm:$0xff] %v13967_v16  ;;  %13982 = vst [vmem:[#allocation17_spill] sm:$0xff] %v11662_v60 }
  0xa1   : > { %8637 = vmatprep.mubr.msk.f32.mxu0 %vm11553_vm15, %v11557_v35  ;;  %vm11583_vm15 = vcmp.ge.s32.totalorder %v630_v44, 1  ;;  %v7235_v44 = vld [vmem:[%s13713_s1 + $0x1a8] sm:$0xff] }
  0xa2   : > { %v13964_v52 = vsel %vm11583_vm15, 4294967295, %v13963_v52  ;;  %v10030_v8 = vpack.c.bf16 %v7235_v44, %v7234_v40  ;;  %v393_v40 = vadd.s32 72, %v11329_v47  ;;  %v11646_v44 = vld [vmem:[#allocation2 + $0x39] sm:$0xff] }
  0xa3   : > { %13965 = vst [vmem:[#allocation8_spill] sm:$0xff] %v13964_v52  ;;  %13978 = vst [vmem:[#allocation15_spill] sm:$0xff] %v11646_v44 }
  0xa4   : > { %8638 = vmatmul.mubr.f32.gmra.mrb[26].mxu0 %v11564_v41 }
  0xa5   : > { %8640 = vmatprep.mubr.msk.f32.mxu0 %vm11566_vm1, %v11570_v43 }
  0xa8   : > { %8641 = vmatmul.mubr.f32.gmra.mrb[28].mxu0 %v11580_v50 }
  0xa9   : > { %8643 = vmatprep.mubr.msk.f32.mxu0 %vm11583_vm15, %v11587_v55 }
  0xac   : > { %8644 = vmatmul.mubr.f32.gmra.mrb[30].mxu0 %v11593_v5 }
  0xad   : > { %8678 = vmatprep.mubr.f32.mxu0 %v1507_v3  ;;  %v11627_v3 = vld [vmem:[#allocation2 + $0x29] sm:$0xff] }
  0xae   : > { %13973 = vst [vmem:[#allocation12_spill] sm:$0xff] %v11627_v3 }
  0xb0   : > { %8679 = vmatmul.mubr.msk.f32.vlgmr.msra.gmra.mrb[0].mxu0 %vm11603_vm14, %v1508_v20  ;;  %vm11639_vm14 = vcmp.le.s32.totalorder %v455_v59, 14  ;;  %v13974_v20 = vmov 0  ;;  %v7239_v59 = vld [vmem:[%s13713_s1 + $0x1c8] sm:$0xff] }
  0xb1   : > { %10025 = vmatpush3.bf16.msra.mxu0 %v11492_v63  ;;  %8681 = vmatprep.mubr.f32.mxu0 %v11608_v32  ;;  %v7237_v63 = vld [vmem:[%s13713_s1 + $0x1b8] sm:$0xff]  ;;  %v13975_v20 = vsel %vm11639_vm14, 4294967295, %v13974_v20 }
  0xb2   : > { %10027 = vmatprep.subr.bf16.mxu0 %v10026_v36  ;;  %13976 = vst [vmem:[#allocation13_spill] sm:$0xff] %v13975_v20  ;;  %v10034_v16 = vpack.c.bf16 %v7237_v63, %v7236_v12  ;;  %v483_v12 = vand.u32 15, %v393_v40  ;;  %v395_v63 = vadd.s32 88, %v11329_v47  ;;  %v7240_v20 = vld [vmem:[%s13713_s1 + $0x1d0] sm:$0xff] }
  0xb3   : > { %v11681_v40 = vld [vmem:[#allocation2 + $0x51] sm:$0xff] }
  0xb4   : > { %8682 = vmatmul.mubr.msk.f32.gmra.mrb[2].mxu0 %vm11620_vm0, %v11624_v51  ;;  %vm11658_vm0 = vcmp.le.s32.totalorder %v469_v28, 14  ;;  %v10038_v51 = vpack.c.bf16 %v7239_v59, %v7238_v49  ;;  %v7241_v28 = vld [vmem:[%s13713_s1 + $0x1d8] sm:$0xff]  ;;  %13987 = vst [vmem:[#allocation20_spill] sm:$0xff] %v11681_v40  ;;  %v497_v49 = vand.u32 15, %v395_v63  ;;  %v397_v59 = vadd.s32 104, %v11329_v47  ;;  %v11700_v63 = vld [vmem:[#allocation2 + $0x61] sm:$0xff] }
  0xb5   : > { %8684 = vmatprep.mubr.f32.mxu0 %v11627_v3  ;;  %10029 = vmatpush3.bf16.msra.mxu0 %v10026_v36  ;;  %v13979_v36 = vmov 0  ;;  %v11665_v3 = vld [vmem:[#allocation2 + $0x49] sm:$0xff]  ;;  %13992 = vst [vmem:[#allocation23_spill] sm:$0xff] %v11700_v63 }
  0xb6   : > { %10031 = vmatprep.subr.bf16.mxu0 %v10030_v8  ;;  %v13980_v36 = vsel %vm11658_vm0, 4294967295, %v13979_v36  ;;  %13983 = vst [vmem:[#allocation18_spill] sm:$0xff] %v11665_v3 }
  0xb7   : > { %13981 = vst [vmem:[#allocation16_spill] sm:$0xff] %v13980_v36  ;;  %v7242_v36 = vld [vmem:[%s13713_s1 + $0x1e0] sm:$0xff] }
  0xb8   : > { %8685 = vmatmul.mubr.msk.f32.gmra.mrb[4].mxu0 %vm11639_vm14, %v11643_v24  ;;  %vm11677_vm14 = vcmp.le.s32.totalorder %v483_v12, 14  ;;  %v10042_v24 = vpack.c.bf16 %v7241_v28, %v7240_v20  ;;  %v7243_v12 = vld [vmem:[%s13713_s1 + $0x1e8] sm:$0xff]  ;;  %v511_v20 = vand.u32 15, %v397_v59  ;;  %v399_v28 = vadd.s32 120, %v11329_v47  ;;  %v11719_v59 = vld [vmem:[#allocation2 + $0x71] sm:$0xff] }
  0xb9   : > { %8687 = vmatprep.mubr.f32.mxu0 %v11646_v44  ;;  %10033 = vmatpush3.bf16.msra.mxu0 %v10030_v8  ;;  %v13984_v8 = vmov 0  ;;  %v11684_v44 = vld [vmem:[#allocation2 + $0x59] sm:$0xff] }
  0xba   : > { %10035 = vmatprep.subr.bf16.mxu0 %v10034_v16  ;;  %v13985_v8 = vsel %vm11677_vm14, 4294967295, %v13984_v8  ;;  %13988 = vst [vmem:[#allocation21_spill] sm:$0xff] %v11684_v44 }
  0xbb   : > { %13986 = vst [vmem:[#allocation19_spill] sm:$0xff] %v13985_v8  ;;  %v7244_v8 = vld [vmem:[%s13713_s1 + $0x1f0] sm:$0xff] }
  0xbc   : > { %8688 = vmatmul.mubr.msk.f32.gmra.mrb[6].mxu0 %vm11658_vm0, %v11662_v60  ;;  %vm11696_vm0 = vcmp.le.s32.totalorder %v497_v49, 14  ;;  %v10046_v60 = vpack.c.bf16 %v7243_v12, %v7242_v36  ;;  %v7245_v49 = vld [vmem:[%s13713_s1 + $0x1f8] sm:$0xff]  ;;  %v525_v36 = vand.u32 15, %v399_v28  ;;  %v401_v12 = vadd.s32 136, %v11329_v47  ;;  %v11738_v28 = vld [vmem:[#allocation2 + $0x81] sm:$0xff] }
  0xbd   : > { %8690 = vmatprep.mubr.f32.mxu0 %v11665_v3  ;;  %10037 = vmatpush3.bf16.msra.mxu0 %v10034_v16  ;;  %v13989_v16 = vmov 0  ;;  %v11703_v3 = vld [vmem:[#allocation2 + $0x69] sm:$0xff] }
  0xbe   : > { %10039 = vmatprep.subr.bf16.mxu0 %v10038_v51  ;;  %v13990_v16 = vsel %vm11696_vm0, 4294967295, %v13989_v16  ;;  %13993 = vst [vmem:[#allocation24_spill] sm:$0xff] %v11703_v3 }
  0xbf   : > { %13991 = vst [vmem:[#allocation22_spill] sm:$0xff] %v13990_v16  ;;  %v7262_v16 = vld [vmem:[%s13713_s1 + $0x200] sm:$0xff] }
  0xc0   : > { %8691 = vmatmul.mubr.msk.f32.gmra.mrb[8].mxu0 %vm11677_vm14, %v11681_v40  ;;  %vm11715_vm14 = vcmp.le.s32.totalorder %v511_v20, 14  ;;  %v10050_v40 = vpack.c.bf16 %v7245_v49, %v7244_v8  ;;  %v7263_v20 = vld [vmem:[%s13713_s1 + $0x208] sm:$0xff]  ;;  %v539_v8 = vand.u32 15, %v401_v12  ;;  %v403_v49 = vadd.s32 152, %v11329_v47 }
  0xc1   : > { %8693 = vmatprep.mubr.f32.mxu0 %v11684_v44  ;;  %10041 = vmatpush3.bf16.msra.mxu0 %v10038_v51  ;;  %v13994_v51 = vmov 0  ;;  %v11722_v44 = vld [vmem:[#allocation2 + $0x79] sm:$0xff] }
  0xc2   : > { %10043 = vmatprep.subr.bf16.mxu0 %v10042_v24  ;;  %v13995_v51 = vsel %vm11715_vm14, 4294967295, %v13994_v51  ;;  %13997 = vst [vmem:[#allocation26_spill] sm:$0xff] %v11722_v44  ;;  %v553_v12 = vand.u32 15, %v403_v49  ;;  %v407_v49 = vadd.s32 184, %v11329_v47 }
  0xc3   : > { %13996 = vst [vmem:[#allocation25_spill] sm:$0xff] %v13995_v51  ;;  %v11751_v51 = vld [vmem:[#allocation2 + $0x91] sm:$0xff] }
  0xc4   : > { %8694 = vmatmul.mubr.msk.f32.gmra.mrb[10].mxu0 %vm11696_vm0, %v11700_v63  ;;  %vm11734_vm0 = vcmp.le.s32.totalorder %v525_v36, 14  ;;  %v10054_v63 = vpack.c.bf16 %v7263_v20, %v7262_v16  ;;  %v14001_v36 = vmov 0  ;;  %v14005_v16 = vmov 0  ;;  %v11764_v20 = vld [vmem:[#allocation2 + $0xa1] sm:$0xff] }
  0xc5   : > { %8696 = vmatprep.mubr.f32.mxu0 %v11703_v3  ;;  %10045 = vmatpush3.bf16.msra.mxu0 %v10042_v24  ;;  %v13998_v24 = vmov 0  ;;  %v11741_v3 = vld [vmem:[#allocation2 + $0x89] sm:$0xff]  ;;  %14008 = vst [vmem:[#allocation31_spill] sm:$0xff] %v11764_v20 }
  0xc6   : > { %10047 = vmatprep.subr.bf16.mxu0 %v10046_v60  ;;  %v13999_v24 = vsel %vm11734_vm0, 4294967295, %v13998_v24 }
  0xc7   : > { %14000 = vst [vmem:[#allocation27_spill] sm:$0xff] %v13999_v24  ;;  %v11767_v24 = vld [vmem:[#allocation2 + $0xa9] sm:$0xff] }
  0xc8   : > { %8697 = vmatmul.mubr.msk.f32.gmra.mrb[12].mxu0 %vm11715_vm14, %v11719_v59  ;;  %vm11747_vm14 = vcmp.le.s32.totalorder %v539_v8, 14  ;;  %14009 = vst [vmem:[#allocation32_spill] sm:$0xff] %v11767_v24 }
  0xc9   : > { %8699 = vmatprep.mubr.f32.mxu0 %v11722_v44  ;;  %10049 = vmatpush3.bf16.msra.mxu0 %v10046_v60  ;;  %v14002_v36 = vsel %vm11747_vm14, 4294967295, %v14001_v36  ;;  %v405_v44 = vadd.s32 168, %v11329_v47  ;;  %v11754_v60 = vld [vmem:[#allocation2 + $0x99] sm:$0xff] }
  0xca   : > { %10051 = vmatprep.subr.bf16.mxu0 %v10050_v40  ;;  %14003 = vst [vmem:[#allocation28_spill] sm:$0xff] %v14002_v36  ;;  %14004 = vst [vmem:[#allocation29_spill] sm:$0xff] %v11754_v60  ;;  %v581_v36 = vand.u32 15, %v407_v49  ;;  %v11793_v49 = vld [vmem:[#allocation2 + $0xc9] sm:$0xff] }
  0xcb   : > { %v567_v8 = vand.u32 15, %v405_v44  ;;  %v11780_v44 = vld [vmem:[#allocation2 + $0xb9] sm:$0xff]  ;;  %14019 = vst [vmem:[#allocation38_spill] sm:$0xff] %v11793_v49 }
  0xcc   : > { %8700 = vmatmul.mubr.msk.f32.gmra.mrb[14].mxu0 %vm11734_vm0, %v11738_v28  ;;  %vm11760_vm0 = vcmp.le.s32.totalorder %v553_v12, 14  ;;  %v11777_v12 = vld [vmem:[#allocation2 + $0xb1] sm:$0xff]  ;;  %14014 = vst [vmem:[#allocation35_spill] sm:$0xff] %v11780_v44 }
  0xcd   : > { %8702 = vmatprep.mubr.f32.mxu0 %v11741_v3  ;;  %10053 = vmatpush3.bf16.msra.mxu0 %v10050_v40  ;;  %v14006_v16 = vsel %vm11760_vm0, 4294967295, %v14005_v16  ;;  %v14010_v40 = vmov 0  ;;  %14013 = vst [vmem:[#allocation34_spill] sm:$0xff] %v11777_v12 }
  0xce   : > { %10055 = vmatprep.subr.bf16.mxu0 %v10054_v63  ;;  %14007 = vst [vmem:[#allocation30_spill] sm:$0xff] %v14006_v16  ;;  %v14015_v16 = vmov 0 }
  0xd0   : > { %8703 = vmatmul.mubr.msk.f32.gmra.mrb[16].mxu0 %vm11747_vm14, %v11751_v51  ;;  %vm11773_vm14 = vcmp.le.s32.totalorder %v567_v8, 14  ;;  %v11790_v8 = vld [vmem:[#allocation2 + $0xc1] sm:$0xff] }
  0xd1   : > { %8705 = vmatprep.mubr.f32.mxu0 %v11754_v60  ;;  %v14011_v40 = vsel %vm11773_vm14, 4294967295, %v14010_v40  ;;  %v409_v60 = vadd.s32 200, %v11329_v47  ;;  %14018 = vst [vmem:[#allocation37_spill] sm:$0xff] %v11790_v8 }
  0xd2   : > { %14012 = vst [vmem:[#allocation33_spill] sm:$0xff] %v14011_v40  ;;  %v14020_v40 = vmov 0 }
  0xd4   : > { %8706 = vmatmul.mubr.msk.f32.gmra.mrb[18].mxu0 %vm11760_vm0, %v11764_v20  ;;  %vm11786_vm0 = vcmp.le.s32.totalorder %v581_v36, 14  ;;  %v411_v20 = vadd.s32 216, %v11329_v47  ;;  %v11803_v36 = vld [vmem:[#allocation2 + $0xd1] sm:$0xff] }
  0xd5   : > { %8708 = vmatprep.mubr.f32.mxu0 %v11767_v24  ;;  %v14016_v16 = vsel %vm11786_vm0, 4294967295, %v14015_v16  ;;  %v595_v24 = vand.u32 15, %v409_v60  ;;  %14023 = vst [vmem:[#allocation40_spill] sm:$0xff] %v11803_v36  ;;  %v11806_v60 = vld [vmem:[#allocation2 + $0xd9] sm:$0xff] }
  0xd6   : > { %14017 = vst [vmem:[#allocation36_spill] sm:$0xff] %v14016_v16  ;;  %14024 = vst [vmem:[#allocation41_spill] sm:$0xff] %v11806_v60  ;;  %v14025_v16 = vmov 0 }
  0xd8   : > { %8709 = vmatmul.mubr.msk.f32.gmra.mrb[20].mxu0 %vm11773_vm14, %v11777_v12  ;;  %vm11799_vm14 = vcmp.le.s32.totalorder %v595_v24, 14  ;;  %v413_v12 = vadd.s32 232, %v11329_v47  ;;  %v11816_v24 = vld [vmem:[#allocation2 + $0xe1] sm:$0xff] }
  0xd9   : > { %8711 = vmatprep.mubr.f32.mxu0 %v11780_v44  ;;  %v14021_v40 = vsel %vm11799_vm14, 4294967295, %v14020_v40  ;;  %v609_v44 = vand.u32 15, %v411_v20  ;;  %v11819_v20 = vld [vmem:[#allocation2 + $0xe9] sm:$0xff] }
  0xda   : > { %14022 = vst [vmem:[#allocation39_spill] sm:$0xff] %v14021_v40  ;;  %v14028_v40 = vmov 0 }
  0xdc   : > { %8712 = vmatmul.mubr.msk.f32.gmra.mrb[22].mxu0 %vm11786_vm0, %v11790_v8  ;;  %vm11812_vm0 = vcmp.le.s32.totalorder %v609_v44, 14  ;;  %v415_v8 = vadd.s32 248, %v11329_v47  ;;  %v11829_v44 = vld [vmem:[#allocation2 + $0xf1] sm:$0xff]  ;;  %v14032_v47 = vmov 0 }
  0xdd   : > { %8714 = vmatprep.mubr.f32.mxu0 %v11793_v49  ;;  %v14026_v16 = vsel %vm11812_vm0, 4294967295, %v14025_v16  ;;  %v623_v49 = vand.u32 15, %v413_v12  ;;  %v11841_v12 = vld [vmem:[#allocation2 + $0x101] sm:$0xff] }
  0xde   : > { %14027 = vst [vmem:[#allocation42_spill] sm:$0xff] %v14026_v16  ;;  %v7490_v16 = vld [vmem:[%s13714_s2 + $0x210] sm:$0xff] }
  0xe0   : > { %8715 = vmatmul.mubr.msk.f32.gmra.mrb[24].mxu0 %vm11799_vm14, %v11803_v36  ;;  %vm11825_vm14 = vcmp.le.s32.totalorder %v623_v49, 14  ;;  %v11831_v36 = vld [vmem:[#allocation2 + $0xf9] sm:$0xff]  ;;  %v7264_v49 = vld [vmem:[%s13713_s1 + $0x210] sm:$0xff] }
  0xe1   : > { %8717 = vmatprep.mubr.f32.mxu0 %v11806_v60  ;;  %v14029_v40 = vsel %vm11825_vm14, 4294967295, %v14028_v40  ;;  %v637_v60 = vand.u32 15, %v415_v8  ;;  %14031 = vst [vmem:[#allocation44_spill] sm:$0xff] %v11831_v36  ;;  %v7265_v8 = vld [vmem:[%s13713_s1 + $0x218] sm:$0xff] }
  0xe2   : > { %14030 = vst [vmem:[#allocation43_spill] sm:$0xff] %v14029_v40  ;;  %v7266_v40 = vld [vmem:[%s13713_s1 + $0x220] sm:$0xff] }
  0xe3   : > { %vm11837_vm15 = vcmp.le.s32.totalorder %v637_v60, 14  ;;  %v10058_v60 = vpack.c.bf16 %v7265_v8, %v7264_v49  ;;  %v7269_v49 = vld [vmem:[%s13713_s1 + $0x238] sm:$0xff]  ;;  %v7279_v8 = vld [vmem:[%s13713_s1 + $0x288] sm:$0xff] }
  0xe4   : > { %8718 = vmatmul.mubr.msk.f32.gmra.mrb[26].mxu0 %vm11812_vm0, %v11816_v24  ;;  %v14033_v47 = vsel %vm11837_vm15, 4294967295, %v14032_v47 }
  0xe5   : > { %8720 = vmatprep.mubr.f32.mxu0 %v11819_v20  ;;  %14034 = vst [vmem:[#allocation45_spill] sm:$0xff] %v14033_v47 }
  0xe8   : > { %8721 = vmatmul.mubr.msk.f32.gmra.mrb[28].mxu0 %vm11825_vm14, %v11829_v44 }
  0xe9   : > { %8723 = vmatprep.mubr.f32.mxu0 %v11831_v36  ;;  %v7267_v36 = vld [vmem:[%s13713_s1 + $0x228] sm:$0xff] }
  0xea   : > { %v10062_v47 = vpack.c.bf16 %v7267_v36, %v7266_v40  ;;  %v7273_v40 = vld [vmem:[%s13713_s1 + $0x258] sm:$0xff]  ;;  %v7275_v36 = vld [vmem:[%s13713_s1 + $0x268] sm:$0xff] }
  0xec   : > { %8724 = vmatmul.mubr.msk.f32.gmra.mrb[30].mxu0 %vm11837_vm15, %v11841_v12 }
  0xed   : > { %8758 = vmatprep.mubr.msk.f32.mxu0 %vm11339_vm2, %v11357_v62  ;;  %v7268_v62 = vld [vmem:[%s13713_s1 + $0x230] sm:$0xff] }
  0xf0   : > { %8759 = vmatmul.mubr.f32.vlgmr.msra.gmra.mrb[0].mxu0 %v11369_v4  ;;  %v10066_v4 = vpack.c.bf16 %v7269_v49, %v7268_v62  ;;  %v7287_v62 = vld [vmem:[%s13713_s1 + $0x2c8] sm:$0xff]  ;;  %v12001_v49 = vld [vmem:[#allocation2 + $0x50] sm:$0xff] }
  0xf1   : > { %10057 = vmatpush3.bf16.msra.mxu0 %v10054_v63  ;;  %8761 = vmatprep.mubr.msk.f32.mxu0 %vm11353_vm3, %v11375_v7  ;;  %v7270_v7 = vld [vmem:[%s13713_s1 + $0x240] sm:$0xff]  ;;  %v7271_v63 = vld [vmem:[%s13713_s1 + $0x248] sm:$0xff] }
  0xf2   : > { %10059 = vmatprep.subr.bf16.mxu0 %v10058_v60 }
  0xf4   : > { %8762 = vmatmul.mubr.f32.gmra.mrb[2].mxu0 %v11388_v13  ;;  %v10070_v13 = vpack.c.bf16 %v7271_v63, %v7270_v7  ;;  %v7288_v63 = vld [vmem:[%s13713_s1 + $0x2d0] sm:$0xff] }
  0xf5   : > { %8764 = vmatprep.mubr.msk.f32.mxu0 %vm11371_vm4, %v11394_v15  ;;  %10061 = vmatpush3.bf16.msra.mxu0 %v10058_v60  ;;  %v7272_v15 = vld [vmem:[%s13713_s1 + $0x250] sm:$0xff]  ;;  %v7286_v60 = vld [vmem:[%s13713_s1 + $0x2c0] sm:$0xff] }
  0xf6   : > { %10063 = vmatprep.subr.bf16.mxu0 %v10062_v47  ;;  %v10102_v7 = vpack.c.bf16 %v7287_v62, %v7286_v60  ;;  %v12069_v60 = vld [vmem:[#allocation2 + $0xc8] sm:$0xff]  ;;  %v12073_v62 = vld [vmem:[#allocation2 + $0xd0] sm:$0xff] }
  0xf8   : > { %8765 = vmatmul.mubr.f32.gmra.mrb[4].mxu0 %v11407_v21  ;;  %v10074_v21 = vpack.c.bf16 %v7273_v40, %v7272_v15  ;;  %v12013_v15 = vld [vmem:[#allocation2 + $0x60] sm:$0xff]  ;;  %v12015_v40 = vld [vmem:[#allocation2 + $0x68] sm:$0xff] }
  0xf9   : > { %8767 = vmatprep.mubr.msk.f32.mxu0 %vm11390_vm5, %v11413_v23  ;;  %10065 = vmatpush3.bf16.msra.mxu0 %v10062_v47  ;;  %v7274_v23 = vld [vmem:[%s13713_s1 + $0x260] sm:$0xff]  ;;  %v7277_v47 = vld [vmem:[%s13713_s1 + $0x278] sm:$0xff] }
  0xfa   : > { %10067 = vmatprep.subr.bf16.mxu0 %v10066_v4 }
  0xfc   : > { %8768 = vmatmul.mubr.f32.gmra.mrb[6].mxu0 %v11426_v29  ;;  %v10078_v29 = vpack.c.bf16 %v7275_v36, %v7274_v23  ;;  %v7290_v23 = vld [vmem:[%s13713_s1 + $0x2e0] sm:$0xff]  ;;  %v7291_v36 = vld [vmem:[%s13713_s1 + $0x2e8] sm:$0xff] }
  0xfd   : > { %8770 = vmatprep.mubr.msk.f32.mxu0 %vm11409_vm6, %v11432_v31  ;;  %10069 = vmatpush3.bf16.msra.mxu0 %v10066_v4  ;;  %v7276_v31 = vld [vmem:[%s13713_s1 + $0x270] sm:$0xff]  ;;  %v12003_v4 = vld [vmem:[#allocation2 + $0x58] sm:$0xff] }
  0xfe   : > { %10071 = vmatprep.subr.bf16.mxu0 %v10070_v13 }
 0x100   : > { %8771 = vmatmul.mubr.f32.gmra.mrb[8].mxu0 %v11445_v37  ;;  %v10082_v37 = vpack.c.bf16 %v7277_v47, %v7276_v31  ;;  %v12027_v31 = vld [vmem:[#allocation2 + $0x78] sm:$0xff]  ;;  %v10110_v47 = vpack.c.bf16 %v7291_v36, %v7290_v23  ;;  %v12091_v36 = vld [vmem:[#allocation2 + $0x108] sm:$0xff] }
 0x101   : > { %8773 = vmatprep.mubr.msk.f32.mxu0 %vm11428_vm7, %v11451_v39  ;;  %10073 = vmatpush3.bf16.msra.mxu0 %v10070_v13  ;;  %v7278_v39 = vld [vmem:[%s13713_s1 + $0x280] sm:$0xff]  ;;  %v7289_v13 = vld [vmem:[%s13713_s1 + $0x2d8] sm:$0xff]  ;;  %14041 = vst [vmem:[#allocation49_spill] sm:$0xff] %v12091_v36 }
 0x102   : > { %10075 = vmatprep.subr.bf16.mxu0 %v10074_v21  ;;  %v12087_v23 = vld [vmem:[#allocation2 + $0xf8] sm:$0xff] }
 0x103   : > { %14040 = vst [vmem:[#allocation48_spill] sm:$0xff] %v12087_v23 }
 0x104   : > { %8774 = vmatmul.mubr.f32.gmra.mrb[10].mxu0 %v11464_v45  ;;  %v10086_v45 = vpack.c.bf16 %v7279_v8, %v7278_v39  ;;  %v7293_v39 = vld [vmem:[%s13713_s1 + $0x2f8] sm:$0xff]  ;;  %v12037_v8 = vld [vmem:[#allocation2 + $0x80] sm:$0xff] }
 0x105   : > { %8776 = vmatprep.mubr.msk.f32.mxu0 %vm11447_vm8, %v11470_v48  ;;  %10077 = vmatpush3.bf16.msra.mxu0 %v10074_v21  ;;  %v11953_v48 = vld [vmem:[#allocation2 + $0x107] sm:$0xff]  ;;  %v10106_v21 = vpack.c.bf16 %v7289_v13, %v7288_v63 }
 0x106   : > { %10079 = vmatprep.subr.bf16.mxu0 %v10078_v29  ;;  %v12079_v63 = vld [vmem:[#allocation2 + $0xe0] sm:$0xff]  ;;  %v12081_v13 = vld [vmem:[#allocation2 + $0xe8] sm:$0xff] }
 0x107   : > { %14038 = vst [vmem:[#allocation46_spill] sm:$0xff] %v12081_v13 }
 0x108   : > { %8777 = vmatmul.mubr.f32.gmra.mrb[12].mxu0 %v11483_v56  ;;  %v11959_v56 = vld [vmem:[#allocation2 + $0x10f] sm:$0xff] }
 0x109   : > { %8779 = vmatprep.mubr.msk.f32.mxu0 %vm11466_vm9, %v11489_v58  ;;  %10081 = vmatpush3.bf16.msra.mxu0 %v10078_v29  ;;  %v2247_v58 = vld [vmem:[#allocation2 + $0x18] sm:$0xff]  ;;  %v12025_v29 = vld [vmem:[#allocation2 + $0x70] sm:$0xff] }
 0x10a   : > { %10083 = vmatprep.subr.bf16.mxu0 %v10082_v37 }
 0x10c   : > { %8780 = vmatmul.mubr.f32.gmra.mrb[14].mxu0 %v11498_v0  ;;  %v7280_v0 = vld [vmem:[%s13713_s1 + $0x290] sm:$0xff] }
 0x10d   : > { %8782 = vmatprep.mubr.msk.f32.mxu0 %vm11485_vm10, %v11504_v2  ;;  %10085 = vmatpush3.bf16.msra.mxu0 %v10082_v37  ;;  %vm14035_vm10 = vnez %v13954_v26  ;;  %v7281_v2 = vld [vmem:[%s13713_s1 + $0x298] sm:$0xff]  ;;  %v7292_v37 = vld [vmem:[%s13713_s1 + $0x2f0] sm:$0xff] }
 0x10e   : > { %10087 = vmatprep.subr.bf16.mxu0 %v10086_v45 }
 0x110   : > { %8783 = vmatmul.mubr.f32.gmra.mrb[16].mxu0 %v11512_v9  ;;  %v2248_v9 = vld [vmem:[#allocation2 + $0x20] sm:$0xff] }
 0x111   : > { %8785 = vmatprep.mubr.msk.f32.mxu0 %vm11500_vm11, %v11518_v11  ;;  %vm14036_vm11 = vnez %v13957_v34  ;;  %v11968_v11 = vld [vmem:[#allocation2 + $0x28] sm:$0xff] }
 0x114   : > { %8786 = vmatmul.mubr.f32.gmra.mrb[18].mxu0 %v11525_v17  ;;  %v10090_v17 = vpack.c.bf16 %v7281_v2, %v7280_v0  ;;  %v7310_v0 = vld [vmem:[%s13713_s1 + $0x300] sm:$0xff]  ;;  %v7311_v2 = vld [vmem:[%s13713_s1 + $0x308] sm:$0xff] }
 0x115   : > { %8788 = vmatprep.mubr.msk.f32.mxu0 %vm11514_vm12, %v11531_v19  ;;  %v7282_v19 = vld [vmem:[%s13713_s1 + $0x2a0] sm:$0xff] }
 0x118   : > { %8789 = vmatmul.mubr.f32.gmra.mrb[20].mxu0 %v11538_v25  ;;  %v7283_v25 = vld [vmem:[%s13713_s1 + $0x2a8] sm:$0xff] }
 0x119   : > { %8791 = vmatprep.mubr.msk.f32.mxu0 %vm11527_vm13, %v11544_v27  ;;  %vm14037_vm13 = vnez %v13964_v52  ;;  %v11977_v27 = vld [vmem:[#allocation2 + $0x30] sm:$0xff] }
 0x11c   : > { %8792 = vmatmul.mubr.f32.gmra.mrb[22].mxu0 %v11551_v33  ;;  %v11979_v33 = vld [vmem:[#allocation2 + $0x38] sm:$0xff] }
 0x11d   : > { %8794 = vmatprep.mubr.msk.f32.mxu0 %vm14035_vm10, %v11557_v35  ;;  %v10094_v35 = vpack.c.bf16 %v7283_v25, %v7282_v19  ;;  %v10118_v19 = vpack.c.bf16 %v7311_v2, %v7310_v0  ;;  %v12055_v25 = vld [vmem:[#allocation2 + $0xa0] sm:$0xff]  ;;  %v7315_v0 = vld [vmem:[%s13713_s1 + $0x328] sm:$0xff]  ;;  %v14043_v2 = vld [vmem:[#allocation11_spill] sm:$0xff] }
 0x120   : > { %8795 = vmatmul.mubr.f32.gmra.mrb[24].mxu0 %v11564_v41  ;;  %v7284_v41 = vld [vmem:[%s13713_s1 + $0x2b0] sm:$0xff] }
 0x121   : > { %8797 = vmatprep.mubr.msk.f32.mxu0 %vm14036_vm11, %v11570_v43  ;;  %v7285_v43 = vld [vmem:[%s13713_s1 + $0x2b8] sm:$0xff] }
 0x124   : > { %8798 = vmatmul.mubr.f32.gmra.mrb[26].mxu0 %v11580_v50  ;;  %v11989_v50 = vld [vmem:[#allocation2 + $0x40] sm:$0xff] }
 0x125   : > { %8800 = vmatprep.mubr.msk.f32.mxu0 %vm11566_vm1, %v11587_v55  ;;  %v11991_v55 = vld [vmem:[#allocation2 + $0x48] sm:$0xff] }
 0x128   : > { %8801 = vmatmul.mubr.f32.gmra.mrb[28].mxu0 %v11593_v5  ;;  %v10098_v5 = vpack.c.bf16 %v7285_v43, %v7284_v41  ;;  %v12061_v41 = vld [vmem:[#allocation2 + $0xb0] sm:$0xff]  ;;  %v12063_v43 = vld [vmem:[#allocation2 + $0xb8] sm:$0xff] }
 0x129   : > { %8803 = vmatprep.mubr.msk.f32.mxu0 %vm14037_vm13, %v11953_v48 }
 0x12c   : > { %8804 = vmatmul.mubr.f32.gmra.mrb[30].mxu0 %v11959_v56 }
 0x12d   : > { %8838 = vmatprep.mubr.f32.mxu0 %v2247_v58  ;;  %v10114_v58 = vpack.c.bf16 %v7293_v39, %v7292_v37  ;;  %v7312_v37 = vld [vmem:[%s13713_s1 + $0x310] sm:$0xff]  ;;  %v7313_v39 = vld [vmem:[%s13713_s1 + $0x318] sm:$0xff] }
 0x130   : > { %8839 = vmatmul.mubr.f32.vlgmr.msra.gmra.mrb[0].mxu0 %v2248_v9  ;;  %v12049_v9 = vld [vmem:[#allocation2 + $0x90] sm:$0xff] }
 0x131   : > { %10089 = vmatpush3.bf16.msra.mxu0 %v10086_v45  ;;  %8841 = vmatprep.mubr.f32.mxu0 %v11968_v11  ;;  %v12039_v45 = vld [vmem:[#allocation2 + $0x88] sm:$0xff] }
 0x132   : > { %10091 = vmatprep.subr.bf16.mxu0 %v10090_v17 }
 0x134   : > { %8842 = vmatmul.mubr.f32.gmra.mrb[2].mxu0 %v11977_v27 }
 0x135   : > { %8844 = vmatprep.mubr.f32.mxu0 %v11979_v33  ;;  %10093 = vmatpush3.bf16.msra.mxu0 %v10090_v17  ;;  %v12051_v17 = vld [vmem:[#allocation2 + $0x98] sm:$0xff] }
 0x136   : > { %10095 = vmatprep.subr.bf16.mxu0 %v10094_v35 }
 0x138   : > { %8845 = vmatmul.mubr.f32.gmra.mrb[4].mxu0 %v11989_v50 }
 0x139   : > { %8847 = vmatprep.mubr.f32.mxu0 %v11991_v55  ;;  %10097 = vmatpush3.bf16.msra.mxu0 %v10094_v35  ;;  %v12057_v35 = vld [vmem:[#allocation2 + $0xa8] sm:$0xff] }
 0x13a   : > { %10099 = vmatprep.subr.bf16.mxu0 %v10098_v5 }
 0x13c   : > { %8848 = vmatmul.mubr.f32.gmra.mrb[6].mxu0 %v12001_v49 }
 0x13d   : > { %8850 = vmatprep.mubr.f32.mxu0 %v12003_v4  ;;  %10101 = vmatpush3.bf16.msra.mxu0 %v10098_v5  ;;  %v12067_v5 = vld [vmem:[#allocation2 + $0xc0] sm:$0xff] }
 0x13e   : > { %10103 = vmatprep.subr.bf16.mxu0 %v10102_v7 }
 0x140   : > { %8851 = vmatmul.mubr.f32.gmra.mrb[8].mxu0 %v12013_v15 }
 0x141   : > { %8853 = vmatprep.mubr.f32.mxu0 %v12015_v40  ;;  %10105 = vmatpush3.bf16.msra.mxu0 %v10102_v7  ;;  %v12075_v7 = vld [vmem:[#allocation2 + $0xd8] sm:$0xff] }
 0x142   : > { %10107 = vmatprep.subr.bf16.mxu0 %v10106_v21 }
 0x144   : > { %8854 = vmatmul.mubr.f32.gmra.mrb[10].mxu0 %v12025_v29 }
 0x145   : > { %8856 = vmatprep.mubr.f32.mxu0 %v12027_v31  ;;  %10109 = vmatpush3.bf16.msra.mxu0 %v10106_v21  ;;  %v12085_v21 = vld [vmem:[#allocation2 + $0xf0] sm:$0xff] }
 0x146   : > { %10111 = vmatprep.subr.bf16.mxu0 %v10110_v47  ;;  %14039 = vst [vmem:[#allocation47_spill] sm:$0xff] %v12085_v21 }
 0x148   : > { %8857 = vmatmul.mubr.f32.gmra.mrb[12].mxu0 %v12037_v8 }
 0x149   : > { %8859 = vmatprep.mubr.f32.mxu0 %v12039_v45  ;;  %10113 = vmatpush3.bf16.msra.mxu0 %v10110_v47  ;;  %v12095_v47 = vld [vmem:[#allocation2 + $0x110] sm:$0xff] }
 0x14a   : > { %10115 = vmatprep.subr.bf16.mxu0 %v10114_v58  ;;  %14042 = vst [vmem:[#allocation50_spill] sm:$0xff] %v12095_v47 }
 0x14c   : > { %8860 = vmatmul.mubr.f32.gmra.mrb[14].mxu0 %v12049_v9 }
 0x14d   : > { %8862 = vmatprep.mubr.f32.mxu0 %v12051_v17  ;;  %10117 = vmatpush3.bf16.msra.mxu0 %v10114_v58  ;;  %v10122_v58 = vpack.c.bf16 %v7313_v39, %v7312_v37  ;;  %v7317_v37 = vld [vmem:[%s13713_s1 + $0x338] sm:$0xff]  ;;  %v14047_v39 = vld [vmem:[#allocation14_spill] sm:$0xff] }
 0x14e   : > { %10119 = vmatprep.subr.bf16.mxu0 %v10118_v19 }
 0x150   : > { %8863 = vmatmul.mubr.f32.gmra.mrb[16].mxu0 %v12055_v25 }
 0x151   : > { %8865 = vmatprep.mubr.f32.mxu0 %v12057_v35 }
 0x154   : > { %8866 = vmatmul.mubr.f32.gmra.mrb[18].mxu0 %v12061_v41 }
 0x155   : > { %8868 = vmatprep.mubr.f32.mxu0 %v12063_v43 }
 0x158   : > { %8869 = vmatmul.mubr.f32.gmra.mrb[20].mxu0 %v12067_v5 }
 0x159   : > { %8871 = vmatprep.mubr.f32.mxu0 %v12069_v60 }
 0x15c   : > { %8872 = vmatmul.mubr.f32.gmra.mrb[22].mxu0 %v12073_v62 }
 0x15d   : > { %8874 = vmatprep.mubr.f32.mxu0 %v12075_v7 }
 0x160   : > { %8875 = vmatmul.mubr.f32.gmra.mrb[24].mxu0 %v12079_v63 }
 0x161   : > { %8877 = vmatprep.mubr.f32.mxu0 %v12081_v13  ;;  %v14050_v13 = vld [vmem:[#allocation15_spill] sm:$0xff] }
 0x164   : > { %8878 = vmatmul.mubr.f32.gmra.mrb[26].mxu0 %v12085_v21  ;;  %v14048_v21 = vld [vmem:[#allocation10_spill] sm:$0xff] }
 0x165   : > { %8880 = vmatprep.mubr.f32.mxu0 %v12087_v23  ;;  %v14046_v23 = vld [vmem:[#allocation12_spill] sm:$0xff]  ;;  %vm14049_vm1 = vnez %v14048_v21  ;;  %v14058_v21 = vld [vmem:[#allocation21_spill] sm:$0xff] }
 0x168   : > { %8881 = vmatmul.mubr.f32.gmra.mrb[28].mxu0 %v11337_v53  ;;  %v7314_v53 = vld [vmem:[%s13713_s1 + $0x320] sm:$0xff] }
 0x169   : > { %8883 = vmatprep.mubr.f32.mxu0 %v12091_v36  ;;  %v14044_v36 = vld [vmem:[#allocation9_spill] sm:$0xff] }
 0x16a   : > { %vm14045_vm13 = vnez %v14044_v36  ;;  %v14054_v36 = vld [vmem:[#allocation18_spill] sm:$0xff] }
 0x16c   : > { %8884 = vmatmul.mubr.f32.gmra.mrb[30].mxu0 %v12095_v47  ;;  %v10126_v47 = vpack.c.bf16 %v7315_v0, %v7314_v53  ;;  %v7319_v53 = vld [vmem:[%s13713_s1 + $0x348] sm:$0xff]  ;;  %v14051_v0 = vld [vmem:[#allocation17_spill] sm:$0xff] }
 0x16d   : > { %8918 = vmatprep.mubr.f32.mxu0 %v11608_v32  ;;  %v7316_v32 = vld [vmem:[%s13713_s1 + $0x330] sm:$0xff] }
 0x170   : > { %8919 = vmatmul.mubr.msk.f32.vlgmr.msra.gmra.mrb[0].mxu0 %vm14045_vm13, %v14043_v2  ;;  %v14052_v2 = vld [vmem:[#allocation13_spill] sm:$0xff] }
 0x171   : > { %10121 = vmatpush3.bf16.msra.mxu0 %v10118_v19  ;;  %8921 = vmatprep.mubr.f32.mxu0 %v14046_v23  ;;  %v10130_v19 = vpack.c.bf16 %v7317_v37, %v7316_v32  ;;  %v7318_v23 = vld [vmem:[%s13713_s1 + $0x340] sm:$0xff]  ;;  %vm14053_vm13 = vnez %v14052_v2  ;;  %v7321_v32 = vld [vmem:[%s13713_s1 + $0x358] sm:$0xff] }
 0x172   : > { %10123 = vmatprep.subr.bf16.mxu0 %v10122_v58  ;;  %v14055_v37 = vld [vmem:[#allocation20_spill] sm:$0xff] }
 0x173   : > { %v14062_v2 = vld [vmem:[#allocation24_spill] sm:$0xff] }
 0x174   : > { %8922 = vmatmul.mubr.msk.f32.gmra.mrb[2].mxu0 %vm14049_vm1, %v14047_v39  ;;  %v14056_v39 = vld [vmem:[#allocation16_spill] sm:$0xff] }
 0x175   : > { %8924 = vmatprep.mubr.f32.mxu0 %v14050_v13  ;;  %10125 = vmatpush3.bf16.msra.mxu0 %v10122_v58  ;;  %v10134_v13 = vpack.c.bf16 %v7319_v53, %v7318_v23  ;;  %v7320_v58 = vld [vmem:[%s13713_s1 + $0x350] sm:$0xff]  ;;  %vm14057_vm1 = vnez %v14056_v39  ;;  %v7323_v23 = vld [vmem:[%s13713_s1 + $0x368] sm:$0xff] }
 0x176   : > { %10127 = vmatprep.subr.bf16.mxu0 %v10126_v47  ;;  %v14059_v53 = vld [vmem:[#allocation23_spill] sm:$0xff] }
 0x178   : > { %8925 = vmatmul.mubr.msk.f32.gmra.mrb[4].mxu0 %vm14053_vm13, %v14051_v0  ;;  %v14060_v0 = vld [vmem:[#allocation19_spill] sm:$0xff] }
 0x179   : > { %8927 = vmatprep.mubr.f32.mxu0 %v14054_v36  ;;  %10129 = vmatpush3.bf16.msra.mxu0 %v10126_v47  ;;  %v10138_v36 = vpack.c.bf16 %v7321_v32, %v7320_v58  ;;  %v7322_v47 = vld [vmem:[%s13713_s1 + $0x360] sm:$0xff]  ;;  %vm14061_vm13 = vnez %v14060_v0  ;;  %v7325_v58 = vld [vmem:[%s13713_s1 + $0x378] sm:$0xff]  ;;  %v14063_v32 = vld [vmem:[#allocation22_spill] sm:$0xff] }
 0x17a   : > { %10131 = vmatprep.subr.bf16.mxu0 %v10130_v19 }
 0x17c   : > { %8928 = vmatmul.mubr.msk.f32.gmra.mrb[6].mxu0 %vm14057_vm1, %v14055_v37  ;;  %vm14064_vm1 = vnez %v14063_v32  ;;  %v14065_v37 = vld [vmem:[#allocation26_spill] sm:$0xff] }
 0x17d   : > { %8930 = vmatprep.mubr.f32.mxu0 %v14058_v21  ;;  %10133 = vmatpush3.bf16.msra.mxu0 %v10130_v19  ;;  %v10142_v21 = vpack.c.bf16 %v7323_v23, %v7322_v47  ;;  %v7324_v19 = vld [vmem:[%s13713_s1 + $0x370] sm:$0xff]  ;;  %v7343_v47 = vld [vmem:[%s13713_s1 + $0x388] sm:$0xff]  ;;  %v14066_v23 = vld [vmem:[#allocation25_spill] sm:$0xff] }
 0x17e   : > { %10135 = vmatprep.subr.bf16.mxu0 %v10134_v13 }
 0x180   : > { %8931 = vmatmul.mubr.msk.f32.gmra.mrb[8].mxu0 %vm14061_vm13, %v14059_v53  ;;  %vm14067_vm13 = vnez %v14066_v23  ;;  %v14070_v53 = vld [vmem:[#allocation29_spill] sm:$0xff]  ;;  %v14076_v23 = vld [vmem:[#allocation30_spill] sm:$0xff] }
 0x181   : > { %8933 = vmatprep.mubr.f32.mxu0 %v14062_v2  ;;  %10137 = vmatpush3.bf16.msra.mxu0 %v10134_v13  ;;  %v10146_v2 = vpack.c.bf16 %v7325_v58, %v7324_v19  ;;  %v7342_v13 = vld [vmem:[%s13713_s1 + $0x380] sm:$0xff]  ;;  %v14071_v19 = vld [vmem:[#allocation31_spill] sm:$0xff]  ;;  %v14072_v58 = vld [vmem:[#allocation28_spill] sm:$0xff] }
 0x182   : > { %10139 = vmatprep.subr.bf16.mxu0 %v10138_v36  ;;  %vm14073_vm11 = vnez %v14072_v58 }
 0x184   : > { %8934 = vmatmul.mubr.msk.f32.gmra.mrb[10].mxu0 %vm14064_vm1, %v11719_v59  ;;  %v10150_v59 = vpack.c.bf16 %v7343_v47, %v7342_v13  ;;  %v14080_v13 = vld [vmem:[#allocation33_spill] sm:$0xff]  ;;  %v14084_v47 = vld [vmem:[#allocation36_spill] sm:$0xff] }
 0x185   : > { %8936 = vmatprep.mubr.f32.mxu0 %v14065_v37  ;;  %10141 = vmatpush3.bf16.msra.mxu0 %v10138_v36  ;;  %v14068_v36 = vld [vmem:[#allocation27_spill] sm:$0xff]  ;;  %v14074_v37 = vld [vmem:[#allocation32_spill] sm:$0xff]  ;;  %vm14081_vm10 = vnez %v14080_v13 }
 0x186   : > { %10143 = vmatprep.subr.bf16.mxu0 %v10142_v21  ;;  %vm14069_vm1 = vnez %v14068_v36 }
 0x188   : > { %8937 = vmatmul.mubr.msk.f32.gmra.mrb[12].mxu0 %vm14067_vm13, %v11738_v28  ;;  %v14075_v28 = vld [vmem:[#allocation34_spill] sm:$0xff]  ;;  %vm14077_vm13 = vnez %v14076_v23 }
 0x189   : > { %8939 = vmatprep.mubr.f32.mxu0 %v11741_v3  ;;  %10145 = vmatpush3.bf16.msra.mxu0 %v10142_v21  ;;  %v14078_v3 = vld [vmem:[#allocation35_spill] sm:$0xff]  ;;  %v14079_v21 = vld [vmem:[#allocation37_spill] sm:$0xff] }
 0x18a   : > { %10147 = vmatprep.subr.bf16.mxu0 %v10146_v2 }
 0x18c   : > { %8940 = vmatmul.mubr.msk.f32.gmra.mrb[14].mxu0 %vm14069_vm1, %v11751_v51  ;;  %v14082_v51 = vld [vmem:[#allocation38_spill] sm:$0xff]  ;;  %vm14085_vm1 = vnez %v14084_v47 }
 0x18d   : > { %8942 = vmatprep.mubr.f32.mxu0 %v14070_v53  ;;  %10149 = vmatpush3.bf16.msra.mxu0 %v10146_v2  ;;  %v14083_v2 = vld [vmem:[#allocation40_spill] sm:$0xff]  ;;  %v14086_v53 = vld [vmem:[#allocation41_spill] sm:$0xff] }
 0x18e   : > { %10151 = vmatprep.subr.bf16.mxu0 %v10150_v59 }
 0x190   : > { %8943 = vmatmul.mubr.msk.f32.gmra.mrb[16].mxu0 %vm14073_vm11, %v14071_v19  ;;  %v14087_v19 = vld [vmem:[#allocation39_spill] sm:$0xff] }
 0x191   : > { %8945 = vmatprep.mubr.f32.mxu0 %v14074_v37  ;;  %vm14088_vm11 = vnez %v14087_v19  ;;  %v14089_v37 = vld [vmem:[#allocation44_spill] sm:$0xff] }
 0x194   : > { %8946 = vmatmul.mubr.msk.f32.gmra.mrb[18].mxu0 %vm14077_vm13, %v14075_v28  ;;  %v12203_v28 = vld [vmem:[#allocation2 + $0x109] sm:$0xff] }
 0x195   : > { %8948 = vmatprep.mubr.f32.mxu0 %v14078_v3  ;;  %v7347_v3 = vld [vmem:[%s13713_s1 + $0x3a8] sm:$0xff] }
 0x198   : > { %8949 = vmatmul.mubr.msk.f32.gmra.mrb[20].mxu0 %vm14081_vm10, %v14079_v21  ;;  %v12209_v21 = vld [vmem:[#allocation2 + $0x111] sm:$0xff] }
 0x199   : > { %8951 = vmatprep.mubr.f32.mxu0 %v14082_v51  ;;  %14091 = vst [vmem:[#allocation11_spill] sm:$0xff] %v12209_v21  ;;  %v2891_v51 = vld [vmem:[#allocation2 + $0x27] sm:$0xff] }
 0x19c   : > { %8952 = vmatmul.mubr.msk.f32.gmra.mrb[22].mxu0 %vm14085_vm1, %v14083_v2  ;;  %v2893_v2 = vld [vmem:[#allocation2 + $0x37] sm:$0xff] }
 0x19d   : > { %8954 = vmatprep.mubr.f32.mxu0 %v14086_v53 }
 0x1a0   : > { %8955 = vmatmul.mubr.msk.f32.gmra.mrb[24].mxu0 %vm14088_vm11, %v11816_v24  ;;  %v7344_v24 = vld [vmem:[%s13713_s1 + $0x390] sm:$0xff] }
 0x1a1   : > { %8957 = vmatprep.mubr.f32.mxu0 %v11819_v20  ;;  %v7345_v20 = vld [vmem:[%s13713_s1 + $0x398] sm:$0xff] }
 0x1a2   : > { %v10154_v53 = vpack.c.bf16 %v7345_v20, %v7344_v24  ;;  %v7348_v24 = vld [vmem:[%s13713_s1 + $0x3b0] sm:$0xff]  ;;  %v7349_v20 = vld [vmem:[%s13713_s1 + $0x3b8] sm:$0xff] }
 0x1a4   : > { %8958 = vmatmul.mubr.msk.f32.gmra.mrb[26].mxu0 %vm11812_vm0, %v11829_v44  ;;  %v2894_v44 = vld [vmem:[#allocation2 + $0x3f] sm:$0xff] }
 0x1a5   : > { %8960 = vmatprep.mubr.f32.mxu0 %v14089_v37  ;;  %v7346_v37 = vld [vmem:[%s13713_s1 + $0x3a0] sm:$0xff] }
 0x1a8   : > { %8961 = vmatmul.mubr.msk.f32.gmra.mrb[28].mxu0 %vm11825_vm14, %v11841_v12  ;;  %v2892_v12 = vld [vmem:[#allocation2 + $0x2f] sm:$0xff] }
 0x1a9   : > { %8963 = vmatprep.mubr.f32.mxu0 %v12203_v28 }
 0x1ac   : > { %8964 = vmatmul.mubr.msk.f32.gmra.mrb[30].mxu0 %vm11837_vm15, %v12209_v21  ;;  %v2895_v21 = vld [vmem:[#allocation2 + $0x47] sm:$0xff] }
 0x1ad   : > { %8998 = vmatprep.mubr.msk.f32.mxu0 %vm11339_vm2, %v2891_v51  ;;  %v10158_v51 = vpack.c.bf16 %v7347_v3, %v7346_v37  ;;  %v7350_v3 = vld [vmem:[%s13713_s1 + $0x3c0] sm:$0xff]  ;;  %v7351_v37 = vld [vmem:[%s13713_s1 + $0x3c8] sm:$0xff] }
 0x1b0   : > { %8999 = vmatmul.mubr.f32.vlgmr.msra.gmra.mrb[0].mxu0 %v2892_v12  ;;  %v2897_v12 = vld [vmem:[#allocation2 + $0x57] sm:$0xff] }
 0x1b1   : > { %10153 = vmatpush3.bf16.msra.mxu0 %v10150_v59  ;;  %9001 = vmatprep.mubr.msk.f32.mxu0 %vm11353_vm3, %v2893_v2  ;;  %v2896_v59 = vld [vmem:[#allocation2 + $0x4f] sm:$0xff]  ;;  %v10162_v2 = vpack.c.bf16 %v7349_v20, %v7348_v24  ;;  %v7353_v20 = vld [vmem:[%s13713_s1 + $0x3d8] sm:$0xff] }
 0x1b2   : > { %10155 = vmatprep.subr.bf16.mxu0 %v10154_v53  ;;  %v7352_v24 = vld [vmem:[%s13713_s1 + $0x3d0] sm:$0xff] }
 0x1b4   : > { %9002 = vmatmul.mubr.f32.gmra.mrb[2].mxu0 %v2894_v44  ;;  %v2898_v44 = vld [vmem:[#allocation2 + $0x5f] sm:$0xff] }
 0x1b5   : > { %9004 = vmatprep.mubr.msk.f32.mxu0 %vm11371_vm4, %v2895_v21  ;;  %10157 = vmatpush3.bf16.msra.mxu0 %v10154_v53  ;;  %v2899_v21 = vld [vmem:[#allocation2 + $0x67] sm:$0xff]  ;;  %v10166_v53 = vpack.c.bf16 %v7351_v37, %v7350_v3 }
 0x1b6   : > { %10159 = vmatprep.subr.bf16.mxu0 %v10158_v51  ;;  %v7354_v3 = vld [vmem:[%s13713_s1 + $0x3e0] sm:$0xff]  ;;  %v7355_v37 = vld [vmem:[%s13713_s1 + $0x3e8] sm:$0xff] }
 0x1b8   : > { %9005 = vmatmul.mubr.f32.gmra.mrb[4].mxu0 %v2896_v59  ;;  %v2900_v59 = vld [vmem:[#allocation2 + $0x6f] sm:$0xff] }
 0x1b9   : > { %9007 = vmatprep.mubr.msk.f32.mxu0 %vm11390_vm5, %v2897_v12  ;;  %10161 = vmatpush3.bf16.msra.mxu0 %v10158_v51  ;;  %v2901_v12 = vld [vmem:[#allocation2 + $0x77] sm:$0xff]  ;;  %v10170_v51 = vpack.c.bf16 %v7353_v20, %v7352_v24 }
 0x1ba   : > { %10163 = vmatprep.subr.bf16.mxu0 %v10162_v2  ;;  %v7356_v24 = vld [vmem:[%s13713_s1 + $0x3f0] sm:$0xff]  ;;  %v7357_v20 = vld [vmem:[%s13713_s1 + $0x3f8] sm:$0xff] }
 0x1bc   : > { %9008 = vmatmul.mubr.f32.gmra.mrb[6].mxu0 %v2898_v44  ;;  %v2902_v44 = vld [vmem:[#allocation2 + $0x7f] sm:$0xff] }
 0x1bd   : > { %9010 = vmatprep.mubr.msk.f32.mxu0 %vm11409_vm6, %v2899_v21  ;;  %10165 = vmatpush3.bf16.msra.mxu0 %v10162_v2  ;;  %v2903_v21 = vld [vmem:[#allocation2 + $0x87] sm:$0xff]  ;;  %v10174_v2 = vpack.c.bf16 %v7355_v37, %v7354_v3 }
 0x1be   : > { %10167 = vmatprep.subr.bf16.mxu0 %v10166_v53  ;;  %v7358_v3 = vld [vmem:[%s13713_s1 + $0x400] sm:$0xff]  ;;  %v7359_v37 = vld [vmem:[%s13713_s1 + $0x408] sm:$0xff] }
 0x1c0   : > { %9011 = vmatmul.mubr.f32.gmra.mrb[8].mxu0 %v2900_v59  ;;  %v2904_v59 = vld [vmem:[#allocation2 + $0x8f] sm:$0xff] }
 0x1c1   : > { %9013 = vmatprep.mubr.msk.f32.mxu0 %vm11428_vm7, %v2901_v12  ;;  %10169 = vmatpush3.bf16.msra.mxu0 %v10166_v53  ;;  %v2905_v12 = vld [vmem:[#allocation2 + $0x97] sm:$0xff]  ;;  %v10178_v53 = vpack.c.bf16 %v7357_v20, %v7356_v24  ;;  %v2908_v24 = vld [vmem:[#allocation2 + $0xaf] sm:$0xff]  ;;  %vm14094_vm7 = vnez %v13947_v1 }
 0x1c2   : > { %10171 = vmatprep.subr.bf16.mxu0 %v10170_v51  ;;  %v2909_v20 = vld [vmem:[#allocation2 + $0xb7] sm:$0xff] }
 0x1c4   : > { %9014 = vmatmul.mubr.f32.gmra.mrb[10].mxu0 %v2902_v44  ;;  %v2906_v44 = vld [vmem:[#allocation2 + $0x9f] sm:$0xff] }
 0x1c5   : > { %9016 = vmatprep.mubr.msk.f32.mxu0 %vm11447_vm8, %v2903_v21  ;;  %10173 = vmatpush3.bf16.msra.mxu0 %v10170_v51  ;;  %v2907_v21 = vld [vmem:[#allocation2 + $0xa7] sm:$0xff]  ;;  %v10182_v51 = vpack.c.bf16 %v7359_v37, %v7358_v3  ;;  %vm14093_vm8 = vnez %v13945_v57  ;;  %v2914_v3 = vld [vmem:[#allocation2 + $0xdf] sm:$0xff]  ;;  %v2916_v37 = vld [vmem:[#allocation2 + $0xef] sm:$0xff] }
 0x1c6   : > { %10175 = vmatprep.subr.bf16.mxu0 %v10174_v2 }
 0x1c8   : > { %9017 = vmatmul.mubr.f32.gmra.mrb[12].mxu0 %v2904_v59  ;;  %v2910_v59 = vld [vmem:[#allocation2 + $0xbf] sm:$0xff] }
 0x1c9   : > { %9019 = vmatprep.mubr.msk.f32.mxu0 %vm11466_vm9, %v2905_v12  ;;  %10177 = vmatpush3.bf16.msra.mxu0 %v10174_v2  ;;  %v2912_v2 = vld [vmem:[#allocation2 + $0xcf] sm:$0xff]  ;;  %v2913_v12 = vld [vmem:[#allocation2 + $0xd7] sm:$0xff]  ;;  %vm14095_vm9 = vnez %v13951_v18 }
 0x1ca   : > { %10179 = vmatprep.subr.bf16.mxu0 %v10178_v53 }
 0x1cc   : > { %9020 = vmatmul.mubr.f32.gmra.mrb[14].mxu0 %v2906_v44  ;;  %v2917_v44 = vld [vmem:[#allocation2 + $0xf7] sm:$0xff] }
 0x1cd   : > { %9022 = vmatprep.mubr.msk.f32.mxu0 %vm14093_vm8, %v2907_v21  ;;  %10181 = vmatpush3.bf16.msra.mxu0 %v10178_v53  ;;  %v2915_v53 = vld [vmem:[#allocation2 + $0xe7] sm:$0xff]  ;;  %vm14096_vm8 = vnez %v13954_v26  ;;  %v2918_v21 = vld [vmem:[#allocation2 + $0xff] sm:$0xff] }
 0x1ce   : > { %10183 = vmatprep.subr.bf16.mxu0 %v10182_v51 }
 0x1d0   : > { %9023 = vmatmul.mubr.f32.gmra.mrb[16].mxu0 %v2908_v24  ;;  %v2922_v24 = vld [vmem:[#allocation2 + $0x11f] sm:$0xff] }
 0x1d1   : > { %9025 = vmatprep.mubr.msk.f32.mxu0 %vm14094_vm7, %v2909_v20  ;;  %vm14097_vm7 = vnez %v13957_v34  ;;  %v7360_v20 = vld [vmem:[%s13713_s1 + $0x410] sm:$0xff] }
 0x1d4   : > { %9026 = vmatmul.mubr.f32.gmra.mrb[18].mxu0 %v2910_v59  ;;  %v7361_v59 = vld [vmem:[%s13713_s1 + $0x418] sm:$0xff] }
 0x1d5   : > { %9028 = vmatprep.mubr.msk.f32.mxu0 %vm11514_vm12, %v2911_v46  ;;  %vm14098_vm12 = vnez %v13960_v42  ;;  %v2921_v46 = vld [vmem:[#allocation2 + $0x117] sm:$0xff] }
 0x1d8   : > { %9029 = vmatmul.mubr.f32.gmra.mrb[20].mxu0 %v2912_v2  ;;  %v7394_v2 = vld [vmem:[%s13714_s2 + $0x90] sm:$0xff] }
 0x1d9   : > { %9031 = vmatprep.mubr.msk.f32.mxu0 %vm14095_vm9, %v2913_v12  ;;  %vm14099_vm9 = vnez %v13964_v52 }
 0x1dc   : > { %9032 = vmatmul.mubr.f32.gmra.mrb[22].mxu0 %v2914_v3  ;;  %v7395_v3 = vld [vmem:[%s13714_s2 + $0x98] sm:$0xff] }
 0x1dd   : > { %9034 = vmatprep.mubr.msk.f32.mxu0 %vm14096_vm8, %v2915_v53  ;;  %v10186_v53 = vpack.c.bf16 %v7361_v59, %v7360_v20  ;;  %v7364_v20 = vld [vmem:[%s13713_s1 + $0x430] sm:$0xff]  ;;  %vm14111_vm8 = vnez %v14056_v39 }
 0x1e0   : > { %9035 = vmatmul.mubr.f32.gmra.mrb[24].mxu0 %v2916_v37  ;;  %v7362_v37 = vld [vmem:[%s13713_s1 + $0x420] sm:$0xff] }
 0x1e1   : > { %9037 = vmatprep.mubr.msk.f32.mxu0 %vm14097_vm7, %v2917_v44  ;;  %v10218_v44 = vpack.c.bf16 %v7395_v3, %v7394_v2 }
 0x1e4   : > { %9038 = vmatmul.mubr.f32.gmra.mrb[26].mxu0 %v2918_v21  ;;  %v7363_v21 = vld [vmem:[%s13713_s1 + $0x428] sm:$0xff] }
 0x1e5   : > { %9040 = vmatprep.mubr.msk.f32.mxu0 %vm14098_vm12, %v11953_v48  ;;  %v7392_v48 = vld [vmem:[%s13714_s2 + $0x80] sm:$0xff] }
 0x1e8   : > { %9041 = vmatmul.mubr.f32.gmra.mrb[28].mxu0 %v11959_v56  ;;  %v7393_v56 = vld [vmem:[%s13714_s2 + $0x88] sm:$0xff] }
 0x1e9   : > { %9043 = vmatprep.mubr.msk.f32.mxu0 %vm14099_vm9, %v2921_v46  ;;  %v10214_v12 = vpack.c.bf16 %v7393_v56, %v7392_v48  ;;  %v7397_v46 = vld [vmem:[%s13714_s2 + $0xa8] sm:$0xff]  ;;  %v7365_v48 = vld [vmem:[%s13713_s1 + $0x438] sm:$0xff]  ;;  %v7366_v56 = vld [vmem:[%s13713_s1 + $0x440] sm:$0xff] }
 0x1eb   : > { %10215 = vmatprep.subr.bf16.mxu1 %v10214_v12 }
 0x1ec   : > { %9044 = vmatmul.mubr.f32.gmra.mrb[30].mxu0 %v2922_v24  ;;  %10217 = vmatpush3.bf16.msra.mxu1 %v10214_v12  ;;  %v10190_v24 = vpack.c.bf16 %v7363_v21, %v7362_v37  ;;  %v7367_v12 = vld [vmem:[%s13713_s1 + $0x448] sm:$0xff]  ;;  %v7368_v37 = vld [vmem:[%s13713_s1 + $0x450] sm:$0xff] }
 0x1ed   : > { %9078 = vmatprep.mubr.f32.mxu0 %v11968_v11  ;;  %v7396_v11 = vld [vmem:[%s13714_s2 + $0xa0] sm:$0xff]  ;;  %10219 = vmatprep.subr.bf16.mxu1 %v10218_v44  ;;  %v10198_v3 = vpack.c.bf16 %v7367_v12, %v7366_v56  ;;  %v7371_v21 = vld [vmem:[%s13713_s1 + $0x468] sm:$0xff] }
 0x1ee   : > { %v10222_v59 = vpack.c.bf16 %v7397_v46, %v7396_v11  ;;  %v7373_v11 = vld [vmem:[%s13713_s1 + $0x478] sm:$0xff]  ;;  %v3547_v56 = vld [vmem:[#allocation2 + $0x89] sm:$0xff] }
 0x1ef   : > { %v3540_v46 = vld [vmem:[#allocation2 + $0x51] sm:$0xff]  ;;  %v3549_v12 = vld [vmem:[#allocation2 + $0x99] sm:$0xff] }
 0x1f0   : > { %9079 = vmatmul.mubr.f32.vlgmr.msra.gmra.mrb[0].mxu0 %v11977_v27  ;;  %v7398_v27 = vld [vmem:[%s13714_s2 + $0xb0] sm:$0xff]  ;;  %10221 = vmatpush3.bf16.msra.mxu1 %v10218_v44  ;;  %v7369_v44 = vld [vmem:[%s13713_s1 + $0x458] sm:$0xff] }
 0x1f1   : > { %10185 = vmatpush3.bf16.msra.mxu0 %v10182_v51  ;;  %9081 = vmatprep.mubr.f32.mxu0 %v11979_v33  ;;  %v7399_v33 = vld [vmem:[%s13714_s2 + $0xb8] sm:$0xff]  ;;  %v10194_v51 = vpack.c.bf16 %v7365_v48, %v7364_v20  ;;  %v14109_v20 = vld [vmem:[#allocation13_spill] sm:$0xff]  ;;  %v3543_v48 = vld [vmem:[#allocation2 + $0x69] sm:$0xff] }
 0x1f2   : > { %10187 = vmatprep.subr.bf16.mxu0 %v10186_v53  ;;  %10223 = vmatprep.subr.bf16.mxu1 %v10222_v59  ;;  %v10226_v2 = vpack.c.bf16 %v7399_v33, %v7398_v27  ;;  %vm14110_vm7 = vnez %v14109_v20  ;;  %v3544_v27 = vld [vmem:[#allocation2 + $0x71] sm:$0xff]  ;;  %v3545_v33 = vld [vmem:[#allocation2 + $0x79] sm:$0xff] }
 0x1f4   : > { %9082 = vmatmul.mubr.f32.gmra.mrb[2].mxu0 %v11989_v50  ;;  %v7400_v50 = vld [vmem:[%s13714_s2 + $0xc0] sm:$0xff]  ;;  %10225 = vmatpush3.bf16.msra.mxu1 %v10222_v59 }
 0x1f5   : > { %9084 = vmatprep.mubr.f32.mxu0 %v11991_v55  ;;  %10189 = vmatpush3.bf16.msra.mxu0 %v10186_v53  ;;  %v7401_v55 = vld [vmem:[%s13714_s2 + $0xc8] sm:$0xff] }
 0x1f6   : > { %10191 = vmatprep.subr.bf16.mxu0 %v10190_v24  ;;  %10227 = vmatprep.subr.bf16.mxu1 %v10226_v2  ;;  %v10230_v53 = vpack.c.bf16 %v7401_v55, %v7400_v50  ;;  %v3542_v59 = vld [vmem:[#allocation2 + $0x61] sm:$0xff] }
 0x1f7   : > { %v14114_v50 = vld [vmem:[#allocation25_spill] sm:$0xff] }
 0x1f8   : > { %9085 = vmatmul.mubr.f32.gmra.mrb[4].mxu0 %v12001_v49  ;;  %10229 = vmatpush3.bf16.msra.mxu1 %v10226_v2  ;;  %v10202_v49 = vpack.c.bf16 %v7369_v44, %v7368_v37  ;;  %v3548_v2 = vld [vmem:[#allocation2 + $0x91] sm:$0xff]  ;;  %v3550_v55 = vld [vmem:[#allocation2 + $0xa1] sm:$0xff]  ;;  %v3553_v37 = vld [vmem:[#allocation2 + $0xb9] sm:$0xff] }
 0x1f9   : > { %9087 = vmatprep.mubr.f32.mxu0 %v12003_v4  ;;  %10193 = vmatpush3.bf16.msra.mxu0 %v10190_v24  ;;  %v7370_v4 = vld [vmem:[%s13713_s1 + $0x460] sm:$0xff] }
 0x1fa   : > { %10195 = vmatprep.subr.bf16.mxu0 %v10194_v51  ;;  %10231 = vmatprep.subr.bf16.mxu1 %v10230_v53  ;;  %v3541_v24 = vld [vmem:[#allocation2 + $0x59] sm:$0xff]  ;;  %v3554_v44 = vld [vmem:[#allocation2 + $0xc1] sm:$0xff] }
 0x1fc   : > { %9088 = vmatmul.mubr.f32.gmra.mrb[6].mxu0 %v12013_v15  ;;  %10233 = vmatpush3.bf16.msra.mxu1 %v10230_v53  ;;  %v10206_v15 = vpack.c.bf16 %v7371_v21, %v7370_v4  ;;  %v3552_v53 = vld [vmem:[#allocation2 + $0xb1] sm:$0xff]  ;;  %v3557_v21 = vld [vmem:[#allocation2 + $0xd9] sm:$0xff] }
 0x1fd   : > { %9090 = vmatprep.mubr.f32.mxu0 %v12015_v40  ;;  %10197 = vmatpush3.bf16.msra.mxu0 %v10194_v51  ;;  %v7372_v40 = vld [vmem:[%s13713_s1 + $0x470] sm:$0xff]  ;;  %v3546_v51 = vld [vmem:[#allocation2 + $0x81] sm:$0xff] }
 0x1fe   : > { %10199 = vmatprep.subr.bf16.mxu0 %v10198_v3  ;;  %v3556_v4 = vld [vmem:[#allocation2 + $0xd1] sm:$0xff] }
 0x200   : > { %9091 = vmatmul.mubr.f32.gmra.mrb[8].mxu0 %v12025_v29  ;;  %v10210_v29 = vpack.c.bf16 %v7373_v11, %v7372_v40  ;;  %v3559_v40 = vld [vmem:[#allocation2 + $0xe9] sm:$0xff]  ;;  %v3560_v11 = vld [vmem:[#allocation2 + $0xf1] sm:$0xff] }
 0x201   : > { %9093 = vmatprep.mubr.f32.mxu0 %v12027_v31  ;;  %10201 = vmatpush3.bf16.msra.mxu0 %v10198_v3  ;;  %v14100_v31 = vld [vmem:[#allocation46_spill] sm:$0xff] }
 0x202   : > { %10203 = vmatprep.subr.bf16.mxu0 %v10202_v49  ;;  %v3551_v3 = vld [vmem:[#allocation2 + $0xa9] sm:$0xff] }
 0x204   : > { %9094 = vmatmul.mubr.f32.gmra.mrb[10].mxu0 %v12037_v8  ;;  %v14101_v8 = vld [vmem:[#allocation47_spill] sm:$0xff] }
 0x205   : > { %9096 = vmatprep.mubr.f32.mxu0 %v12039_v45  ;;  %10205 = vmatpush3.bf16.msra.mxu0 %v10202_v49  ;;  %v14102_v45 = vld [vmem:[#allocation48_spill] sm:$0xff]  ;;  %v3555_v49 = vld [vmem:[#allocation2 + $0xc9] sm:$0xff] }
 0x206   : > { %10207 = vmatprep.subr.bf16.mxu0 %v10206_v15 }
 0x208   : > { %9097 = vmatmul.mubr.f32.gmra.mrb[12].mxu0 %v12049_v9  ;;  %v3256_v9 = vld [vmem:[#allocation2 + $0x100] sm:$0xff] }
 0x209   : > { %9099 = vmatprep.mubr.f32.mxu0 %v12051_v17  ;;  %10209 = vmatpush3.bf16.msra.mxu0 %v10206_v15  ;;  %v14103_v17 = vld [vmem:[#allocation49_spill] sm:$0xff] }
 0x20a   : > { %10211 = vmatprep.subr.bf16.mxu0 %v10210_v29  ;;  %v3558_v15 = vld [vmem:[#allocation2 + $0xe1] sm:$0xff] }
 0x20c   : > { %9100 = vmatmul.mubr.f32.gmra.mrb[14].mxu0 %v12055_v25  ;;  %v14104_v25 = vld [vmem:[#allocation50_spill] sm:$0xff] }
 0x20d   : > { %9102 = vmatprep.mubr.f32.mxu0 %v12057_v35  ;;  %10213 = vmatpush3.bf16.msra.mxu0 %v10210_v29  ;;  %v12397_v35 = vld [vmem:[#allocation2 + $0x8] sm:$0xff]  ;;  %v3561_v29 = vld [vmem:[#allocation2 + $0xf9] sm:$0xff] }
 0x210   : > { %9103 = vmatmul.mubr.f32.gmra.mrb[16].mxu0 %v12061_v41  ;;  %v3535_v41 = vld [vmem:[#allocation2 + $0x29] sm:$0xff] }
 0x211   : > { %9105 = vmatprep.mubr.f32.mxu0 %v12063_v43  ;;  %v3536_v43 = vld [vmem:[#allocation2 + $0x31] sm:$0xff] }
 0x214   : > { %9106 = vmatmul.mubr.f32.gmra.mrb[18].mxu0 %v12067_v5  ;;  %v3537_v5 = vld [vmem:[#allocation2 + $0x39] sm:$0xff] }
 0x215   : > { %9108 = vmatprep.mubr.f32.mxu0 %v12069_v60  ;;  %v14105_v60 = vld [vmem:[#allocation9_spill] sm:$0xff] }
 0x216   : > { %vm14106_vm9 = vnez %v14105_v60 }
 0x218   : > { %9109 = vmatmul.mubr.f32.gmra.mrb[20].mxu0 %v12073_v62  ;;  %v3538_v62 = vld [vmem:[#allocation2 + $0x41] sm:$0xff] }
 0x219   : > { %9111 = vmatprep.mubr.f32.mxu0 %v12075_v7  ;;  %v3539_v7 = vld [vmem:[#allocation2 + $0x49] sm:$0xff] }
 0x21c   : > { %9112 = vmatmul.mubr.f32.gmra.mrb[22].mxu0 %v12079_v63  ;;  %v14107_v63 = vld [vmem:[#allocation10_spill] sm:$0xff] }
 0x21d   : > { %9114 = vmatprep.mubr.f32.mxu0 %v14100_v31  ;;  %vm14108_vm12 = vnez %v14107_v63  ;;  %v3562_v31 = vld [vmem:[#allocation2 + $0x101] sm:$0xff] }
 0x220   : > { %9115 = vmatmul.mubr.f32.gmra.mrb[24].mxu0 %v14101_v8  ;;  %v3565_v8 = vld [vmem:[#allocation2 + $0x119] sm:$0xff] }
 0x221   : > { %9117 = vmatprep.mubr.f32.mxu0 %v14102_v45  ;;  %v14118_v45 = vld [vmem:[#allocation11_spill] sm:$0xff] }
 0x224   : > { %9118 = vmatmul.mubr.f32.gmra.mrb[26].mxu0 %v3256_v9 }
 0x225   : > { %9120 = vmatprep.mubr.f32.mxu0 %v14103_v17  ;;  %v3566_v17 = vld [vmem:[#allocation2 + $0x121] sm:$0xff] }
 0x228   : > { %9121 = vmatmul.mubr.f32.gmra.mrb[28].mxu0 %v14104_v25 }
 0x229   : > { %9123 = vmatprep.mubr.f32.mxu0 %v12397_v35 }
 0x22c   : > { %9124 = vmatmul.mubr.f32.gmra.mrb[30].mxu0 %v12397_v35 }
 0x22d   : > { %9158 = vmatprep.mubr.f32.mxu0 %v3535_v41  ;;  %v7402_v41 = vld [vmem:[%s13714_s2 + $0xd0] sm:$0xff] }
 0x230   : > { %9159 = vmatmul.mubr.msk.f32.vlgmr.msra.gmra.mrb[0].mxu0 %vm14106_vm9, %v3536_v43  ;;  %vm14112_vm9 = vnez %v14060_v0  ;;  %v7403_v43 = vld [vmem:[%s13714_s2 + $0xd8] sm:$0xff] }
 0x231   : > { %9161 = vmatprep.mubr.f32.mxu0 %v3537_v5  ;;  %v10234_v5 = vpack.c.bf16 %v7403_v43, %v7402_v41  ;;  %v7424_v41 = vld [vmem:[%s13714_s2 + $0x100] sm:$0xff]  ;;  %v7425_v43 = vld [vmem:[%s13714_s2 + $0x108] sm:$0xff] }
 0x233   : > { %10235 = vmatprep.subr.bf16.mxu1 %v10234_v5 }
 0x234   : > { %9162 = vmatmul.mubr.msk.f32.gmra.mrb[2].mxu0 %vm14108_vm12, %v3538_v62  ;;  %vm14113_vm12 = vnez %v14063_v32  ;;  %10237 = vmatpush3.bf16.msra.mxu1 %v10234_v5  ;;  %v7405_v62 = vld [vmem:[%s13714_s2 + $0xe8] sm:$0xff]  ;;  %v12508_v5 = vpack.c.bf16 %v7425_v43, %v7424_v41 }
 0x235   : > { %9164 = vmatprep.mubr.f32.mxu0 %v3539_v7 }
 0x238   : > { %9165 = vmatmul.mubr.msk.f32.gmra.mrb[4].mxu0 %vm14110_vm7, %v3540_v46  ;;  %vm14115_vm7 = vnez %v14114_v50  ;;  %v7406_v46 = vld [vmem:[%s13714_s2 + $0xf0] sm:$0xff] }
 0x239   : > { %9167 = vmatprep.mubr.f32.mxu0 %v3541_v24  ;;  %v7407_v24 = vld [vmem:[%s13714_s2 + $0xf8] sm:$0xff] }
 0x23c   : > { %9168 = vmatmul.mubr.msk.f32.gmra.mrb[6].mxu0 %vm14111_vm8, %v3542_v59  ;;  %vm14116_vm8 = vnez %v14068_v36  ;;  %v10242_v59 = vpack.c.bf16 %v7407_v24, %v7406_v46 }
 0x23d   : > { %9170 = vmatprep.mubr.f32.mxu0 %v3543_v48  ;;  %v4079_v48 = vld [vmem:[%s13714_s2] sm:$0xff] }
 0x240   : > { %9171 = vmatmul.mubr.msk.f32.gmra.mrb[8].mxu0 %vm14112_vm9, %v3544_v27  ;;  %vm14117_vm9 = vnez %v14072_v58  ;;  %v4080_v27 = vld [vmem:[%s13714_s2 + $0x8] sm:$0xff] }
 0x241   : > { %9173 = vmatprep.mubr.f32.mxu0 %v3545_v33  ;;  %v10246_v33 = vpack.c.bf16 %v4080_v27, %v4079_v48 }
 0x244   : > { %9174 = vmatmul.mubr.msk.f32.gmra.mrb[10].mxu0 %vm14113_vm12, %v3546_v51  ;;  %v4081_v51 = vld [vmem:[%s13714_s2 + $0x10] sm:$0xff] }
 0x245   : > { %9176 = vmatprep.mubr.f32.mxu0 %v3547_v56  ;;  %v4082_v56 = vld [vmem:[%s13714_s2 + $0x18] sm:$0xff] }
 0x248   : > { %9177 = vmatmul.mubr.msk.f32.gmra.mrb[12].mxu0 %vm14115_vm7, %v3548_v2  ;;  %v4083_v2 = vld [vmem:[%s13714_s2 + $0x20] sm:$0xff] }
 0x249   : > { %9179 = vmatprep.mubr.f32.mxu0 %v3549_v12  ;;  %v4084_v12 = vld [vmem:[%s13714_s2 + $0x28] sm:$0xff] }
 0x24c   : > { %9180 = vmatmul.mubr.msk.f32.gmra.mrb[14].mxu0 %vm14116_vm8, %v3550_v55  ;;  %v10254_v55 = vpack.c.bf16 %v4084_v12, %v4083_v2 }
 0x24d   : > { %9182 = vmatprep.mubr.f32.mxu0 %v3551_v3  ;;  %v4085_v3 = vld [vmem:[%s13714_s2 + $0x30] sm:$0xff] }
 0x250   : > { %9183 = vmatmul.mubr.msk.f32.gmra.mrb[16].mxu0 %vm14117_vm9, %v3552_v53  ;;  %v4086_v53 = vld [vmem:[%s13714_s2 + $0x38] sm:$0xff] }
 0x251   : > { %9185 = vmatprep.mubr.f32.mxu0 %v3553_v37  ;;  %v10258_v37 = vpack.c.bf16 %v4086_v53, %v4085_v3 }
 0x254   : > { %9186 = vmatmul.mubr.msk.f32.gmra.mrb[18].mxu0 %vm14077_vm13, %v3554_v44  ;;  %v4087_v44 = vld [vmem:[%s13714_s2 + $0x40] sm:$0xff] }
 0x255   : > { %9188 = vmatprep.mubr.f32.mxu0 %v3555_v49  ;;  %v4088_v49 = vld [vmem:[%s13714_s2 + $0x48] sm:$0xff] }
 0x258   : > { %9189 = vmatmul.mubr.msk.f32.gmra.mrb[20].mxu0 %vm14081_vm10, %v3556_v4  ;;  %v10262_v4 = vpack.c.bf16 %v4088_v49, %v4087_v44 }
 0x259   : > { %9191 = vmatprep.mubr.f32.mxu0 %v3557_v21  ;;  %v4089_v21 = vld [vmem:[%s13714_s2 + $0x50] sm:$0xff] }
 0x25c   : > { %9192 = vmatmul.mubr.msk.f32.gmra.mrb[22].mxu0 %vm14085_vm1, %v3558_v15  ;;  %v4090_v15 = vld [vmem:[%s13714_s2 + $0x58] sm:$0xff] }
 0x25d   : > { %9194 = vmatprep.mubr.f32.mxu0 %v3559_v40  ;;  %v10266_v40 = vpack.c.bf16 %v4090_v15, %v4089_v21 }
 0x260   : > { %9195 = vmatmul.mubr.msk.f32.gmra.mrb[24].mxu0 %vm14088_vm11, %v3560_v11  ;;  %v4091_v11 = vld [vmem:[%s13714_s2 + $0x60] sm:$0xff] }
 0x261   : > { %9197 = vmatprep.mubr.f32.mxu0 %v3561_v29  ;;  %v4092_v29 = vld [vmem:[%s13714_s2 + $0x68] sm:$0xff] }
 0x264   : > { %9198 = vmatmul.mubr.msk.f32.gmra.mrb[26].mxu0 %vm11812_vm0, %v3562_v31  ;;  %v10270_v31 = vpack.c.bf16 %v4092_v29, %v4091_v11 }
 0x265   : > { %9200 = vmatprep.mubr.f32.mxu0 %v12203_v28  ;;  %v7404_v28 = vld [vmem:[%s13714_s2 + $0xe0] sm:$0xff] }
 0x266   : > { %v10238_v7 = vpack.c.bf16 %v7405_v62, %v7404_v28  ;;  %v12514_v28 = vld [vmem:[%s13715_s3] ss:$0 sm:$0xff] }
 0x268   : > { %9201 = vmatmul.mubr.msk.f32.gmra.mrb[28].mxu0 %vm11825_vm14, %v14118_v45  ;;  %10239 = vmatprep.subr.bf16.mxu1 %v10238_v7  ;;  %v4094_v45 = vld [vmem:[%s13714_s2 + $0x78] sm:$0xff] }
 0x269   : > { %9203 = vmatprep.mubr.f32.mxu0 %v3565_v8  ;;  %10241 = vmatpush3.bf16.msra.mxu1 %v10238_v7  ;;  %v4093_v8 = vld [vmem:[%s13714_s2 + $0x70] sm:$0xff]  ;;  %v12519_v7 = vld [vmem:[%s13716_s4] ss:$0 sm:$0xff] }
 0x26a   : > { %10243 = vmatprep.subr.bf16.mxu1 %v10242_v59 }
 0x26c   : > { %9204 = vmatmul.mubr.msk.f32.gmra.mrb[30].mxu0 %vm11837_vm15, %v3566_v17  ;;  %v10274_v17 = vpack.c.bf16 %v4094_v45, %v4093_v8 }
 0x26d   : > { %10245 = vmatpush3.bf16.msra.mxu1 %v10242_v59 }
 0x26e   : > { %10247 = vmatprep.subr.bf16.mxu1 %v10246_v33 }
 0x270   : > { %9239 = vmatmul.mubr.f32.vlgmr.msra.gmra.mrb[0].mxu1 %v12397_v35  ;;  %v10250_v35 = vpack.c.bf16 %v4082_v56, %v4081_v51 }
 0x271   : > { %10249 = vmatpush3.bf16.msra.mxu1 %v10246_v33 }
 0x272   : > { %10251 = vmatprep.subr.bf16.mxu1 %v10250_v35 }
 0x275   : > { %10253 = vmatpush3.bf16.msra.mxu1 %v10250_v35 }
 0x276   : > { %10255 = vmatprep.subr.bf16.mxu1 %v10254_v55 }
 0x279   : > { %10257 = vmatpush3.bf16.msra.mxu1 %v10254_v55 }
 0x27a   : > { %10259 = vmatprep.subr.bf16.mxu1 %v10258_v37 }
 0x27d   : > { %10261 = vmatpush3.bf16.msra.mxu1 %v10258_v37 }
 0x27e   : > { %10263 = vmatprep.subr.bf16.mxu1 %v10262_v4 }
 0x281   : > { %10265 = vmatpush3.bf16.msra.mxu1 %v10262_v4 }
 0x282   : > { %10267 = vmatprep.subr.bf16.mxu1 %v10266_v40 }
 0x285   : > { %10269 = vmatpush3.bf16.msra.mxu1 %v10266_v40 }
 0x286   : > { %10271 = vmatprep.subr.bf16.mxu1 %v10270_v31 }
 0x289   : > { %10273 = vmatpush3.bf16.msra.mxu1 %v10270_v31 }
 0x28a   : > { %10275 = vmatprep.subr.bf16.mxu1 %v10274_v17 }
 0x28d   : > { %10277 = vmatpush3.bf16.msra.mxu1 %v10274_v17 }
 0x28e   : > { %10279 = vmatprep.subr.bf16.mxu1 %v12508_v5 }
 0x303   : > { %v9160_v62 = vpop.f32.mrb[0].mxu0 }
 0x304   : > { %v3881_v46 = vmul.f32 %v9160_v62, %v12514_v28  ;;  %v3682_v24 = vpop.f32.mrb[1].mxu0 }
 0x305   : > { %v3880_v59 = vmul.f32 %v12514_v28, %v3682_v24 }
 0x306   : > { %v3920_v48 = vadd.f32 %v12519_v7, %v3881_v46 }
 0x307   : > { %v3919_v27 = vadd.f32 %v12519_v7, %v3880_v59  ;;  %v9163_v33 = vpop.f32.mrb[2].mxu0 }
 0x308   : > { %v3952_v51 = vmax.f32 %v3920_v48, 0.0  ;;  %v3883_v56 = vmul.f32 %v9163_v33, %v12514_v28  ;;  %v3692_v35 = vpop.f32.mrb[3].mxu0 }
 0x309   : > { %v3951_v2 = vmax.f32 %v3919_v27, 0.0  ;;  %v3882_v12 = vmul.f32 %v12514_v28, %v3692_v35 }
 0x30a   : > { %3984 = vst [vmem:[#allocation2 + $0x20] sm:$0xff] %v3952_v51  ;;  %v3922_v55 = vadd.f32 %v12519_v7, %v3883_v56 }
 0x30b   : > { %3983 = vst [vmem:[#allocation2 + $0x18] sm:$0xff] %v3951_v2  ;;  %v3921_v3 = vadd.f32 %v12519_v7, %v3882_v12  ;;  %v9166_v53 = vpop.f32.mrb[4].mxu0  ;;  %9241 = vmatprep.mubr.f32.mxu1 %v3951_v2 }
 0x30c   : > { %v3954_v37 = vmax.f32 %v3922_v55, 0.0  ;;  %v3885_v44 = vmul.f32 %v9166_v53, %v12514_v28  ;;  %v3702_v49 = vpop.f32.mrb[5].mxu0  ;;  %9242 = vmatmul.mubr.f32.gmra.mrb[2].mxu1 %v3952_v51 }
 0x30d   : > { %v3953_v4 = vmax.f32 %v3921_v3, 0.0  ;;  %v3884_v21 = vmul.f32 %v12514_v28, %v3702_v49 }
 0x30e   : > { %3986 = vst [vmem:[#allocation2 + $0x30] sm:$0xff] %v3954_v37  ;;  %v3924_v15 = vadd.f32 %v12519_v7, %v3885_v44 }
 0x30f   : > { %3985 = vst [vmem:[#allocation2 + $0x28] sm:$0xff] %v3953_v4  ;;  %v3923_v40 = vadd.f32 %v12519_v7, %v3884_v21  ;;  %v9169_v11 = vpop.f32.mrb[6].mxu0  ;;  %9244 = vmatprep.mubr.f32.mxu1 %v3953_v4 }
 0x310   : > { %v3956_v29 = vmax.f32 %v3924_v15, 0.0  ;;  %v3887_v31 = vmul.f32 %v9169_v11, %v12514_v28  ;;  %v3712_v8 = vpop.f32.mrb[7].mxu0  ;;  %9245 = vmatmul.mubr.f32.gmra.mrb[4].mxu1 %v3954_v37 }
 0x311   : > { %v3955_v45 = vmax.f32 %v3923_v40, 0.0  ;;  %v3886_v17 = vmul.f32 %v12514_v28, %v3712_v8 }
 0x312   : > { %3988 = vst [vmem:[#allocation2 + $0x40] sm:$0xff] %v3956_v29  ;;  %v3926_v41 = vadd.f32 %v12519_v7, %v3887_v31 }
 0x313   : > { %3987 = vst [vmem:[#allocation2 + $0x38] sm:$0xff] %v3955_v45  ;;  %v3925_v43 = vadd.f32 %v12519_v7, %v3886_v17  ;;  %v9172_v62 = vpop.f32.mrb[8].mxu0  ;;  %9247 = vmatprep.mubr.f32.mxu1 %v3955_v45 }
 0x314   : > { %v3958_v46 = vmax.f32 %v3926_v41, 0.0  ;;  %v3889_v24 = vmul.f32 %v9172_v62, %v12514_v28  ;;  %v3722_v59 = vpop.f32.mrb[9].mxu0  ;;  %9248 = vmatmul.mubr.f32.gmra.mrb[6].mxu1 %v3956_v29 }
 0x315   : > { %v3957_v48 = vmax.f32 %v3925_v43, 0.0  ;;  %v3888_v27 = vmul.f32 %v12514_v28, %v3722_v59 }
 0x316   : > { %3990 = vst [vmem:[#allocation2 + $0x50] sm:$0xff] %v3958_v46  ;;  %v3928_v33 = vadd.f32 %v12519_v7, %v3889_v24 }
 0x317   : > { %3989 = vst [vmem:[#allocation2 + $0x48] sm:$0xff] %v3957_v48  ;;  %v3927_v51 = vadd.f32 %v12519_v7, %v3888_v27  ;;  %v9175_v56 = vpop.f32.mrb[10].mxu0  ;;  %9250 = vmatprep.mubr.f32.mxu1 %v3957_v48 }
 0x318   : > { %v3960_v35 = vmax.f32 %v3928_v33, 0.0  ;;  %v3891_v2 = vmul.f32 %v9175_v56, %v12514_v28  ;;  %v3732_v12 = vpop.f32.mrb[11].mxu0  ;;  %9251 = vmatmul.mubr.f32.gmra.mrb[8].mxu1 %v3958_v46 }
 0x319   : > { %v3959_v55 = vmax.f32 %v3927_v51, 0.0  ;;  %v3890_v3 = vmul.f32 %v12514_v28, %v3732_v12 }
 0x31a   : > { %3992 = vst [vmem:[#allocation2 + $0x60] sm:$0xff] %v3960_v35  ;;  %v3930_v53 = vadd.f32 %v12519_v7, %v3891_v2 }
 0x31b   : > { %3991 = vst [vmem:[#allocation2 + $0x58] sm:$0xff] %v3959_v55  ;;  %v3929_v37 = vadd.f32 %v12519_v7, %v3890_v3  ;;  %v9178_v44 = vpop.f32.mrb[12].mxu0  ;;  %9253 = vmatprep.mubr.f32.mxu1 %v3959_v55 }
 0x31c   : > { %v3962_v49 = vmax.f32 %v3930_v53, 0.0  ;;  %v3893_v4 = vmul.f32 %v9178_v44, %v12514_v28  ;;  %v3742_v21 = vpop.f32.mrb[13].mxu0  ;;  %9254 = vmatmul.mubr.f32.gmra.mrb[10].mxu1 %v3960_v35 }
 0x31d   : > { %v3961_v15 = vmax.f32 %v3929_v37, 0.0  ;;  %v3892_v40 = vmul.f32 %v12514_v28, %v3742_v21 }
 0x31e   : > { %3994 = vst [vmem:[#allocation2 + $0x70] sm:$0xff] %v3962_v49  ;;  %v3932_v11 = vadd.f32 %v12519_v7, %v3893_v4 }
 0x31f   : > { %3993 = vst [vmem:[#allocation2 + $0x68] sm:$0xff] %v3961_v15  ;;  %v3931_v29 = vadd.f32 %v12519_v7, %v3892_v40  ;;  %v9181_v31 = vpop.f32.mrb[14].mxu0  ;;  %9256 = vmatprep.mubr.f32.mxu1 %v3961_v15 }
 0x320   : > { %v3964_v8 = vmax.f32 %v3932_v11, 0.0  ;;  %v3895_v45 = vmul.f32 %v9181_v31, %v12514_v28  ;;  %v3752_v17 = vpop.f32.mrb[15].mxu0  ;;  %9257 = vmatmul.mubr.f32.gmra.mrb[12].mxu1 %v3962_v49 }
 0x321   : > { %v3963_v41 = vmax.f32 %v3931_v29, 0.0  ;;  %v3894_v43 = vmul.f32 %v12514_v28, %v3752_v17 }
 0x322   : > { %3996 = vst [vmem:[#allocation2 + $0x80] sm:$0xff] %v3964_v8  ;;  %v3934_v62 = vadd.f32 %v12519_v7, %v3895_v45 }
 0x323   : > { %3995 = vst [vmem:[#allocation2 + $0x78] sm:$0xff] %v3963_v41  ;;  %v3933_v46 = vadd.f32 %v12519_v7, %v3894_v43  ;;  %v9184_v24 = vpop.f32.mrb[16].mxu0  ;;  %9259 = vmatprep.mubr.f32.mxu1 %v3963_v41 }
 0x324   : > { %v3966_v59 = vmax.f32 %v3934_v62, 0.0  ;;  %v3897_v48 = vmul.f32 %v9184_v24, %v12514_v28  ;;  %v3762_v27 = vpop.f32.mrb[17].mxu0  ;;  %9260 = vmatmul.mubr.f32.gmra.mrb[14].mxu1 %v3964_v8 }
 0x325   : > { %v3965_v33 = vmax.f32 %v3933_v46, 0.0  ;;  %v3896_v51 = vmul.f32 %v12514_v28, %v3762_v27 }
 0x326   : > { %3998 = vst [vmem:[#allocation2 + $0x90] sm:$0xff] %v3966_v59  ;;  %v3936_v56 = vadd.f32 %v12519_v7, %v3897_v48 }
 0x327   : > { %3997 = vst [vmem:[#allocation2 + $0x88] sm:$0xff] %v3965_v33  ;;  %v3935_v35 = vadd.f32 %v12519_v7, %v3896_v51  ;;  %v9187_v2 = vpop.f32.mrb[18].mxu0  ;;  %9262 = vmatprep.mubr.f32.mxu1 %v3965_v33 }
 0x328   : > { %v12557_v12 = vmax.f32 %v3936_v56, 0.0  ;;  %v3899_v55 = vmul.f32 %v9187_v2, %v12514_v28  ;;  %v3772_v3 = vpop.f32.mrb[19].mxu0  ;;  %9263 = vmatmul.mubr.f32.gmra.mrb[16].mxu1 %v3966_v59 }
 0x329   : > { %v12560_v53 = vmax.f32 %v3935_v35, 0.0  ;;  %v3898_v37 = vmul.f32 %v12514_v28, %v3772_v3 }
 0x32a   : > { %14121 = vst [vmem:[#allocation12_spill] sm:$0xff] %v12557_v12  ;;  %4000 = vst [vmem:[#allocation2 + $0xa0] sm:$0xff] %v12557_v12  ;;  %v3938_v44 = vadd.f32 %v12519_v7, %v3899_v55  ;;  %v12920_v32 = vld [vmem:[#allocation2 + $0x79] sm:$0xff] }
 0x32b   : > { %14122 = vst [vmem:[#allocation14_spill] sm:$0xff] %v12560_v53  ;;  %3999 = vst [vmem:[#allocation2 + $0x98] sm:$0xff] %v12560_v53  ;;  %v3937_v49 = vadd.f32 %v12519_v7, %v3898_v37  ;;  %v9190_v4 = vpop.f32.mrb[20].mxu0  ;;  %9265 = vmatprep.mubr.f32.mxu1 %v12560_v53 }
 0x32c   : > { %v12568_v21 = vmax.f32 %v3938_v44, 0.0  ;;  %v3901_v15 = vmul.f32 %v9190_v4, %v12514_v28  ;;  %v3782_v40 = vpop.f32.mrb[21].mxu0  ;;  %9266 = vmatmul.mubr.f32.gmra.mrb[18].mxu1 %v12557_v12  ;;  %v4594_v12 = vld [vmem:[#allocation2 + $0x9] sm:$0xff] }
 0x32d   : > { %v12572_v11 = vmax.f32 %v3937_v49, 0.0  ;;  %v3900_v29 = vmul.f32 %v12514_v28, %v3782_v40 }
 0x32e   : > { %14123 = vst [vmem:[#allocation15_spill] sm:$0xff] %v12568_v21  ;;  %4002 = vst [vmem:[#allocation2 + $0xb0] sm:$0xff] %v12568_v21  ;;  %v3940_v31 = vadd.f32 %v12519_v7, %v3901_v15 }
 0x32f   : > { %14124 = vst [vmem:[#allocation17_spill] sm:$0xff] %v12572_v11  ;;  %4001 = vst [vmem:[#allocation2 + $0xa8] sm:$0xff] %v12572_v11  ;;  %v3939_v8 = vadd.f32 %v12519_v7, %v3900_v29  ;;  %v9193_v45 = vpop.f32.mrb[22].mxu0  ;;  %9268 = vmatprep.mubr.f32.mxu1 %v12572_v11 }
 0x330   : > { %v12580_v17 = vmax.f32 %v3940_v31, 0.0  ;;  %v3903_v41 = vmul.f32 %v9193_v45, %v12514_v28  ;;  %v3792_v43 = vpop.f32.mrb[23].mxu0  ;;  %9269 = vmatmul.mubr.f32.gmra.mrb[20].mxu1 %v12568_v21 }
 0x331   : > { %v12584_v62 = vmax.f32 %v3939_v8, 0.0  ;;  %v3902_v46 = vmul.f32 %v12514_v28, %v3792_v43 }
 0x332   : > { %14125 = vst [vmem:[#allocation18_spill] sm:$0xff] %v12580_v17  ;;  %4004 = vst [vmem:[#allocation2 + $0xc0] sm:$0xff] %v12580_v17  ;;  %v3942_v24 = vadd.f32 %v12519_v7, %v3903_v41  ;;  %v12931_v50 = vld [vmem:[#allocation2 + $0x91] sm:$0xff] }
 0x333   : > { %14126 = vst [vmem:[#allocation20_spill] sm:$0xff] %v12584_v62  ;;  %4003 = vst [vmem:[#allocation2 + $0xb8] sm:$0xff] %v12584_v62  ;;  %v3941_v59 = vadd.f32 %v12519_v7, %v3902_v46  ;;  %v9196_v48 = vpop.f32.mrb[24].mxu0  ;;  %9271 = vmatprep.mubr.f32.mxu1 %v12584_v62 }
 0x334   : > { %v12592_v27 = vmax.f32 %v3942_v24, 0.0  ;;  %v3905_v33 = vmul.f32 %v9196_v48, %v12514_v28  ;;  %v3802_v51 = vpop.f32.mrb[25].mxu0  ;;  %9272 = vmatmul.mubr.f32.gmra.mrb[22].mxu1 %v12580_v17 }
 0x335   : > { %v12596_v56 = vmax.f32 %v3941_v59, 0.0  ;;  %v3904_v35 = vmul.f32 %v12514_v28, %v3802_v51 }
 0x336   : > { %14127 = vst [vmem:[#allocation21_spill] sm:$0xff] %v12592_v27  ;;  %4006 = vst [vmem:[#allocation2 + $0xd0] sm:$0xff] %v12592_v27  ;;  %v3944_v2 = vadd.f32 %v12519_v7, %v3905_v33 }
 0x337   : > { %14128 = vst [vmem:[#allocation23_spill] sm:$0xff] %v12596_v56  ;;  %4005 = vst [vmem:[#allocation2 + $0xc8] sm:$0xff] %v12596_v56  ;;  %v3943_v55 = vadd.f32 %v12519_v7, %v3904_v35  ;;  %v9199_v3 = vpop.f32.mrb[26].mxu0  ;;  %9274 = vmatprep.mubr.f32.mxu1 %v12596_v56 }
 0x338   : > { %v12604_v37 = vmax.f32 %v3944_v2, 0.0  ;;  %v3907_v44 = vmul.f32 %v9199_v3, %v12514_v28  ;;  %v3812_v49 = vpop.f32.mrb[27].mxu0  ;;  %9275 = vmatmul.mubr.f32.gmra.mrb[24].mxu1 %v12592_v27 }
 0x339   : > { %v12608_v4 = vmax.f32 %v3943_v55, 0.0  ;;  %v3906_v15 = vmul.f32 %v12514_v28, %v3812_v49 }
 0x33a   : > { %14129 = vst [vmem:[#allocation24_spill] sm:$0xff] %v12604_v37  ;;  %4008 = vst [vmem:[#allocation2 + $0xe0] sm:$0xff] %v12604_v37  ;;  %v3946_v40 = vadd.f32 %v12519_v7, %v3907_v44  ;;  %v4015_v44 = vld [vmem:[#allocation2 + $0x7] sm:$0xff]  ;;  %v12952_v58 = vld [vmem:[#allocation2 + $0xb9] sm:$0xff] }
 0x33b   : > { %14130 = vst [vmem:[#allocation26_spill] sm:$0xff] %v12608_v4  ;;  %4007 = vst [vmem:[#allocation2 + $0xd8] sm:$0xff] %v12608_v4  ;;  %v3945_v29 = vadd.f32 %v12519_v7, %v3906_v15  ;;  %v9202_v31 = vpop.f32.mrb[28].mxu0  ;;  %9277 = vmatprep.mubr.f32.mxu1 %v12608_v4  ;;  %v7426_v15 = vld [vmem:[%s13714_s2 + $0x110] sm:$0xff] }
 0x33c   : > { %v12616_v8 = vmax.f32 %v3946_v40, 0.0  ;;  %v3909_v45 = vmul.f32 %v9202_v31, %v12514_v28  ;;  %v3822_v41 = vpop.f32.mrb[29].mxu0  ;;  %9278 = vmatmul.mubr.f32.gmra.mrb[26].mxu1 %v12604_v37  ;;  %v12787_v37 = vld [vmem:[#allocation2 + $0xbf] sm:$0xff]  ;;  %14166 = vst [vmem:[#allocation51_spill] sm:$0xff] %v12952_v58 }
 0x33d   : > { %v12620_v43 = vmax.f32 %v3945_v29, 0.0  ;;  %v3908_v46 = vmul.f32 %v12514_v28, %v3822_v41  ;;  %v7429_v41 = vld [vmem:[%s13714_s2 + $0x128] sm:$0xff] }
 0x33e   : > { %14131 = vst [vmem:[#allocation27_spill] sm:$0xff] %v12616_v8  ;;  %4010 = vst [vmem:[#allocation2 + $0xf0] sm:$0xff] %v12616_v8  ;;  %v3948_v24 = vadd.f32 %v12519_v7, %v3909_v45  ;;  %v7428_v45 = vld [vmem:[%s13714_s2 + $0x120] sm:$0xff]  ;;  %v12795_v27 = vld [vmem:[#allocation2 + $0xcf] sm:$0xff] }
 0x33f   : > { %14132 = vst [vmem:[#allocation29_spill] sm:$0xff] %v12620_v43  ;;  %4009 = vst [vmem:[#allocation2 + $0xe8] sm:$0xff] %v12620_v43  ;;  %v3947_v59 = vadd.f32 %v12519_v7, %v3908_v46  ;;  %v9205_v48 = vpop.f32.mrb[30].mxu0  ;;  %9280 = vmatprep.mubr.f32.mxu1 %v12620_v43  ;;  %v12665_v46 = vld [vmem:[#allocation2 + $0x17] sm:$0xff]  ;;  %v12790_v4 = vld [vmem:[#allocation2 + $0xc7] sm:$0xff] }
 0x340   : > { %v12628_v33 = vmax.f32 %v3948_v24, 0.0  ;;  %v3911_v51 = vmul.f32 %v9205_v48, %v12514_v28  ;;  %v3832_v35 = vpop.f32.mrb[31].mxu0  ;;  %9281 = vmatmul.mubr.f32.gmra.mrb[28].mxu1 %v12616_v8  ;;  %v10286_v24 = vpack.c.bf16 %v7429_v41, %v7428_v45  ;;  %v7430_v48 = vld [vmem:[%s13714_s2 + $0x130] sm:$0xff]  ;;  %v7435_v41 = vld [vmem:[%s13714_s2 + $0x158] sm:$0xff] }
 0x341   : > { %v12632_v2 = vmax.f32 %v3947_v59, 0.0  ;;  %v3910_v55 = vmul.f32 %v12514_v28, %v3832_v35  ;;  %v7427_v28 = vld [vmem:[%s13714_s2 + $0x118] sm:$0xff]  ;;  %v12680_v35 = vld [vmem:[#allocation2 + $0x27] sm:$0xff]  ;;  %v7434_v45 = vld [vmem:[%s13714_s2 + $0x150] sm:$0xff] }
 0x342   : > { %14133 = vst [vmem:[#allocation31_spill] sm:$0xff] %v12628_v33  ;;  %4012 = vst [vmem:[#allocation2 + $0x100] sm:$0xff] %v12628_v33  ;;  %v12637_v3 = vadd.f32 %v12519_v7, %v3911_v51  ;;  %v10282_v31 = vpack.c.bf16 %v7427_v28, %v7426_v15  ;;  %v12671_v59 = vld [vmem:[#allocation2 + $0x1f] sm:$0xff]  ;;  %v7433_v15 = vld [vmem:[%s13714_s2 + $0x148] sm:$0xff] }
 0x343   : > { %14134 = vst [vmem:[#allocation32_spill] sm:$0xff] %v12632_v2  ;;  %4011 = vst [vmem:[#allocation2 + $0xf8] sm:$0xff] %v12632_v2  ;;  %v12641_v49 = vadd.f32 %v12519_v7, %v3910_v55  ;;  %9283 = vmatprep.mubr.f32.mxu1 %v12632_v2  ;;  %v4016_v7 = vld [vmem:[#allocation2 + $0xf] sm:$0xff]  ;;  %v7431_v51 = vld [vmem:[%s13714_s2 + $0x138] sm:$0xff] }
 0x344   : > { %14135 = vst [vmem:[#allocation34_spill] sm:$0xff] %v12637_v3  ;;  %v13829_v40 = vmax.f32 %v12637_v3, 0.0  ;;  %9284 = vmatmul.mubr.f32.gmra.mrb[30].mxu1 %v12628_v33  ;;  %v12685_v55 = vld [vmem:[#allocation2 + $0x2f] sm:$0xff]  ;;  %v12694_v28 = vld [vmem:[#allocation2 + $0x37] sm:$0xff]  ;;  %v12736_v3 = vld [vmem:[#allocation2 + $0x67] sm:$0xff] }
 0x345   : > { %14136 = vst [vmem:[#allocation35_spill] sm:$0xff] %v12641_v49  ;;  %v13832_v29 = vmax.f32 %v12641_v49, 0.0  ;;  %9318 = vmatprep.mubr.msk.f32.mxu1 %vm11339_vm2, %v4015_v44  ;;  %v7432_v44 = vld [vmem:[%s13714_s2 + $0x140] sm:$0xff]  ;;  %v7457_v49 = vld [vmem:[%s13714_s2 + $0x188] sm:$0xff]  ;;  %v12750_v33 = vld [vmem:[#allocation2 + $0x77] sm:$0xff] }
 0x346   : > { %4014 = vst [vmem:[#allocation2 + $0x110] sm:$0xff] %v13829_v40  ;;  %v12722_v40 = vld [vmem:[#allocation2 + $0x57] sm:$0xff]  ;;  %v12763_v8 = vld [vmem:[#allocation2 + $0x8f] sm:$0xff]  ;;  %v12803_v17 = vld [vmem:[#allocation2 + $0xdf] sm:$0xff] }
 0x347   : > { %4013 = vst [vmem:[#allocation2 + $0x108] sm:$0xff] %v13832_v29  ;;  %v7439_v29 = vld [vmem:[%s13714_s2 + $0x178] sm:$0xff]  ;;  %v14139_v2 = vld [vmem:[#allocation3_spill] sm:$0xff]  ;;  %14148 = vst [vmem:[#allocation38_spill] sm:$0xff] %v12803_v17 }
 0x348   : > { %9319 = vmatmul.mubr.f32.vlgmr.msra.gmra.mrb[0].mxu1 %v4016_v7  ;;  %v10294_v7 = vpack.c.bf16 %v7433_v15, %v7432_v44  ;;  %v7436_v44 = vld [vmem:[%s13714_s2 + $0x160] sm:$0xff]  ;;  %v7437_v15 = vld [vmem:[%s13714_s2 + $0x168] sm:$0xff]  ;;  %v12766_v43 = vld [vmem:[#allocation2 + $0x97] sm:$0xff] }
 0x349   : > { %9321 = vmatprep.mubr.msk.f32.mxu1 %vm11353_vm3, %v12665_v46  ;;  %10281 = vmatpush3.bf16.msra.mxu1 %v12508_v5  ;;  %v10290_v5 = vpack.c.bf16 %v7431_v51, %v7430_v48  ;;  %v12708_v48 = vld [vmem:[#allocation2 + $0x47] sm:$0xff]  ;;  %v12713_v51 = vld [vmem:[#allocation2 + $0x4f] sm:$0xff]  ;;  %v12798_v56 = vld [vmem:[#allocation2 + $0xd7] sm:$0xff] }
 0x34a   : > { %10283 = vmatprep.subr.bf16.mxu1 %v10282_v31  ;;  %14146 = vst [vmem:[#allocation37_spill] sm:$0xff] %v12798_v56  ;;  %v12806_v62 = vld [vmem:[#allocation2 + $0xe7] sm:$0xff]  ;;  %v12811_v21 = vld [vmem:[#allocation2 + $0xef] sm:$0xff]  ;;  %v12814_v11 = vld [vmem:[#allocation2 + $0xf7] sm:$0xff] }
 0x34b   : > { %14149 = vst [vmem:[#allocation40_spill] sm:$0xff] %v12806_v62  ;;  %14151 = vst [vmem:[#allocation41_spill] sm:$0xff] %v12811_v21  ;;  %v12819_v53 = vld [vmem:[#allocation2 + $0xff] sm:$0xff]  ;;  %v12960_v23 = vld [vmem:[#allocation2 + $0xc9] sm:$0xff] }
 0x34c   : > { %9322 = vmatmul.mubr.f32.gmra.mrb[2].mxu1 %v12671_v59  ;;  %14152 = vst [vmem:[#allocation44_spill] sm:$0xff] %v12814_v11  ;;  %14154 = vst [vmem:[#allocation46_spill] sm:$0xff] %v12819_v53  ;;  %v12968_v13 = vld [vmem:[#allocation2 + $0xd9] sm:$0xff]  ;;  %v12976_v47 = vld [vmem:[#allocation2 + $0xe9] sm:$0xff] }
 0x34d   : > { %9324 = vmatprep.mubr.msk.f32.mxu1 %vm11371_vm4, %v12680_v35  ;;  %10285 = vmatpush3.bf16.msra.mxu1 %v10282_v31  ;;  %v12699_v31 = vld [vmem:[#allocation2 + $0x3f] sm:$0xff]  ;;  %vm14144_vm4 = vnez %v13951_v18  ;;  %14167 = vst [vmem:[#allocation52_spill] sm:$0xff] %v12960_v23  ;;  %14168 = vst [vmem:[#allocation53_spill] sm:$0xff] %v12968_v13 }
 0x34e   : > { %10287 = vmatprep.subr.bf16.mxu1 %v10286_v24  ;;  %14169 = vst [vmem:[#allocation54_spill] sm:$0xff] %v12976_v47  ;;  %v12984_v19 = vld [vmem:[#allocation2 + $0xf9] sm:$0xff] }
 0x34f   : > { %14171 = vst [vmem:[#allocation56_spill] sm:$0xff] %v12984_v19  ;;  %v6580_v36 = vld [vmem:[#allocation2 + $0xd9] sm:$0xff] }
 0x350   : > { %9325 = vmatmul.mubr.f32.gmra.mrb[4].mxu1 %v12685_v55 }
 0x351   : > { %9327 = vmatprep.mubr.msk.f32.mxu1 %vm11390_vm5, %v12694_v28  ;;  %10289 = vmatpush3.bf16.msra.mxu1 %v10286_v24  ;;  %v10298_v24 = vpack.c.bf16 %v7435_v41, %v7434_v45  ;;  %v12727_v45 = vld [vmem:[#allocation2 + $0x5f] sm:$0xff]  ;;  %v7438_v41 = vld [vmem:[%s13714_s2 + $0x170] sm:$0xff]  ;;  %vm14141_vm5 = vnez %v13945_v57 }
 0x352   : > { %10291 = vmatprep.subr.bf16.mxu1 %v10290_v5 }
 0x354   : > { %9328 = vmatmul.mubr.f32.gmra.mrb[6].mxu1 %v12699_v31 }
 0x355   : > { %9330 = vmatprep.mubr.msk.f32.mxu1 %vm11409_vm6, %v12708_v48  ;;  %10293 = vmatpush3.bf16.msra.mxu1 %v10290_v5  ;;  %vm14137_vm6 = vnez %v13938_v30  ;;  %v10302_v5 = vpack.c.bf16 %v7437_v15, %v7436_v44  ;;  %v12741_v44 = vld [vmem:[#allocation2 + $0x6f] sm:$0xff]  ;;  %v7456_v15 = vld [vmem:[%s13714_s2 + $0x180] sm:$0xff] }
 0x356   : > { %10295 = vmatprep.subr.bf16.mxu1 %v10294_v7 }
 0x358   : > { %9331 = vmatmul.mubr.f32.gmra.mrb[8].mxu1 %v12713_v51 }
 0x359   : > { %9333 = vmatprep.mubr.msk.f32.mxu1 %vm14137_vm6, %v12722_v40  ;;  %10297 = vmatpush3.bf16.msra.mxu1 %v10294_v7  ;;  %vm14138_vm6 = vnez %v13940_v38  ;;  %v10306_v7 = vpack.c.bf16 %v7439_v29, %v7438_v41  ;;  %v10310_v29 = vpack.c.bf16 %v7457_v49, %v7456_v15  ;;  %v12758_v41 = vld [vmem:[#allocation2 + $0x87] sm:$0xff]  ;;  %v12771_v49 = vld [vmem:[#allocation2 + $0x9f] sm:$0xff]  ;;  %v12782_v15 = vld [vmem:[#allocation2 + $0xb7] sm:$0xff] }
 0x35a   : > { %10299 = vmatprep.subr.bf16.mxu1 %v10298_v24 }
 0x35c   : > { %9334 = vmatmul.mubr.f32.gmra.mrb[10].mxu1 %v12727_v45 }
 0x35d   : > { %9336 = vmatprep.mubr.msk.f32.mxu1 %vm14138_vm6, %v12736_v3  ;;  %10301 = vmatpush3.bf16.msra.mxu1 %v10298_v24  ;;  %vm14140_vm6 = vnez %v14139_v2  ;;  %v12755_v24 = vld [vmem:[#allocation2 + $0x7f] sm:$0xff] }
 0x35e   : > { %10303 = vmatprep.subr.bf16.mxu1 %v10302_v5 }
 0x360   : > { %9337 = vmatmul.mubr.f32.gmra.mrb[12].mxu1 %v12741_v44 }
 0x361   : > { %9339 = vmatprep.mubr.msk.f32.mxu1 %vm14140_vm6, %v12750_v33  ;;  %10305 = vmatpush3.bf16.msra.mxu1 %v10302_v5  ;;  %vm14142_vm6 = vnez %v13947_v1  ;;  %v12774_v5 = vld [vmem:[#allocation2 + $0xa7] sm:$0xff] }
 0x362   : > { %10307 = vmatprep.subr.bf16.mxu1 %v10306_v7 }
 0x364   : > { %9340 = vmatmul.mubr.f32.gmra.mrb[14].mxu1 %v12755_v24 }
 0x365   : > { %9342 = vmatprep.mubr.msk.f32.mxu1 %vm14141_vm5, %v12758_v41  ;;  %10309 = vmatpush3.bf16.msra.mxu1 %v10306_v7  ;;  %vm14143_vm5 = vnez %v13949_v10  ;;  %v12779_v7 = vld [vmem:[#allocation2 + $0xaf] sm:$0xff] }
 0x366   : > { %10311 = vmatprep.subr.bf16.mxu1 %v10310_v29 }
 0x368   : > { %9343 = vmatmul.mubr.f32.gmra.mrb[16].mxu1 %v12763_v8 }
 0x369   : > { %9345 = vmatprep.mubr.msk.f32.mxu1 %vm14142_vm6, %v12766_v43  ;;  %vm14145_vm6 = vnez %v13954_v26 }
 0x36c   : > { %9346 = vmatmul.mubr.f32.gmra.mrb[18].mxu1 %v12771_v49 }
 0x36d   : > { %9348 = vmatprep.mubr.msk.f32.mxu1 %vm14143_vm5, %v12774_v5  ;;  %vm14147_vm5 = vnez %v13957_v34  ;;  %v7458_v34 = vld [vmem:[%s13714_s2 + $0x190] sm:$0xff] }
 0x370   : > { %9349 = vmatmul.mubr.f32.gmra.mrb[20].mxu1 %v12779_v7 }
 0x371   : > { %9351 = vmatprep.mubr.msk.f32.mxu1 %vm14144_vm4, %v12782_v15  ;;  %vm14150_vm4 = vnez %v13960_v42  ;;  %v7459_v42 = vld [vmem:[%s13714_s2 + $0x198] sm:$0xff] }
 0x374   : > { %9352 = vmatmul.mubr.f32.gmra.mrb[22].mxu1 %v12787_v37 }
 0x375   : > { %9354 = vmatprep.mubr.msk.f32.mxu1 %vm14145_vm6, %v12790_v4  ;;  %vm14153_vm6 = vnez %v13964_v52  ;;  %v7460_v52 = vld [vmem:[%s13714_s2 + $0x1a0] sm:$0xff] }
 0x378   : > { %9355 = vmatmul.mubr.f32.gmra.mrb[24].mxu1 %v12795_v27 }
 0x379   : > { %9357 = vmatprep.mubr.msk.f32.mxu1 %vm14147_vm5, %v12798_v56 }
 0x37c   : > { %9358 = vmatmul.mubr.f32.gmra.mrb[26].mxu1 %v12803_v17  ;;  %v12836_v17 = vld [vmem:[#allocation2 + $0x19] sm:$0xff] }
 0x37d   : > { %9360 = vmatprep.mubr.msk.f32.mxu1 %vm14150_vm4, %v12806_v62  ;;  %v4595_v62 = vld [vmem:[#allocation2 + $0x11] sm:$0xff] }
 0x380   : > { %9361 = vmatmul.mubr.f32.gmra.mrb[28].mxu1 %v12811_v21  ;;  %v10314_v21 = vpack.c.bf16 %v7459_v42, %v7458_v34  ;;  %v12839_v34 = vld [vmem:[#allocation2 + $0x21] sm:$0xff]  ;;  %v7462_v42 = vld [vmem:[%s13714_s2 + $0x1b0] sm:$0xff] }
 0x381   : > { %9363 = vmatprep.mubr.msk.f32.mxu1 %vm14153_vm6, %v12814_v11  ;;  %v7461_v11 = vld [vmem:[%s13714_s2 + $0x1a8] sm:$0xff]  ;;  %vm14155_vm6 = vnez %v14105_v60 }
 0x382   : > { %v7465_v60 = vld [vmem:[%s13714_s2 + $0x1c8] sm:$0xff] }
 0x384   : > { %9364 = vmatmul.mubr.f32.gmra.mrb[30].mxu1 %v12819_v53  ;;  %v7463_v53 = vld [vmem:[%s13714_s2 + $0x1b8] sm:$0xff] }
 0x385   : > { %9398 = vmatprep.mubr.f32.mxu1 %v4594_v12  ;;  %v10318_v12 = vpack.c.bf16 %v7461_v11, %v7460_v52  ;;  %v10322_v52 = vpack.c.bf16 %v7463_v53, %v7462_v42  ;;  %v12853_v11 = vld [vmem:[#allocation2 + $0x31] sm:$0xff] }
 0x386   : > { %v7466_v42 = vld [vmem:[%s13714_s2 + $0x1d0] sm:$0xff] }
 0x388   : > { %9399 = vmatmul.mubr.msk.f32.vlgmr.msra.gmra.mrb[0].mxu1 %vm14155_vm6, %v4595_v62  ;;  %vm14156_vm6 = vnez %v14107_v63  ;;  %v12850_v62 = vld [vmem:[#allocation2 + $0x29] sm:$0xff]  ;;  %v12864_v63 = vld [vmem:[#allocation2 + $0x39] sm:$0xff] }
 0x389   : > { %9401 = vmatprep.mubr.f32.mxu1 %v12836_v17  ;;  %10313 = vmatpush3.bf16.msra.mxu1 %v10310_v29  ;;  %14157 = vst [vmem:[#allocation47_spill] sm:$0xff] %v12850_v62  ;;  %v7464_v29 = vld [vmem:[%s13714_s2 + $0x1c0] sm:$0xff]  ;;  %14159 = vst [vmem:[#allocation48_spill] sm:$0xff] %v12864_v63 }
 0x38a   : > { %10315 = vmatprep.subr.bf16.mxu1 %v10314_v21  ;;  %v10326_v53 = vpack.c.bf16 %v7465_v60, %v7464_v29  ;;  %v7468_v29 = vld [vmem:[%s13714_s2 + $0x1e0] sm:$0xff] }
 0x38c   : > { %9402 = vmatmul.mubr.msk.f32.gmra.mrb[2].mxu1 %vm14156_vm6, %v12839_v34  ;;  %vm14158_vm6 = vnez %v14109_v20  ;;  %v12878_v20 = vld [vmem:[#allocation2 + $0x49] sm:$0xff] }
 0x38d   : > { %9404 = vmatprep.mubr.f32.mxu1 %v12850_v62  ;;  %10317 = vmatpush3.bf16.msra.mxu1 %v10314_v21  ;;  %v12867_v21 = vld [vmem:[#allocation2 + $0x41] sm:$0xff]  ;;  %v7467_v62 = vld [vmem:[%s13714_s2 + $0x1d8] sm:$0xff]  ;;  %14161 = vst [vmem:[#allocation49_spill] sm:$0xff] %v12878_v20 }
 0x38e   : > { %10319 = vmatprep.subr.bf16.mxu1 %v10318_v12  ;;  %v10330_v60 = vpack.c.bf16 %v7467_v62, %v7466_v42  ;;  %v7470_v42 = vld [vmem:[%s13714_s2 + $0x1f0] sm:$0xff] }
 0x390   : > { %9405 = vmatmul.mubr.msk.f32.gmra.mrb[4].mxu1 %vm14158_vm6, %v12853_v11  ;;  %vm14160_vm6 = vnez %v14056_v39  ;;  %v12892_v39 = vld [vmem:[#allocation2 + $0x59] sm:$0xff] }
 0x391   : > { %9407 = vmatprep.mubr.f32.mxu1 %v12864_v63  ;;  %10321 = vmatpush3.bf16.msra.mxu1 %v10318_v12  ;;  %v12881_v12 = vld [vmem:[#allocation2 + $0x51] sm:$0xff]  ;;  %v7469_v63 = vld [vmem:[%s13714_s2 + $0x1e8] sm:$0xff]  ;;  %14163 = vst [vmem:[#allocation50_spill] sm:$0xff] %v12892_v39 }
 0x392   : > { %10323 = vmatprep.subr.bf16.mxu1 %v10322_v52  ;;  %v10334_v62 = vpack.c.bf16 %v7469_v63, %v7468_v29  ;;  %v7488_v29 = vld [vmem:[%s13714_s2 + $0x200] sm:$0xff] }
 0x394   : > { %9408 = vmatmul.mubr.msk.f32.gmra.mrb[6].mxu1 %vm14160_vm6, %v12867_v21  ;;  %vm14162_vm6 = vnez %v14060_v0  ;;  %v12906_v0 = vld [vmem:[#allocation2 + $0x69] sm:$0xff] }
 0x395   : > { %9410 = vmatprep.mubr.f32.mxu1 %v12878_v20  ;;  %10325 = vmatpush3.bf16.msra.mxu1 %v10322_v52  ;;  %v12895_v52 = vld [vmem:[#allocation2 + $0x61] sm:$0xff]  ;;  %v7471_v20 = vld [vmem:[%s13714_s2 + $0x1f8] sm:$0xff] }
 0x396   : > { %10327 = vmatprep.subr.bf16.mxu1 %v10326_v53  ;;  %v10338_v63 = vpack.c.bf16 %v7471_v20, %v7470_v42  ;;  %v12928_v42 = vld [vmem:[#allocation2 + $0x89] sm:$0xff] }
 0x398   : > { %9411 = vmatmul.mubr.msk.f32.gmra.mrb[8].mxu1 %vm14162_vm6, %v12881_v12 }
 0x399   : > { %9413 = vmatprep.mubr.f32.mxu1 %v12892_v39  ;;  %10329 = vmatpush3.bf16.msra.mxu1 %v10326_v53  ;;  %v12909_v53 = vld [vmem:[#allocation2 + $0x71] sm:$0xff]  ;;  %v7489_v39 = vld [vmem:[%s13714_s2 + $0x208] sm:$0xff] }
 0x39a   : > { %10331 = vmatprep.subr.bf16.mxu1 %v10330_v60  ;;  %v10342_v20 = vpack.c.bf16 %v7489_v39, %v7488_v29  ;;  %v12939_v39 = vld [vmem:[#allocation2 + $0xa1] sm:$0xff]  ;;  %v12944_v29 = vld [vmem:[#allocation2 + $0xa9] sm:$0xff] }
 0x39b   : > { %14165 = vst [vmem:[#allocation3_spill] sm:$0xff] %v12944_v29 }
 0x39c   : > { %9414 = vmatmul.mubr.msk.f32.gmra.mrb[10].mxu1 %vm14113_vm12, %v12895_v52 }
 0x39d   : > { %9416 = vmatprep.mubr.f32.mxu1 %v12906_v0  ;;  %10333 = vmatpush3.bf16.msra.mxu1 %v10330_v60  ;;  %v12923_v60 = vld [vmem:[#allocation2 + $0x81] sm:$0xff] }
 0x39e   : > { %10335 = vmatprep.subr.bf16.mxu1 %v10334_v62 }
 0x3a0   : > { %9417 = vmatmul.mubr.msk.f32.gmra.mrb[12].mxu1 %vm14115_vm7, %v12909_v53 }
 0x3a1   : > { %9419 = vmatprep.mubr.f32.mxu1 %v12920_v32  ;;  %10337 = vmatpush3.bf16.msra.mxu1 %v10334_v62  ;;  %v12936_v62 = vld [vmem:[#allocation2 + $0x99] sm:$0xff] }
 0x3a2   : > { %10339 = vmatprep.subr.bf16.mxu1 %v10338_v63  ;;  %14164 = vst [vmem:[#allocation11_spill] sm:$0xff] %v12936_v62 }
 0x3a4   : > { %9420 = vmatmul.mubr.msk.f32.gmra.mrb[14].mxu1 %vm14116_vm8, %v12923_v60 }
 0x3a5   : > { %9422 = vmatprep.mubr.f32.mxu1 %v12928_v42  ;;  %10341 = vmatpush3.bf16.msra.mxu1 %v10338_v63  ;;  %v12947_v63 = vld [vmem:[#allocation2 + $0xb1] sm:$0xff] }
 0x3a6   : > { %10343 = vmatprep.subr.bf16.mxu1 %v10342_v20 }
 0x3a8   : > { %9423 = vmatmul.mubr.msk.f32.gmra.mrb[16].mxu1 %vm14117_vm9, %v12931_v50 }
 0x3a9   : > { %9425 = vmatprep.mubr.f32.mxu1 %v12936_v62  ;;  %v12955_v62 = vld [vmem:[#allocation2 + $0xc1] sm:$0xff] }
 0x3ac   : > { %9426 = vmatmul.mubr.msk.f32.gmra.mrb[18].mxu1 %vm14077_vm13, %v12939_v39 }
 0x3ad   : > { %9428 = vmatprep.mubr.f32.mxu1 %v12944_v29  ;;  %v12963_v29 = vld [vmem:[#allocation2 + $0xd1] sm:$0xff] }
 0x3b0   : > { %9429 = vmatmul.mubr.msk.f32.gmra.mrb[20].mxu1 %vm14081_vm10, %v12947_v63 }
 0x3b1   : > { %9431 = vmatprep.mubr.f32.mxu1 %v12952_v58  ;;  %v12971_v58 = vld [vmem:[#allocation2 + $0xe1] sm:$0xff] }
 0x3b4   : > { %9432 = vmatmul.mubr.msk.f32.gmra.mrb[22].mxu1 %vm14085_vm1, %v12955_v62 }
 0x3b5   : > { %9434 = vmatprep.mubr.f32.mxu1 %v12960_v23  ;;  %v12979_v23 = vld [vmem:[#allocation2 + $0xf1] sm:$0xff] }
 0x3b6   : > { %14170 = vst [vmem:[#allocation55_spill] sm:$0xff] %v12979_v23 }
 0x3b8   : > { %9435 = vmatmul.mubr.msk.f32.gmra.mrb[24].mxu1 %vm14088_vm11, %v12963_v29 }
 0x3b9   : > { %9437 = vmatprep.mubr.f32.mxu1 %v12968_v13  ;;  %v12987_v13 = vld [vmem:[#allocation2 + $0x101] sm:$0xff] }
 0x3bc   : > { %9438 = vmatmul.mubr.msk.f32.gmra.mrb[26].mxu1 %vm11812_vm0, %v12971_v58 }
 0x3bd   : > { %9440 = vmatprep.mubr.f32.mxu1 %v12976_v47  ;;  %v7491_v47 = vld [vmem:[%s13714_s2 + $0x218] sm:$0xff] }
 0x3be   : > { %v10346_v9 = vpack.c.bf16 %v7491_v47, %v7490_v16  ;;  %v7494_v16 = vld [vmem:[%s13714_s2 + $0x230] sm:$0xff]  ;;  %v7495_v47 = vld [vmem:[%s13714_s2 + $0x238] sm:$0xff] }
 0x3c0   : > { %9441 = vmatmul.mubr.msk.f32.gmra.mrb[28].mxu1 %vm11825_vm14, %v12979_v23  ;;  %v7493_v23 = vld [vmem:[%s13714_s2 + $0x228] sm:$0xff]  ;;  %vm14181_vm14 = vnez %v13951_v18  ;;  %v14191_v18 = vld [vmem:[#allocation8_spill] sm:$0xff] }
 0x3c1   : > { %9443 = vmatprep.mubr.f32.mxu1 %v12984_v19  ;;  %v7492_v19 = vld [vmem:[%s13714_s2 + $0x220] sm:$0xff] }
 0x3c2   : > { %v10350_v25 = vpack.c.bf16 %v7493_v23, %v7492_v19  ;;  %v7496_v23 = vld [vmem:[%s13714_s2 + $0x240] sm:$0xff]  ;;  %v7497_v19 = vld [vmem:[%s13714_s2 + $0x248] sm:$0xff] }
 0x3c4   : > { %9444 = vmatmul.mubr.msk.f32.gmra.mrb[30].mxu1 %vm11837_vm15, %v12987_v13  ;;  %vm14179_vm15 = vnez %v13947_v1  ;;  %v14274_v1 = vld [vmem:[#allocation41_spill] sm:$0xff] }
 0x3c5   : > { %9478 = vmatprep.mubr.msk.f32.mxu1 %vm11339_vm2, %v12665_v46  ;;  %vm14172_vm2 = vnez %v13932_v6  ;;  %v10354_v46 = vpack.c.bf16 %v7495_v47, %v7494_v16  ;;  %v7501_v47 = vld [vmem:[%s13714_s2 + $0x268] sm:$0xff] }
 0x3c8   : > { %9479 = vmatmul.mubr.f32.vlgmr.msra.gmra.mrb[0].mxu1 %v12671_v59  ;;  %v10358_v59 = vpack.c.bf16 %v7497_v19, %v7496_v23  ;;  %v7503_v19 = vld [vmem:[%s13714_s2 + $0x278] sm:$0xff] }
 0x3c9   : > { %9481 = vmatprep.mubr.msk.f32.mxu1 %vm11353_vm3, %v12680_v35  ;;  %10345 = vmatpush3.bf16.msra.mxu1 %v10342_v20  ;;  %vm14173_vm3 = vnez %v13934_v14  ;;  %v7499_v20 = vld [vmem:[%s13714_s2 + $0x258] sm:$0xff] }
 0x3ca   : > { %10347 = vmatprep.subr.bf16.mxu1 %v10346_v9 }
 0x3cc   : > { %9482 = vmatmul.mubr.f32.gmra.mrb[2].mxu1 %v12685_v55 }
 0x3cd   : > { %9484 = vmatprep.mubr.msk.f32.mxu1 %vm14172_vm2, %v12694_v28  ;;  %10349 = vmatpush3.bf16.msra.mxu1 %v10346_v9  ;;  %v7498_v9 = vld [vmem:[%s13714_s2 + $0x250] sm:$0xff]  ;;  %vm14174_vm2 = vnez %v13936_v22 }
 0x3ce   : > { %10351 = vmatprep.subr.bf16.mxu1 %v10350_v25  ;;  %v10362_v16 = vpack.c.bf16 %v7499_v20, %v7498_v9  ;;  %v7505_v20 = vld [vmem:[%s13714_s2 + $0x288] sm:$0xff] }
 0x3d0   : > { %9485 = vmatmul.mubr.f32.gmra.mrb[4].mxu1 %v12699_v31 }
 0x3d1   : > { %9487 = vmatprep.mubr.msk.f32.mxu1 %vm14173_vm3, %v12708_v48  ;;  %10353 = vmatpush3.bf16.msra.mxu1 %v10350_v25  ;;  %v7500_v25 = vld [vmem:[%s13714_s2 + $0x260] sm:$0xff]  ;;  %vm14175_vm3 = vnez %v13938_v30 }
 0x3d2   : > { %10355 = vmatprep.subr.bf16.mxu1 %v10354_v46  ;;  %v10366_v23 = vpack.c.bf16 %v7501_v47, %v7500_v25  ;;  %v14184_v47 = vld [vmem:[#allocation40_spill] sm:$0xff] }
 0x3d4   : > { %9488 = vmatmul.mubr.f32.gmra.mrb[6].mxu1 %v12713_v51 }
 0x3d5   : > { %9490 = vmatprep.mubr.msk.f32.mxu1 %vm14174_vm2, %v12722_v40  ;;  %10357 = vmatpush3.bf16.msra.mxu1 %v10354_v46  ;;  %v7502_v46 = vld [vmem:[%s13714_s2 + $0x270] sm:$0xff]  ;;  %vm14176_vm2 = vnez %v13940_v38 }
 0x3d6   : > { %10359 = vmatprep.subr.bf16.mxu1 %v10358_v59  ;;  %v10370_v9 = vpack.c.bf16 %v7503_v19, %v7502_v46  ;;  %v14186_v46 = vld [vmem:[#allocation41_spill] sm:$0xff]  ;;  %v14187_v19 = vld [vmem:[#allocation44_spill] sm:$0xff] }
 0x3d8   : > { %9491 = vmatmul.mubr.f32.gmra.mrb[8].mxu1 %v12727_v45 }
 0x3d9   : > { %9493 = vmatprep.mubr.msk.f32.mxu1 %vm14175_vm3, %v12736_v3  ;;  %10361 = vmatpush3.bf16.msra.mxu1 %v10358_v59  ;;  %v7504_v59 = vld [vmem:[%s13714_s2 + $0x280] sm:$0xff]  ;;  %vm14177_vm3 = vnez %v14139_v2 }
 0x3da   : > { %10363 = vmatprep.subr.bf16.mxu1 %v10362_v16  ;;  %v10374_v25 = vpack.c.bf16 %v7505_v20, %v7504_v59  ;;  %v14189_v59 = vld [vmem:[#allocation46_spill] sm:$0xff] }
 0x3db   : > { %v13100_v20 = vld [vmem:[#allocation2 + $0x107] sm:$0xff] }
 0x3dc   : > { %9494 = vmatmul.mubr.f32.gmra.mrb[10].mxu1 %v12741_v44  ;;  %14190 = vst [vmem:[#allocation57_spill] sm:$0xff] %v13100_v20 }
 0x3dd   : > { %9496 = vmatprep.mubr.msk.f32.mxu1 %vm14176_vm2, %v12750_v33  ;;  %10365 = vmatpush3.bf16.msra.mxu1 %v10362_v16  ;;  %vm14178_vm2 = vnez %v13945_v57  ;;  %v14183_v16 = vld [vmem:[#allocation38_spill] sm:$0xff] }
 0x3de   : > { %10367 = vmatprep.subr.bf16.mxu1 %v10366_v23 }
 0x3e0   : > { %9497 = vmatmul.mubr.f32.gmra.mrb[12].mxu1 %v12755_v24 }
 0x3e1   : > { %9499 = vmatprep.mubr.msk.f32.mxu1 %vm14177_vm3, %v12758_v41  ;;  %10369 = vmatpush3.bf16.msra.mxu1 %v10366_v23  ;;  %vm14180_vm3 = vnez %v13949_v10  ;;  %v7506_v23 = vld [vmem:[%s13714_s2 + $0x290] sm:$0xff]  ;;  %v14277_v10 = vld [vmem:[#allocation46_spill] sm:$0xff] }
 0x3e2   : > { %10371 = vmatprep.subr.bf16.mxu1 %v10370_v9 }
 0x3e4   : > { %9500 = vmatmul.mubr.f32.gmra.mrb[14].mxu1 %v12763_v8 }
 0x3e5   : > { %9502 = vmatprep.mubr.msk.f32.mxu1 %vm14178_vm2, %v12766_v43  ;;  %10373 = vmatpush3.bf16.msra.mxu1 %v10370_v9  ;;  %vm14182_vm2 = vnez %v13954_v26  ;;  %v13105_v26 = vld [vmem:[#allocation2 + $0x10f] sm:$0xff]  ;;  %v5270_v9 = vld [vmem:[#allocation2 + $0x18] sm:$0xff] }
 0x3e6   : > { %10375 = vmatprep.subr.bf16.mxu1 %v10374_v25  ;;  %14193 = vst [vmem:[#allocation58_spill] sm:$0xff] %v13105_v26 }
 0x3e8   : > { %9503 = vmatmul.mubr.f32.gmra.mrb[16].mxu1 %v12771_v49 }
 0x3e9   : > { %9505 = vmatprep.mubr.msk.f32.mxu1 %vm14179_vm15, %v12774_v5 }
 0x3ec   : > { %9506 = vmatmul.mubr.f32.gmra.mrb[18].mxu1 %v12779_v7 }
 0x3ed   : > { %9508 = vmatprep.mubr.msk.f32.mxu1 %vm14180_vm3, %v12782_v15 }
 0x3f0   : > { %9509 = vmatmul.mubr.f32.gmra.mrb[20].mxu1 %v12787_v37 }
 0x3f1   : > { %9511 = vmatprep.mubr.msk.f32.mxu1 %vm14181_vm14, %v12790_v4  ;;  %vm14192_vm14 = vnez %v14191_v18  ;;  %v7508_v18 = vld [vmem:[%s13714_s2 + $0x2a0] sm:$0xff] }
 0x3f4   : > { %9512 = vmatmul.mubr.f32.gmra.mrb[22].mxu1 %v12795_v27 }
 0x3f5   : > { %9514 = vmatprep.mubr.msk.f32.mxu1 %vm14182_vm2, %v12798_v56  ;;  %v14212_v56 = vld [vmem:[#allocation20_spill] sm:$0xff] }
 0x3f8   : > { %9515 = vmatmul.mubr.f32.gmra.mrb[24].mxu1 %v14183_v16  ;;  %v13123_v16 = vld [vmem:[#allocation2 + $0x30] sm:$0xff] }
 0x3f9   : > { %9517 = vmatprep.mubr.msk.f32.mxu1 %vm14147_vm5, %v14184_v47  ;;  %v13120_v47 = vld [vmem:[#allocation2 + $0x28] sm:$0xff]  ;;  %14195 = vst [vmem:[#allocation60_spill] sm:$0xff] %v13123_v16 }
 0x3fa   : > { %14194 = vst [vmem:[#allocation59_spill] sm:$0xff] %v13120_v47 }
 0x3fc   : > { %9518 = vmatmul.mubr.f32.gmra.mrb[26].mxu1 %v14186_v46  ;;  %v7507_v46 = vld [vmem:[%s13714_s2 + $0x298] sm:$0xff] }
 0x3fd   : > { %9520 = vmatprep.mubr.msk.f32.mxu1 %vm14150_vm4, %v14187_v19  ;;  %v5271_v19 = vld [vmem:[#allocation2 + $0x20] sm:$0xff] }
 0x400   : > { %9521 = vmatmul.mubr.f32.gmra.mrb[28].mxu1 %v14189_v59  ;;  %v10378_v59 = vpack.c.bf16 %v7507_v46, %v7506_v23  ;;  %v7510_v23 = vld [vmem:[%s13714_s2 + $0x2b0] sm:$0xff]  ;;  %v7511_v46 = vld [vmem:[%s13714_s2 + $0x2b8] sm:$0xff] }
 0x401   : > { %9523 = vmatprep.mubr.msk.f32.mxu1 %vm14192_vm14, %v13100_v20  ;;  %v7509_v20 = vld [vmem:[%s13714_s2 + $0x2a8] sm:$0xff] }
 0x404   : > { %9524 = vmatmul.mubr.f32.gmra.mrb[30].mxu1 %v13105_v26  ;;  %v10382_v26 = vpack.c.bf16 %v7509_v20, %v7508_v18  ;;  %v13135_v18 = vld [vmem:[#allocation2 + $0x40] sm:$0xff]  ;;  %v7513_v20 = vld [vmem:[%s13714_s2 + $0x2c8] sm:$0xff] }
 0x405   : > { %9558 = vmatprep.mubr.f32.mxu1 %v5270_v9  ;;  %14197 = vst [vmem:[#allocation62_spill] sm:$0xff] %v13135_v18  ;;  %v7512_v9 = vld [vmem:[%s13714_s2 + $0x2c0] sm:$0xff] }
 0x408   : > { %9559 = vmatmul.mubr.f32.vlgmr.msra.gmra.mrb[0].mxu1 %v5271_v19  ;;  %v13132_v19 = vld [vmem:[#allocation2 + $0x38] sm:$0xff] }
 0x409   : > { %9561 = vmatprep.mubr.f32.mxu1 %v13120_v47  ;;  %10377 = vmatpush3.bf16.msra.mxu1 %v10374_v25  ;;  %14196 = vst [vmem:[#allocation61_spill] sm:$0xff] %v13132_v19  ;;  %v10386_v25 = vpack.c.bf16 %v7511_v46, %v7510_v23  ;;  %v13147_v23 = vld [vmem:[#allocation2 + $0x50] sm:$0xff]  ;;  %v14210_v47 = vld [vmem:[#allocation17_spill] sm:$0xff] }
 0x40a   : > { %10379 = vmatprep.subr.bf16.mxu1 %v10378_v59  ;;  %14199 = vst [vmem:[#allocation64_spill] sm:$0xff] %v13147_v23  ;;  %v7514_v46 = vld [vmem:[%s13714_s2 + $0x2d0] sm:$0xff] }
 0x40c   : > { %9562 = vmatmul.mubr.f32.gmra.mrb[2].mxu1 %v13123_v16  ;;  %v13144_v16 = vld [vmem:[#allocation2 + $0x48] sm:$0xff] }
 0x40d   : > { %9564 = vmatprep.mubr.f32.mxu1 %v13132_v19  ;;  %10381 = vmatpush3.bf16.msra.mxu1 %v10378_v59  ;;  %14198 = vst [vmem:[#allocation63_spill] sm:$0xff] %v13144_v16  ;;  %v10390_v59 = vpack.c.bf16 %v7513_v20, %v7512_v9  ;;  %v7515_v19 = vld [vmem:[%s13714_s2 + $0x2d8] sm:$0xff]  ;;  %v13159_v9 = vld [vmem:[#allocation2 + $0x60] sm:$0xff] }
 0x40e   : > { %10383 = vmatprep.subr.bf16.mxu1 %v10382_v26  ;;  %14201 = vst [vmem:[#allocation66_spill] sm:$0xff] %v13159_v9  ;;  %v7516_v20 = vld [vmem:[%s13714_s2 + $0x2e0] sm:$0xff] }
 0x410   : > { %9565 = vmatmul.mubr.f32.gmra.mrb[4].mxu1 %v13135_v18  ;;  %v13156_v18 = vld [vmem:[#allocation2 + $0x58] sm:$0xff] }
 0x411   : > { %9567 = vmatprep.mubr.f32.mxu1 %v13144_v16  ;;  %10385 = vmatpush3.bf16.msra.mxu1 %v10382_v26  ;;  %14200 = vst [vmem:[#allocation65_spill] sm:$0xff] %v13156_v18  ;;  %v10394_v26 = vpack.c.bf16 %v7515_v19, %v7514_v46  ;;  %v7517_v16 = vld [vmem:[%s13714_s2 + $0x2e8] sm:$0xff]  ;;  %v13171_v19 = vld [vmem:[#allocation2 + $0x70] sm:$0xff] }
 0x412   : > { %10387 = vmatprep.subr.bf16.mxu1 %v10386_v25  ;;  %14203 = vst [vmem:[#allocation68_spill] sm:$0xff] %v13171_v19  ;;  %v7518_v46 = vld [vmem:[%s13714_s2 + $0x2f0] sm:$0xff] }
 0x414   : > { %9568 = vmatmul.mubr.f32.gmra.mrb[6].mxu1 %v13147_v23  ;;  %v13168_v23 = vld [vmem:[#allocation2 + $0x68] sm:$0xff] }
 0x415   : > { %9570 = vmatprep.mubr.f32.mxu1 %v13156_v18  ;;  %10389 = vmatpush3.bf16.msra.mxu1 %v10386_v25  ;;  %14202 = vst [vmem:[#allocation67_spill] sm:$0xff] %v13168_v23  ;;  %v10398_v25 = vpack.c.bf16 %v7517_v16, %v7516_v20  ;;  %v7519_v18 = vld [vmem:[%s13714_s2 + $0x2f8] sm:$0xff]  ;;  %v13183_v16 = vld [vmem:[#allocation2 + $0x80] sm:$0xff] }
 0x416   : > { %10391 = vmatprep.subr.bf16.mxu1 %v10390_v59  ;;  %14205 = vst [vmem:[#allocation70_spill] sm:$0xff] %v13183_v16  ;;  %v7536_v20 = vld [vmem:[%s13714_s2 + $0x300] sm:$0xff] }
 0x418   : > { %9571 = vmatmul.mubr.f32.gmra.mrb[8].mxu1 %v13159_v9  ;;  %v13180_v9 = vld [vmem:[#allocation2 + $0x78] sm:$0xff] }
 0x419   : > { %9573 = vmatprep.mubr.f32.mxu1 %v13168_v23  ;;  %10393 = vmatpush3.bf16.msra.mxu1 %v10390_v59  ;;  %14204 = vst [vmem:[#allocation69_spill] sm:$0xff] %v13180_v9  ;;  %v10402_v59 = vpack.c.bf16 %v7519_v18, %v7518_v46  ;;  %v7537_v23 = vld [vmem:[%s13714_s2 + $0x308] sm:$0xff]  ;;  %v13195_v18 = vld [vmem:[#allocation2 + $0x90] sm:$0xff] }
 0x41a   : > { %10395 = vmatprep.subr.bf16.mxu1 %v10394_v26  ;;  %14207 = vst [vmem:[#allocation72_spill] sm:$0xff] %v13195_v18  ;;  %v14208_v46 = vld [vmem:[#allocation14_spill] sm:$0xff] }
 0x41c   : > { %9574 = vmatmul.mubr.f32.gmra.mrb[10].mxu1 %v13171_v19  ;;  %v13192_v19 = vld [vmem:[#allocation2 + $0x88] sm:$0xff] }
 0x41d   : > { %9576 = vmatprep.mubr.f32.mxu1 %v13180_v9  ;;  %10397 = vmatpush3.bf16.msra.mxu1 %v10394_v26  ;;  %14206 = vst [vmem:[#allocation71_spill] sm:$0xff] %v13192_v19  ;;  %v10406_v26 = vpack.c.bf16 %v7537_v23, %v7536_v20  ;;  %v14209_v9 = vld [vmem:[#allocation12_spill] sm:$0xff]  ;;  %v14215_v23 = vld [vmem:[#allocation21_spill] sm:$0xff]  ;;  %v14216_v20 = vld [vmem:[#allocation26_spill] sm:$0xff] }
 0x41e   : > { %10399 = vmatprep.subr.bf16.mxu1 %v10398_v25 }
 0x420   : > { %9577 = vmatmul.mubr.f32.gmra.mrb[12].mxu1 %v13183_v16  ;;  %v14211_v16 = vld [vmem:[#allocation15_spill] sm:$0xff] }
 0x421   : > { %9579 = vmatprep.mubr.f32.mxu1 %v13192_v19  ;;  %10401 = vmatpush3.bf16.msra.mxu1 %v10398_v25  ;;  %v14213_v19 = vld [vmem:[#allocation18_spill] sm:$0xff]  ;;  %v14214_v25 = vld [vmem:[#allocation23_spill] sm:$0xff] }
 0x422   : > { %10403 = vmatprep.subr.bf16.mxu1 %v10402_v59 }
 0x424   : > { %9580 = vmatmul.mubr.f32.gmra.mrb[14].mxu1 %v13195_v18  ;;  %v14217_v18 = vld [vmem:[#allocation24_spill] sm:$0xff] }
 0x425   : > { %9582 = vmatprep.mubr.f32.mxu1 %v14208_v46  ;;  %10405 = vmatpush3.bf16.msra.mxu1 %v10402_v59  ;;  %v14218_v59 = vld [vmem:[#allocation29_spill] sm:$0xff]  ;;  %v14219_v46 = vld [vmem:[#allocation27_spill] sm:$0xff] }
 0x426   : > { %10407 = vmatprep.subr.bf16.mxu1 %v10406_v26 }
 0x428   : > { %9583 = vmatmul.mubr.f32.gmra.mrb[16].mxu1 %v14209_v9  ;;  %v14220_v9 = vld [vmem:[#allocation32_spill] sm:$0xff] }
 0x429   : > { %9585 = vmatprep.mubr.f32.mxu1 %v14210_v47  ;;  %v14221_v47 = vld [vmem:[#allocation31_spill] sm:$0xff] }
 0x42c   : > { %9586 = vmatmul.mubr.f32.gmra.mrb[18].mxu1 %v14211_v16  ;;  %v14222_v16 = vld [vmem:[#allocation35_spill] sm:$0xff] }
 0x42d   : > { %9588 = vmatprep.mubr.f32.mxu1 %v14212_v56  ;;  %v14223_v56 = vmax.f32 %v14222_v16, 0.0 }
 0x430   : > { %9589 = vmatmul.mubr.f32.gmra.mrb[20].mxu1 %v14213_v19  ;;  %v7538_v19 = vld [vmem:[%s13714_s2 + $0x310] sm:$0xff] }
 0x431   : > { %9591 = vmatprep.mubr.f32.mxu1 %v14214_v25  ;;  %v7539_v25 = vld [vmem:[%s13714_s2 + $0x318] sm:$0xff] }
 0x434   : > { %9592 = vmatmul.mubr.f32.gmra.mrb[22].mxu1 %v14215_v23 }
 0x435   : > { %9594 = vmatprep.mubr.f32.mxu1 %v14216_v20  ;;  %v10410_v20 = vpack.c.bf16 %v7539_v25, %v7538_v19  ;;  %v14229_v19 = vld [vmem:[#allocation10_spill] sm:$0xff]  ;;  %v14231_v25 = vld [vmem:[#allocation48_spill] sm:$0xff] }
 0x436   : > { %vm14230_vm4 = vnez %v14229_v19 }
 0x438   : > { %9595 = vmatmul.mubr.f32.gmra.mrb[24].mxu1 %v14217_v18  ;;  %v14224_v18 = vld [vmem:[#allocation34_spill] sm:$0xff] }
 0x439   : > { %9597 = vmatprep.mubr.f32.mxu1 %v14218_v59  ;;  %v14225_v23 = vmax.f32 %v14224_v18, 0.0  ;;  %v7540_v59 = vld [vmem:[%s13714_s2 + $0x320] sm:$0xff]  ;;  %v7545_v18 = vld [vmem:[%s13714_s2 + $0x348] sm:$0xff] }
 0x43c   : > { %9598 = vmatmul.mubr.f32.gmra.mrb[26].mxu1 %v14219_v46  ;;  %v7541_v46 = vld [vmem:[%s13714_s2 + $0x328] sm:$0xff] }
 0x43d   : > { %9600 = vmatprep.mubr.f32.mxu1 %v14220_v9  ;;  %v14226_v9 = vld [vmem:[#allocation9_spill] sm:$0xff]  ;;  %v10414_v16 = vpack.c.bf16 %v7541_v46, %v7540_v59  ;;  %v7547_v46 = vld [vmem:[%s13714_s2 + $0x358] sm:$0xff] }
 0x43e   : > { %vm14227_vm14 = vnez %v14226_v9  ;;  %v14234_v59 = vld [vmem:[#allocation49_spill] sm:$0xff] }
 0x440   : > { %9601 = vmatmul.mubr.f32.gmra.mrb[28].mxu1 %v14221_v47  ;;  %v14228_v47 = vld [vmem:[#allocation47_spill] sm:$0xff] }
 0x441   : > { %9603 = vmatprep.mubr.f32.mxu1 %v14223_v56  ;;  %v7543_v56 = vld [vmem:[%s13714_s2 + $0x338] sm:$0xff] }
 0x444   : > { %9604 = vmatmul.mubr.f32.gmra.mrb[30].mxu1 %v14225_v23  ;;  %v14232_v23 = vld [vmem:[#allocation13_spill] sm:$0xff] }
 0x445   : > { %9638 = vmatprep.mubr.f32.mxu1 %v12836_v17  ;;  %v7542_v17 = vld [vmem:[%s13714_s2 + $0x330] sm:$0xff] }
 0x448   : > { %9639 = vmatmul.mubr.msk.f32.vlgmr.msra.gmra.mrb[0].mxu1 %vm14227_vm14, %v12839_v34  ;;  %v10418_v34 = vpack.c.bf16 %v7543_v56, %v7542_v17  ;;  %vm14233_vm14 = vnez %v14232_v23  ;;  %v14237_v17 = vld [vmem:[#allocation50_spill] sm:$0xff] }
 0x449   : > { %9641 = vmatprep.mubr.f32.mxu1 %v14228_v47  ;;  %10409 = vmatpush3.bf16.msra.mxu1 %v10406_v26  ;;  %v7544_v26 = vld [vmem:[%s13714_s2 + $0x340] sm:$0xff]  ;;  %v14235_v47 = vld [vmem:[#allocation16_spill] sm:$0xff]  ;;  %v7549_v56 = vld [vmem:[%s13714_s2 + $0x368] sm:$0xff] }
 0x44a   : > { %10411 = vmatprep.subr.bf16.mxu1 %v10410_v20  ;;  %v6570_v23 = vld [vmem:[#allocation2 + $0x89] sm:$0xff] }
 0x44c   : > { %9642 = vmatmul.mubr.msk.f32.gmra.mrb[2].mxu1 %vm14230_vm4, %v12853_v11  ;;  %v10422_v11 = vpack.c.bf16 %v7545_v18, %v7544_v26  ;;  %vm14236_vm4 = vnez %v14235_v47  ;;  %v7551_v26 = vld [vmem:[%s13714_s2 + $0x378] sm:$0xff] }
 0x44d   : > { %9644 = vmatprep.mubr.f32.mxu1 %v14231_v25  ;;  %10413 = vmatpush3.bf16.msra.mxu1 %v10410_v20  ;;  %v7546_v20 = vld [vmem:[%s13714_s2 + $0x350] sm:$0xff]  ;;  %v6572_v47 = vld [vmem:[#allocation2 + $0x99] sm:$0xff] }
 0x44e   : > { %10415 = vmatprep.subr.bf16.mxu1 %v10414_v16  ;;  %v6574_v25 = vld [vmem:[#allocation2 + $0xa9] sm:$0xff]  ;;  %v6576_v18 = vld [vmem:[#allocation2 + $0xb9] sm:$0xff] }
 0x450   : > { %9645 = vmatmul.mubr.msk.f32.gmra.mrb[4].mxu1 %vm14233_vm14, %v12867_v21  ;;  %v10426_v21 = vpack.c.bf16 %v7547_v46, %v7546_v20  ;;  %v14243_v46 = vld [vmem:[#allocation3_spill] sm:$0xff] }
 0x451   : > { %9647 = vmatprep.mubr.f32.mxu1 %v14234_v59  ;;  %10417 = vmatpush3.bf16.msra.mxu1 %v10414_v16  ;;  %v7548_v16 = vld [vmem:[%s13714_s2 + $0x360] sm:$0xff]  ;;  %v7569_v59 = vld [vmem:[%s13714_s2 + $0x388] sm:$0xff] }
 0x452   : > { %10419 = vmatprep.subr.bf16.mxu1 %v10418_v34  ;;  %v6582_v20 = vld [vmem:[#allocation2 + $0xe9] sm:$0xff] }
 0x454   : > { %9648 = vmatmul.mubr.msk.f32.gmra.mrb[6].mxu1 %vm14236_vm4, %v12881_v12  ;;  %v10430_v12 = vpack.c.bf16 %v7549_v56, %v7548_v16  ;;  %v14249_v16 = vld [vmem:[#allocation53_spill] sm:$0xff]  ;;  %v14251_v56 = vld [vmem:[#allocation54_spill] sm:$0xff] }
 0x455   : > { %9650 = vmatprep.mubr.f32.mxu1 %v14237_v17  ;;  %10421 = vmatpush3.bf16.msra.mxu1 %v10418_v34  ;;  %v7550_v34 = vld [vmem:[%s13714_s2 + $0x370] sm:$0xff]  ;;  %v14246_v17 = vld [vmem:[#allocation33_spill] sm:$0xff] }
 0x456   : > { %10423 = vmatprep.subr.bf16.mxu1 %v10422_v11 }
 0x458   : > { %9651 = vmatmul.mubr.msk.f32.gmra.mrb[8].mxu1 %vm14162_vm6, %v12895_v52  ;;  %v7568_v52 = vld [vmem:[%s13714_s2 + $0x380] sm:$0xff] }
 0x459   : > { %9653 = vmatprep.mubr.f32.mxu1 %v12906_v0  ;;  %10425 = vmatpush3.bf16.msra.mxu1 %v10422_v11  ;;  %v10434_v0 = vpack.c.bf16 %v7551_v26, %v7550_v34  ;;  %v14254_v34 = vld [vmem:[#allocation56_spill] sm:$0xff]  ;;  %v13324_v26 = vld [vmem:[#allocation2 + $0x109] sm:$0xff] }
 0x45a   : > { %10427 = vmatprep.subr.bf16.mxu1 %v10426_v21  ;;  %v6578_v11 = vld [vmem:[#allocation2 + $0xc9] sm:$0xff] }
 0x45c   : > { %9654 = vmatmul.mubr.msk.f32.gmra.mrb[10].mxu1 %vm14113_vm12, %v12909_v53  ;;  %v14241_v53 = vld [vmem:[#allocation11_spill] sm:$0xff] }
 0x45d   : > { %9656 = vmatprep.mubr.f32.mxu1 %v12920_v32  ;;  %10429 = vmatpush3.bf16.msra.mxu1 %v10426_v21  ;;  %v10438_v32 = vpack.c.bf16 %v7569_v59, %v7568_v52  ;;  %v14257_v52 = vld [vmem:[#allocation45_spill] sm:$0xff] }
 0x45e   : > { %10431 = vmatprep.subr.bf16.mxu1 %v10430_v12  ;;  %v7572_v59 = vld [vmem:[%s13714_s2 + $0x3a0] sm:$0xff] }
 0x45f   : > { %v6589_v21 = vld [vmem:[#allocation2 + $0x121] sm:$0xff] }
 0x460   : > { %9657 = vmatmul.mubr.msk.f32.gmra.mrb[12].mxu1 %vm14115_vm7, %v12923_v60  ;;  %v6584_v60 = vld [vmem:[#allocation2 + $0xf9] sm:$0xff] }
 0x461   : > { %9659 = vmatprep.mubr.f32.mxu1 %v12928_v42  ;;  %10433 = vmatpush3.bf16.msra.mxu1 %v10430_v12  ;;  %v14245_v42 = vld [vmem:[#allocation51_spill] sm:$0xff]  ;;  %v14253_v12 = vld [vmem:[#allocation42_spill] sm:$0xff] }
 0x462   : > { %10435 = vmatprep.subr.bf16.mxu1 %v10434_v0 }
 0x464   : > { %9660 = vmatmul.mubr.msk.f32.gmra.mrb[14].mxu1 %vm14116_vm8, %v12931_v50  ;;  %v14247_v50 = vld [vmem:[#allocation52_spill] sm:$0xff] }
 0x465   : > { %9662 = vmatprep.mubr.f32.mxu1 %v14241_v53  ;;  %10437 = vmatpush3.bf16.msra.mxu1 %v10434_v0  ;;  %v7571_v0 = vld [vmem:[%s13714_s2 + $0x398] sm:$0xff]  ;;  %v7573_v53 = vld [vmem:[%s13714_s2 + $0x3a8] sm:$0xff] }
 0x466   : > { %10439 = vmatprep.subr.bf16.mxu1 %v10438_v32 }
 0x468   : > { %9663 = vmatmul.mubr.msk.f32.gmra.mrb[16].mxu1 %vm14117_vm9, %v12939_v39  ;;  %v14250_v39 = vld [vmem:[#allocation39_spill] sm:$0xff] }
 0x469   : > { %9665 = vmatprep.mubr.f32.mxu1 %v14243_v46  ;;  %v10446_v46 = vpack.c.bf16 %v7573_v53, %v7572_v59  ;;  %v7591_v59 = vld [vmem:[%s13714_s2 + $0x438] sm:$0xff]  ;;  %v14287_v53 = vld [vmem:[#allocation62_spill] sm:$0xff] }
 0x46c   : > { %9666 = vmatmul.mubr.msk.f32.gmra.mrb[18].mxu1 %vm14077_vm13, %v12947_v63  ;;  %v14252_v63 = vld [vmem:[#allocation55_spill] sm:$0xff] }
 0x46d   : > { %9668 = vmatprep.mubr.f32.mxu1 %v14245_v42  ;;  %v7587_v42 = vld [vmem:[%s13714_s2 + $0x418] sm:$0xff] }
 0x470   : > { %9669 = vmatmul.mubr.msk.f32.gmra.mrb[20].mxu1 %vm14081_vm10, %v12955_v62  ;;  %v14255_v62 = vld [vmem:[#allocation43_spill] sm:$0xff] }
 0x471   : > { %9671 = vmatprep.mubr.f32.mxu1 %v14247_v50  ;;  %vm14256_vm10 = vnez %v14255_v62  ;;  %v14284_v50 = vld [vmem:[#allocation59_spill] sm:$0xff] }
 0x474   : > { %9672 = vmatmul.mubr.msk.f32.gmra.mrb[22].mxu1 %vm14085_vm1, %v12963_v29  ;;  %v13327_v29 = vld [vmem:[#allocation2 + $0x111] sm:$0xff] }
 0x475   : > { %9674 = vmatprep.mubr.f32.mxu1 %v14249_v16 }
 0x478   : > { %9675 = vmatmul.mubr.msk.f32.gmra.mrb[24].mxu1 %vm14088_vm11, %v12971_v58  ;;  %v7570_v58 = vld [vmem:[%s13714_s2 + $0x390] sm:$0xff]  ;;  %vm14260_vm11 = vnez %v13930_v61 }
 0x479   : > { %9677 = vmatprep.mubr.f32.mxu1 %v14251_v56  ;;  %v7588_v56 = vld [vmem:[%s13714_s2 + $0x420] sm:$0xff] }
 0x47c   : > { %9678 = vmatmul.mubr.msk.f32.gmra.mrb[26].mxu1 %vm11812_vm0, %v14252_v63  ;;  %vm14258_vm0 = vnez %v14257_v52  ;;  %v7589_v63 = vld [vmem:[%s13714_s2 + $0x428] sm:$0xff] }
 0x47d   : > { %9680 = vmatprep.mubr.f32.mxu1 %v14254_v34  ;;  %v14285_v34 = vld [vmem:[#allocation60_spill] sm:$0xff] }
 0x480   : > { %9681 = vmatmul.mubr.msk.f32.gmra.mrb[28].mxu1 %vm14256_vm10, %v12987_v13  ;;  %vm14259_vm10 = vnez %v13928_v54  ;;  %v10442_v13 = vpack.c.bf16 %v7571_v0, %v7570_v58  ;;  %v7574_v54 = vld [vmem:[%s13714_s2 + $0x3b0] sm:$0xff]  ;;  %v14286_v58 = vld [vmem:[#allocation61_spill] sm:$0xff]  ;;  %v10478_v0 = vpack.c.bf16 %v7589_v63, %v7588_v56  ;;  %v11024_v63 = vld [vmem:[#allocation2 + $0x8] sm:$0xff] }
 0x481   : > { %9683 = vmatprep.mubr.f32.mxu1 %v13324_v26  ;;  %v6281_v56 = vld [vmem:[#allocation2 + $0x110] sm:$0xff] }
 0x484   : > { %9684 = vmatmul.mubr.msk.f32.gmra.mrb[30].mxu1 %vm14258_vm0, %v13327_v29 }
 0x485   : > { %9718 = vmatprep.mubr.msk.f32.mxu1 %vm14259_vm10, %v12680_v35  ;;  %v7575_v35 = vld [vmem:[%s13714_s2 + $0x3b8] sm:$0xff]  ;;  %vm14261_vm10 = vnez %v13932_v6 }
 0x486   : > { %v10450_v61 = vpack.c.bf16 %v7575_v35, %v7574_v54  ;;  %v7592_v35 = vld [vmem:[%s13714_s2 + $0x440] sm:$0xff] }
 0x488   : > { %9719 = vmatmul.mubr.f32.vlgmr.msra.gmra.mrb[0].mxu1 %v12685_v55  ;;  %v7576_v55 = vld [vmem:[%s13714_s2 + $0x3c0] sm:$0xff] }
 0x489   : > { %9721 = vmatprep.mubr.msk.f32.mxu1 %vm14260_vm11, %v12694_v28  ;;  %10441 = vmatpush3.bf16.msra.mxu1 %v10438_v32  ;;  %v7577_v28 = vld [vmem:[%s13714_s2 + $0x3c8] sm:$0xff]  ;;  %vm14262_vm11 = vnez %v13934_v14  ;;  %v7586_v32 = vld [vmem:[%s13714_s2 + $0x410] sm:$0xff] }
 0x48a   : > { %10443 = vmatprep.subr.bf16.mxu1 %v10442_v13  ;;  %v10454_v6 = vpack.c.bf16 %v7577_v28, %v7576_v55  ;;  %v10474_v16 = vpack.c.bf16 %v7587_v42, %v7586_v32  ;;  %v14289_v55 = vld [vmem:[#allocation64_spill] sm:$0xff]  ;;  %v14290_v28 = vld [vmem:[#allocation65_spill] sm:$0xff]  ;;  %v6277_v32 = vld [vmem:[#allocation2 + $0xf0] sm:$0xff] }
 0x48b   : > { %v6278_v42 = vld [vmem:[#allocation2 + $0xf8] sm:$0xff] }
 0x48c   : > { %9722 = vmatmul.mubr.f32.gmra.mrb[2].mxu1 %v12699_v31  ;;  %v7578_v31 = vld [vmem:[%s13714_s2 + $0x3d0] sm:$0xff] }
 0x48d   : > { %9724 = vmatprep.mubr.msk.f32.mxu1 %vm14261_vm10, %v12708_v48  ;;  %10445 = vmatpush3.bf16.msra.mxu1 %v10442_v13  ;;  %v7579_v48 = vld [vmem:[%s13714_s2 + $0x3d8] sm:$0xff]  ;;  %vm14263_vm10 = vnez %v13936_v22  ;;  %v7590_v13 = vld [vmem:[%s13714_s2 + $0x430] sm:$0xff] }
 0x48e   : > { %10447 = vmatprep.subr.bf16.mxu1 %v10446_v46  ;;  %v10458_v14 = vpack.c.bf16 %v7579_v48, %v7578_v31  ;;  %v10482_v54 = vpack.c.bf16 %v7591_v59, %v7590_v13  ;;  %v7594_v31 = vld [vmem:[%s13714_s2 + $0x450] sm:$0xff]  ;;  %v7595_v48 = vld [vmem:[%s13714_s2 + $0x458] sm:$0xff]  ;;  %v6561_v13 = vld [vmem:[#allocation2 + $0x41] sm:$0xff] }
 0x48f   : > { %v6562_v59 = vld [vmem:[#allocation2 + $0x49] sm:$0xff] }
 0x490   : > { %9725 = vmatmul.mubr.f32.gmra.mrb[4].mxu1 %v12713_v51  ;;  %v7581_v51 = vld [vmem:[%s13714_s2 + $0x3e8] sm:$0xff] }
 0x491   : > { %9727 = vmatprep.mubr.msk.f32.mxu1 %vm14262_vm11, %v12722_v40  ;;  %10449 = vmatpush3.bf16.msra.mxu1 %v10446_v46  ;;  %v7580_v40 = vld [vmem:[%s13714_s2 + $0x3e0] sm:$0xff]  ;;  %vm14264_vm11 = vnez %v13938_v30  ;;  %v14288_v46 = vld [vmem:[#allocation63_spill] sm:$0xff] }
 0x492   : > { %10451 = vmatprep.subr.bf16.mxu1 %v10450_v61  ;;  %v10462_v22 = vpack.c.bf16 %v7581_v51, %v7580_v40  ;;  %v14292_v40 = vld [vmem:[#allocation67_spill] sm:$0xff]  ;;  %v10490_v51 = vpack.c.bf16 %v7595_v48, %v7594_v31  ;;  %v6577_v31 = vld [vmem:[#allocation2 + $0xc1] sm:$0xff] }
 0x493   : > { %v6579_v48 = vld [vmem:[#allocation2 + $0xd1] sm:$0xff] }
 0x494   : > { %9728 = vmatmul.mubr.f32.gmra.mrb[6].mxu1 %v12727_v45  ;;  %v7583_v45 = vld [vmem:[%s13714_s2 + $0x3f8] sm:$0xff] }
 0x495   : > { %9730 = vmatprep.mubr.msk.f32.mxu1 %vm14263_vm10, %v12736_v3  ;;  %10453 = vmatpush3.bf16.msra.mxu1 %v10450_v61  ;;  %v7582_v3 = vld [vmem:[%s13714_s2 + $0x3f0] sm:$0xff]  ;;  %vm14265_vm10 = vnez %v13940_v38  ;;  %v7593_v61 = vld [vmem:[%s13714_s2 + $0x448] sm:$0xff] }
 0x496   : > { %10455 = vmatprep.subr.bf16.mxu1 %v10454_v6  ;;  %v10466_v30 = vpack.c.bf16 %v7583_v45, %v7582_v3  ;;  %v7597_v3 = vld [vmem:[%s13714_s2 + $0x468] sm:$0xff]  ;;  %v14293_v45 = vld [vmem:[#allocation68_spill] sm:$0xff] }
 0x498   : > { %9731 = vmatmul.mubr.f32.gmra.mrb[8].mxu1 %v12741_v44  ;;  %v7585_v44 = vld [vmem:[%s13714_s2 + $0x408] sm:$0xff] }
 0x499   : > { %9733 = vmatprep.mubr.msk.f32.mxu1 %vm14264_vm11, %v12750_v33  ;;  %10457 = vmatpush3.bf16.msra.mxu1 %v10454_v6  ;;  %v7584_v33 = vld [vmem:[%s13714_s2 + $0x400] sm:$0xff]  ;;  %vm14266_vm11 = vnez %v14139_v2  ;;  %v14272_v2 = vld [vmem:[#allocation40_spill] sm:$0xff]  ;;  %v10486_v6 = vpack.c.bf16 %v7593_v61, %v7592_v35 }
 0x49a   : > { %10459 = vmatprep.subr.bf16.mxu1 %v10458_v14  ;;  %v10470_v38 = vpack.c.bf16 %v7585_v44, %v7584_v33  ;;  %v7598_v44 = vld [vmem:[%s13714_s2 + $0x470] sm:$0xff]  ;;  %v6569_v61 = vld [vmem:[#allocation2 + $0x81] sm:$0xff] }
 0x49b   : > { %v6567_v35 = vld [vmem:[#allocation2 + $0x71] sm:$0xff] }
 0x49c   : > { %9734 = vmatmul.mubr.f32.gmra.mrb[10].mxu1 %v12755_v24  ;;  %v6266_v24 = vld [vmem:[#allocation2 + $0x98] sm:$0xff] }
 0x49d   : > { %9736 = vmatprep.mubr.msk.f32.mxu1 %vm14265_vm10, %v12758_v41  ;;  %10461 = vmatpush3.bf16.msra.mxu1 %v10458_v14  ;;  %vm14267_vm10 = vnez %v13945_v57  ;;  %v14271_v57 = vld [vmem:[#allocation38_spill] sm:$0xff]  ;;  %v14275_v41 = vld [vmem:[#allocation44_spill] sm:$0xff] }
 0x49e   : > { %10463 = vmatprep.subr.bf16.mxu1 %v10462_v22  ;;  %v14291_v14 = vld [vmem:[#allocation66_spill] sm:$0xff] }
 0x4a0   : > { %9737 = vmatmul.mubr.f32.gmra.mrb[12].mxu1 %v12763_v8  ;;  %v14268_v8 = vld [vmem:[#allocation37_spill] sm:$0xff] }
 0x4a1   : > { %9739 = vmatprep.mubr.msk.f32.mxu1 %vm14266_vm11, %v12766_v43  ;;  %10465 = vmatpush3.bf16.msra.mxu1 %v10462_v22  ;;  %v14269_v43 = vld [vmem:[#allocation4_spill] sm:$0xff]  ;;  %v7596_v22 = vld [vmem:[%s13714_s2 + $0x460] sm:$0xff] }
 0x4a2   : > { %10467 = vmatprep.subr.bf16.mxu1 %v10466_v30  ;;  %vm14270_vm11 = vnez %v14269_v43  ;;  %v10494_v33 = vpack.c.bf16 %v7597_v3, %v7596_v22  ;;  %v14296_v43 = vld [vmem:[#allocation71_spill] sm:$0xff]  ;;  %v6975_v22 = vld [vmem:[%s11128_s23 + $0x8] sm:$0xff] }
 0x4a4   : > { %9740 = vmatmul.mubr.f32.gmra.mrb[14].mxu1 %v12771_v49  ;;  %v14281_v49 = vld [vmem:[#allocation58_spill] sm:$0xff] }
 0x4a5   : > { %9742 = vmatprep.mubr.msk.f32.mxu1 %vm14267_vm10, %v12774_v5  ;;  %10469 = vmatpush3.bf16.msra.mxu1 %v10466_v30  ;;  %v5944_v5 = vld [vmem:[#allocation2 + $0x117] sm:$0xff]  ;;  %v14294_v30 = vld [vmem:[#allocation69_spill] sm:$0xff] }
 0x4a6   : > { %10471 = vmatprep.subr.bf16.mxu1 %v10470_v38 }
 0x4a8   : > { %9743 = vmatmul.mubr.f32.gmra.mrb[16].mxu1 %v12779_v7  ;;  %v14282_v7 = vld [vmem:[#allocation8_spill] sm:$0xff] }
 0x4a9   : > { %9745 = vmatprep.mubr.msk.f32.mxu1 %vm14179_vm15, %v12782_v15  ;;  %vm14283_vm15 = vnez %v14282_v7  ;;  %v5945_v15 = vld [vmem:[#allocation2 + $0x11f] sm:$0xff] }
 0x4aa   : > { %v6275_v7 = vld [vmem:[#allocation2 + $0xe0] sm:$0xff] }
 0x4ac   : > { %9746 = vmatmul.mubr.f32.gmra.mrb[18].mxu1 %v12787_v37  ;;  %v6269_v37 = vld [vmem:[#allocation2 + $0xb0] sm:$0xff] }
 0x4ad   : > { %9748 = vmatprep.mubr.msk.f32.mxu1 %vm14180_vm3, %v12790_v4  ;;  %v14278_v4 = vld [vmem:[#allocation57_spill] sm:$0xff] }
 0x4b0   : > { %9749 = vmatmul.mubr.f32.gmra.mrb[20].mxu1 %v12795_v27  ;;  %v14279_v27 = vld [vmem:[#allocation7_spill] sm:$0xff] }
 0x4b1   : > { %9751 = vmatprep.mubr.msk.f32.mxu1 %vm14270_vm11, %v14268_v8  ;;  %vm14280_vm3 = vnez %v14279_v27  ;;  %v14295_v8 = vld [vmem:[#allocation70_spill] sm:$0xff] }
 0x4b2   : > { %v6272_v27 = vld [vmem:[#allocation2 + $0xc8] sm:$0xff] }
 0x4b4   : > { %9752 = vmatmul.mubr.f32.gmra.mrb[22].mxu1 %v14271_v57 }
 0x4b5   : > { %9754 = vmatprep.mubr.msk.f32.mxu1 %vm14182_vm2, %v14272_v2  ;;  %v14297_v2 = vld [vmem:[#allocation72_spill] sm:$0xff]  ;;  %vm14298_vm2 = vnez %v14226_v9  ;;  %v6566_v9 = vld [vmem:[#allocation2 + $0x69] sm:$0xff] }
 0x4b8   : > { %9755 = vmatmul.mubr.f32.gmra.mrb[24].mxu1 %v14274_v1  ;;  %v6267_v1 = vld [vmem:[#allocation2 + $0xa0] sm:$0xff] }
 0x4b9   : > { %9757 = vmatprep.mubr.msk.f32.mxu1 %vm14147_vm5, %v14275_v41  ;;  %v6268_v41 = vld [vmem:[#allocation2 + $0xa8] sm:$0xff]  ;;  %vm14299_vm5 = vnez %v14229_v19  ;;  %v6568_v19 = vld [vmem:[#allocation2 + $0x79] sm:$0xff] }
 0x4bc   : > { %9758 = vmatmul.mubr.f32.gmra.mrb[26].mxu1 %v14277_v10  ;;  %v6270_v10 = vld [vmem:[#allocation2 + $0xb8] sm:$0xff] }
 0x4bd   : > { %9760 = vmatprep.mubr.msk.f32.mxu1 %vm14280_vm3, %v14278_v4  ;;  %v6271_v4 = vld [vmem:[#allocation2 + $0xc0] sm:$0xff] }
 0x4c0   : > { %9761 = vmatmul.mubr.f32.gmra.mrb[28].mxu1 %v14281_v49  ;;  %v6273_v49 = vld [vmem:[#allocation2 + $0xd0] sm:$0xff] }
 0x4c1   : > { %9763 = vmatprep.mubr.msk.f32.mxu1 %vm14283_vm15, %v5944_v5  ;;  %v6274_v5 = vld [vmem:[#allocation2 + $0xd8] sm:$0xff] }
 0x4c4   : > { %9764 = vmatmul.mubr.f32.gmra.mrb[30].mxu1 %v5945_v15  ;;  %v6276_v15 = vld [vmem:[#allocation2 + $0xe8] sm:$0xff] }
 0x4c5   : > { %9798 = vmatprep.mubr.f32.mxu1 %v14284_v50  ;;  %v6279_v50 = vld [vmem:[#allocation2 + $0x100] sm:$0xff] }
 0x4c8   : > { %9799 = vmatmul.mubr.f32.vlgmr.msra.gmra.mrb[0].mxu1 %v14285_v34  ;;  %v6558_v34 = vld [vmem:[#allocation2 + $0x29] sm:$0xff] }
 0x4c9   : > { %9801 = vmatprep.mubr.f32.mxu1 %v14286_v58  ;;  %10473 = vmatpush3.bf16.msra.mxu1 %v10470_v38  ;;  %v7599_v38 = vld [vmem:[%s13714_s2 + $0x478] sm:$0xff] }
 0x4ca   : > { %10475 = vmatprep.subr.bf16.mxu1 %v10474_v16  ;;  %v10498_v57 = vpack.c.bf16 %v7599_v38, %v7598_v44  ;;  %v6559_v58 = vld [vmem:[#allocation2 + $0x31] sm:$0xff] }
 0x4cc   : > { %9802 = vmatmul.mubr.f32.gmra.mrb[2].mxu1 %v14287_v53  ;;  %v6563_v53 = vld [vmem:[#allocation2 + $0x51] sm:$0xff] }
 0x4cd   : > { %9804 = vmatprep.mubr.f32.mxu1 %v14288_v46  ;;  %10477 = vmatpush3.bf16.msra.mxu1 %v10474_v16  ;;  %v6280_v16 = vld [vmem:[#allocation2 + $0x108] sm:$0xff]  ;;  %v6564_v46 = vld [vmem:[#allocation2 + $0x59] sm:$0xff] }
 0x4ce   : > { %10479 = vmatprep.subr.bf16.mxu1 %v10478_v0 }
 0x4d0   : > { %9805 = vmatmul.mubr.f32.gmra.mrb[4].mxu1 %v14289_v55  ;;  %v6571_v55 = vld [vmem:[#allocation2 + $0x91] sm:$0xff] }
 0x4d1   : > { %9807 = vmatprep.mubr.f32.mxu1 %v14290_v28  ;;  %10481 = vmatpush3.bf16.msra.mxu1 %v10478_v0  ;;  %v6560_v0 = vld [vmem:[#allocation2 + $0x39] sm:$0xff]  ;;  %v6573_v28 = vld [vmem:[#allocation2 + $0xa1] sm:$0xff] }
 0x4d2   : > { %10483 = vmatprep.subr.bf16.mxu1 %v10482_v54 }
 0x4d4   : > { %9808 = vmatmul.mubr.f32.gmra.mrb[6].mxu1 %v14291_v14  ;;  %v6581_v14 = vld [vmem:[#allocation2 + $0xe1] sm:$0xff] }
 0x4d5   : > { %9810 = vmatprep.mubr.f32.mxu1 %v14292_v40  ;;  %10485 = vmatpush3.bf16.msra.mxu1 %v10482_v54  ;;  %v6565_v54 = vld [vmem:[#allocation2 + $0x61] sm:$0xff]  ;;  %v6583_v40 = vld [vmem:[#allocation2 + $0xf1] sm:$0xff] }
 0x4d6   : > { %10487 = vmatprep.subr.bf16.mxu1 %v10486_v6 }
 0x4d8   : > { %9811 = vmatmul.mubr.f32.gmra.mrb[8].mxu1 %v14293_v45  ;;  %v6974_v45 = vld [vmem:[%s11128_s23] sm:$0xff] }
 0x4d9   : > { %9813 = vmatprep.mubr.f32.mxu1 %v14294_v30  ;;  %10489 = vmatpush3.bf16.msra.mxu1 %v10486_v6  ;;  %v6575_v6 = vld [vmem:[#allocation2 + $0xb1] sm:$0xff] }
 0x4da   : > { %10491 = vmatprep.subr.bf16.mxu1 %v10490_v51 }
 0x4dc   : > { %9814 = vmatmul.mubr.f32.gmra.mrb[10].mxu1 %v14295_v8 }
 0x4dd   : > { %9816 = vmatprep.mubr.f32.mxu1 %v14296_v43  ;;  %10493 = vmatpush3.bf16.msra.mxu1 %v10490_v51  ;;  %v6585_v51 = vld [vmem:[#allocation2 + $0x101] sm:$0xff] }
 0x4de   : > { %10495 = vmatprep.subr.bf16.mxu1 %v10494_v33 }
 0x4e0   : > { %9817 = vmatmul.mubr.f32.gmra.mrb[12].mxu1 %v14297_v2 }
 0x4e1   : > { %9819 = vmatprep.mubr.f32.mxu1 %v6266_v24  ;;  %10497 = vmatpush3.bf16.msra.mxu1 %v10494_v33 }
 0x4e2   : > { %10499 = vmatprep.subr.bf16.mxu1 %v10498_v57 }
 0x4e4   : > { %9820 = vmatmul.mubr.f32.gmra.mrb[14].mxu1 %v6267_v1 }
 0x4e5   : > { %9822 = vmatprep.mubr.f32.mxu1 %v6268_v41  ;;  %10501 = vmatpush3.bf16.msra.mxu1 %v10498_v57  ;;  %v6977_v57 = vld [vmem:[%s11128_s23 + $0x18] sm:$0xff]  ;;  %v6976_v41 = vld [vmem:[%s11128_s23 + $0x10] sm:$0xff] }
 0x4e8   : > { %9823 = vmatmul.mubr.f32.gmra.mrb[16].mxu1 %v6269_v37 }
 0x4e9   : > { %9825 = vmatprep.mubr.f32.mxu1 %v6270_v10 }
 0x4ec   : > { %9826 = vmatmul.mubr.f32.gmra.mrb[18].mxu1 %v6271_v4 }
 0x4ed   : > { %9828 = vmatprep.mubr.f32.mxu1 %v6272_v27 }
 0x4f0   : > { %9829 = vmatmul.mubr.f32.gmra.mrb[20].mxu1 %v6273_v49 }
 0x4f1   : > { %9831 = vmatprep.mubr.f32.mxu1 %v6274_v5 }
 0x4f4   : > { %9832 = vmatmul.mubr.f32.gmra.mrb[22].mxu1 %v6275_v7 }
 0x4f5   : > { %9834 = vmatprep.mubr.f32.mxu1 %v6276_v15  ;;  %v6979_v15 = vld [vmem:[%s11128_s23 + $0x28] sm:$0xff] }
 0x4f8   : > { %9835 = vmatmul.mubr.f32.gmra.mrb[24].mxu1 %v6277_v32 }
 0x4f9   : > { %9837 = vmatprep.mubr.f32.mxu1 %v6278_v42 }
 0x4fc   : > { %9838 = vmatmul.mubr.f32.gmra.mrb[26].mxu1 %v6279_v50 }
 0x4fd   : > { %9840 = vmatprep.mubr.f32.mxu1 %v6280_v16  ;;  %v6978_v16 = vld [vmem:[%s11128_s23 + $0x20] sm:$0xff] }
 0x500   : > { %9841 = vmatmul.mubr.f32.gmra.mrb[28].mxu1 %v6281_v56 }
 0x501   : > { %9843 = vmatprep.mubr.f32.mxu1 %v11024_v63 }
 0x504   : > { %9844 = vmatmul.mubr.f32.gmra.mrb[30].mxu1 %v11024_v63 }
 0x505   : > { %9878 = vmatprep.mubr.f32.mxu1 %v6558_v34 }
 0x508   : > { %9879 = vmatmul.mubr.msk.f32.vlgmr.msra.gmra.mrb[0].mxu1 %vm14298_vm2, %v6559_v58 }
 0x509   : > { %9881 = vmatprep.mubr.f32.mxu1 %v6560_v0 }
 0x50c   : > { %9882 = vmatmul.mubr.msk.f32.gmra.mrb[2].mxu1 %vm14299_vm5, %v6561_v13 }
 0x50d   : > { %9884 = vmatprep.mubr.f32.mxu1 %v6562_v59 }
 0x510   : > { %9885 = vmatmul.mubr.msk.f32.gmra.mrb[4].mxu1 %vm14233_vm14, %v6563_v53  ;;  %v6981_v53 = vld [vmem:[%s11128_s23 + $0x38] sm:$0xff] }
 0x511   : > { %9887 = vmatprep.mubr.f32.mxu1 %v6564_v46 }
 0x514   : > { %9888 = vmatmul.mubr.msk.f32.gmra.mrb[6].mxu1 %vm14236_vm4, %v6565_v54  ;;  %vm14300_vm4 = vnez %v14246_v17  ;;  %v6588_v17 = vld [vmem:[#allocation2 + $0x119] sm:$0xff] }
 0x515   : > { %9890 = vmatprep.mubr.f32.mxu1 %v6566_v9 }
 0x518   : > { %9891 = vmatmul.mubr.msk.f32.gmra.mrb[8].mxu1 %vm14162_vm6, %v6567_v35  ;;  %vm14301_vm6 = vnez %v14250_v39  ;;  %v13535_v39 = vld [vmem:[%s13717_s5] ss:$0 sm:$0xff]  ;;  %v6980_v35 = vld [vmem:[%s11128_s23 + $0x30] sm:$0xff] }
 0x519   : > { %9893 = vmatprep.mubr.f32.mxu1 %v6568_v19 }
 0x51c   : > { %9894 = vmatmul.mubr.msk.f32.gmra.mrb[10].mxu1 %vm14113_vm12, %v6569_v61 }
 0x51d   : > { %9896 = vmatprep.mubr.f32.mxu1 %v6570_v23 }
 0x520   : > { %9897 = vmatmul.mubr.msk.f32.gmra.mrb[12].mxu1 %vm14115_vm7, %v6571_v55  ;;  %vm14302_vm7 = vnez %v14253_v12 }
 0x521   : > { %9899 = vmatprep.mubr.f32.mxu1 %v6572_v47 }
 0x524   : > { %9900 = vmatmul.mubr.msk.f32.gmra.mrb[14].mxu1 %vm14116_vm8, %v6573_v28 }
 0x525   : > { %9902 = vmatprep.mubr.f32.mxu1 %v6574_v25 }
 0x528   : > { %9903 = vmatmul.mubr.msk.f32.gmra.mrb[16].mxu1 %vm14117_vm9, %v6575_v6  ;;  %v6983_v6 = vld [vmem:[%s11128_s23 + $0x48] sm:$0xff] }
 0x529   : > { %9905 = vmatprep.mubr.f32.mxu1 %v6576_v18 }
 0x52c   : > { %9906 = vmatmul.mubr.msk.f32.gmra.mrb[18].mxu1 %vm14077_vm13, %v6577_v31 }
 0x52d   : > { %9908 = vmatprep.mubr.f32.mxu1 %v6578_v11 }
 0x530   : > { %9909 = vmatmul.mubr.msk.f32.gmra.mrb[20].mxu1 %vm14300_vm4, %v6579_v48  ;;  %v6982_v48 = vld [vmem:[%s11128_s23 + $0x40] sm:$0xff] }
 0x531   : > { %9911 = vmatprep.mubr.f32.mxu1 %v6580_v36 }
 0x534   : > { %9912 = vmatmul.mubr.msk.f32.gmra.mrb[22].mxu1 %vm14085_vm1, %v6581_v14  ;;  %vm14303_vm1 = vnez %v14255_v62 }
 0x535   : > { %9914 = vmatprep.mubr.f32.mxu1 %v6582_v20 }
 0x538   : > { %9915 = vmatmul.mubr.msk.f32.gmra.mrb[24].mxu1 %vm14301_vm6, %v6583_v40 }
 0x539   : > { %9917 = vmatprep.mubr.f32.mxu1 %v6584_v60 }
 0x53c   : > { %9918 = vmatmul.mubr.msk.f32.gmra.mrb[26].mxu1 %vm14302_vm7, %v6585_v51 }
 0x53d   : > { %9920 = vmatprep.mubr.f32.mxu1 %v13324_v26  ;;  %v13540_v26 = vld [vmem:[%s13718_s6] ss:$0 sm:$0xff] }
 0x540   : > { %9921 = vmatmul.mubr.msk.f32.gmra.mrb[28].mxu1 %vm14303_vm1, %v13327_v29 }
 0x541   : > { %9923 = vmatprep.mubr.f32.mxu1 %v6588_v17 }
 0x544   : > { %9924 = vmatmul.mubr.msk.f32.gmra.mrb[30].mxu1 %vm14258_vm0, %v6589_v21  ;;  %vm14304_vm0 = vcmask 31744   ;;  %v6985_v21 = vld [vmem:[%s11128_s23 + $0x58] sm:$0xff] }
 0x545   : > { %vm14305_vm8 = vmmov %vm14304_vm0 }
 0x546   : > { %vm14306_vm9 = vmmov %vm14304_vm0 }
 0x547   : > { %vm14307_vm12 = vmmov %vm14304_vm0 }
 0x548   : > { %vm14308_vm13 = vmmov %vm14304_vm0 }
 0x549   : > { %vm14309_vm14 = vmmov %vm14304_vm0 }
 0x54a   : > { %vm14310_vm10 = vmmov %vm14304_vm0 }
 0x54b   : > { %vm14311_vm11 = vmmov %vm14304_vm0 }
 0x54c   : > { %vm14312_vm3 = vmmov %vm14304_vm0 }
 0x54d   : > { %vm14313_vm15 = vmmov %vm14304_vm0 }
 0x54e   : > { %vm14314_vm2 = vmmov %vm14304_vm0 }
 0x54f   : > { %vm14315_vm5 = vmmov %vm14304_vm0 }
 0x550   : > { %vm14316_vm4 = vmmov %vm14304_vm0 }
 0x551   : > { %vm14317_vm6 = vmmov %vm14304_vm0 }
 0x552   : > { %vm14318_vm7 = vmmov %vm14304_vm0 }
 0x553   : > { %vm14319_vm1 = vmmov %vm14304_vm0 }
 0x5db   : > { %v9880_v12 = vpop.f32.mrb[0].mxu1 }
 0x5dc   : > { %v6904_v62 = vmul.f32 %v9880_v12, %v13535_v39  ;;  %v6705_v29 = vpop.f32.mrb[1].mxu1 }
 0x5dd   : > { %v6903_v52 = vmul.f32 %v13535_v39, %v6705_v29 }
 0x5de   : > { %v6943_v3 = vadd.f32 %v13540_v26, %v6904_v62 }
 0x5df   : > { %v6942_v30 = vadd.f32 %v13540_v26, %v6903_v52  ;;  %v9883_v33 = vpop.f32.mrb[2].mxu1 }
 0x5e0   : > { %v7007_v44 = vadd.f32 %v6975_v22, %v6943_v3  ;;  %v6906_v38 = vmul.f32 %v9883_v33, %v13535_v39  ;;  %v6715_v8 = vpop.f32.mrb[3].mxu1  ;;  %v6984_v22 = vld [vmem:[%s11128_s23 + $0x50] sm:$0xff] }
 0x5e1   : > { %v7006_v43 = vadd.f32 %v6974_v45, %v6942_v30  ;;  %v6905_v2 = vmul.f32 %v13535_v39, %v6715_v8  ;;  %v6987_v8 = vld [vmem:[%s11128_s23 + $0x68] sm:$0xff] }
 0x5e2   : > { %v7039_v24 = vmax.f32 %v7007_v44, 0.0  ;;  %v6945_v1 = vadd.f32 %v13540_v26, %v6906_v38 }
 0x5e3   : > { %v7038_v37 = vmax.f32 %v7006_v43, 0.0  ;;  %v6944_v10 = vadd.f32 %v13540_v26, %v6905_v2  ;;  %v9886_v4 = vpop.f32.mrb[4].mxu1 }
 0x5e4   : > { %7071 = vst.msk [vmem:[%s13554_s26 + $0x8] sm:$0xff] %vm14304_vm0, %v7039_v24  ;;  %v7009_v27 = vadd.f32 %v6977_v57, %v6945_v1  ;;  %v6908_v49 = vmul.f32 %v9886_v4, %v13535_v39  ;;  %v6725_v5 = vpop.f32.mrb[5].mxu1  ;;  %v6986_v24 = vld [vmem:[%s11128_s23 + $0x60] sm:$0xff] }
 0x5e5   : > { %7070 = vst.msk [vmem:[%s13554_s26] sm:$0xff] %vm14305_vm8, %v7038_v37  ;;  %v7008_v7 = vadd.f32 %v6976_v41, %v6944_v10  ;;  %v6907_v32 = vmul.f32 %v13535_v39, %v6725_v5  ;;  %v6989_v5 = vld [vmem:[%s11128_s23 + $0x78] sm:$0xff]  ;;  %vm14320_vm8 = vmmov %vm14304_vm0 }
 0x5e6   : > { %v7041_v42 = vmax.f32 %v7009_v27, 0.0  ;;  %v6947_v50 = vadd.f32 %v13540_v26, %v6908_v49 }
 0x5e7   : > { %v7040_v56 = vmax.f32 %v7008_v7, 0.0  ;;  %v6946_v63 = vadd.f32 %v13540_v26, %v6907_v32  ;;  %v9889_v34 = vpop.f32.mrb[6].mxu1 }
 0x5e8   : > { %7073 = vst.msk [vmem:[%s13554_s26 + $0x18] sm:$0xff] %vm14306_vm9, %v7041_v42  ;;  %v7011_v58 = vadd.f32 %v6979_v15, %v6947_v50  ;;  %v6910_v0 = vmul.f32 %v9889_v34, %v13535_v39  ;;  %v6735_v13 = vpop.f32.mrb[7].mxu1  ;;  %v6988_v42 = vld [vmem:[%s11128_s23 + $0x70] sm:$0xff]  ;;  %vm14321_vm9 = vmmov %vm14304_vm0 }
 0x5e9   : > { %7072 = vst.msk [vmem:[%s13554_s26 + $0x10] sm:$0xff] %vm14307_vm12, %v7040_v56  ;;  %v7010_v59 = vadd.f32 %v6978_v16, %v6946_v63  ;;  %v6909_v46 = vmul.f32 %v13535_v39, %v6735_v13  ;;  %v6991_v13 = vld [vmem:[%s11128_s23 + $0x88] sm:$0xff]  ;;  %vm14322_vm12 = vmmov %vm14304_vm0 }
 0x5ea   : > { %v7043_v54 = vmax.f32 %v7011_v58, 0.0  ;;  %v6949_v9 = vadd.f32 %v13540_v26, %v6910_v0 }
 0x5eb   : > { %v7042_v19 = vmax.f32 %v7010_v59, 0.0  ;;  %v6948_v61 = vadd.f32 %v13540_v26, %v6909_v46  ;;  %v9892_v23 = vpop.f32.mrb[8].mxu1 }
 0x5ec   : > { %7075 = vst.msk [vmem:[%s13554_s26 + $0x28] sm:$0xff] %vm14308_vm13, %v7043_v54  ;;  %v7013_v55 = vadd.f32 %v6981_v53, %v6949_v9  ;;  %v6912_v47 = vmul.f32 %v9892_v23, %v13535_v39  ;;  %v6745_v28 = vpop.f32.mrb[9].mxu1  ;;  %v6990_v54 = vld [vmem:[%s11128_s23 + $0x80] sm:$0xff]  ;;  %vm14323_vm13 = vmmov %vm14304_vm0 }
 0x5ed   : > { %7074 = vst.msk [vmem:[%s13554_s26 + $0x20] sm:$0xff] %vm14309_vm14, %v7042_v19  ;;  %v7012_v25 = vadd.f32 %v6980_v35, %v6948_v61  ;;  %v6911_v18 = vmul.f32 %v13535_v39, %v6745_v28  ;;  %v6993_v28 = vld [vmem:[%s11128_s23 + $0x98] sm:$0xff]  ;;  %vm14324_vm14 = vmmov %vm14304_vm0 }
 0x5ee   : > { %v7045_v31 = vmax.f32 %v7013_v55, 0.0  ;;  %v6951_v11 = vadd.f32 %v13540_v26, %v6912_v47 }
 0x5ef   : > { %v7044_v36 = vmax.f32 %v7012_v25, 0.0  ;;  %v6950_v14 = vadd.f32 %v13540_v26, %v6911_v18  ;;  %v9895_v20 = vpop.f32.mrb[10].mxu1 }
 0x5f0   : > { %7077 = vst.msk [vmem:[%s13554_s26 + $0x38] sm:$0xff] %vm14310_vm10, %v7045_v31  ;;  %v7015_v40 = vadd.f32 %v6983_v6, %v6951_v11  ;;  %v6914_v60 = vmul.f32 %v9895_v20, %v13535_v39  ;;  %v6755_v51 = vpop.f32.mrb[11].mxu1  ;;  %v6992_v31 = vld [vmem:[%s11128_s23 + $0x90] sm:$0xff]  ;;  %vm14325_vm10 = vmmov %vm14304_vm0 }
 0x5f1   : > { %7076 = vst.msk [vmem:[%s13554_s26 + $0x30] sm:$0xff] %vm14311_vm11, %v7044_v36  ;;  %v7014_v17 = vadd.f32 %v6982_v48, %v6950_v14  ;;  %v6913_v12 = vmul.f32 %v13535_v39, %v6755_v51  ;;  %v6995_v51 = vld [vmem:[%s11128_s23 + $0xa8] sm:$0xff]  ;;  %vm14326_vm11 = vmmov %vm14304_vm0 }
 0x5f2   : > { %v7047_v62 = vmax.f32 %v7015_v40, 0.0  ;;  %v6953_v29 = vadd.f32 %v13540_v26, %v6914_v60 }
 0x5f3   : > { %v7046_v52 = vmax.f32 %v7014_v17, 0.0  ;;  %v6952_v3 = vadd.f32 %v13540_v26, %v6913_v12  ;;  %v9898_v45 = vpop.f32.mrb[12].mxu1 }
 0x5f4   : > { %7079 = vst.msk [vmem:[%s13554_s26 + $0x48] sm:$0xff] %vm14312_vm3, %v7047_v62  ;;  %v7017_v30 = vadd.f32 %v6985_v21, %v6953_v29  ;;  %v6916_v33 = vmul.f32 %v9898_v45, %v13535_v39  ;;  %v6765_v44 = vpop.f32.mrb[13].mxu1  ;;  %v6994_v62 = vld [vmem:[%s11128_s23 + $0xa0] sm:$0xff]  ;;  %vm14327_vm3 = vmmov %vm14304_vm0 }
 0x5f5   : > { %7078 = vst.msk [vmem:[%s13554_s26 + $0x40] sm:$0xff] %vm14313_vm15, %v7046_v52  ;;  %v7016_v38 = vadd.f32 %v6984_v22, %v6952_v3  ;;  %v6915_v43 = vmul.f32 %v13535_v39, %v6765_v44  ;;  %v6997_v44 = vld [vmem:[%s11128_s23 + $0xb8] sm:$0xff]  ;;  %vm14328_vm15 = vmmov %vm14304_vm0 }
 0x5f6   : > { %v7049_v57 = vmax.f32 %v7017_v30, 0.0  ;;  %v6955_v2 = vadd.f32 %v13540_v26, %v6916_v33 }
 0x5f7   : > { %v7048_v1 = vmax.f32 %v7016_v38, 0.0  ;;  %v6954_v41 = vadd.f32 %v13540_v26, %v6915_v43  ;;  %v9901_v37 = vpop.f32.mrb[14].mxu1 }
 0x5f8   : > { %7081 = vst.msk [vmem:[%s13554_s26 + $0x58] sm:$0xff] %vm14314_vm2, %v7049_v57  ;;  %v7019_v10 = vadd.f32 %v6987_v8, %v6955_v2  ;;  %v6918_v4 = vmul.f32 %v9901_v37, %v13535_v39  ;;  %v6775_v27 = vpop.f32.mrb[15].mxu1  ;;  %v6996_v57 = vld [vmem:[%s11128_s23 + $0xb0] sm:$0xff]  ;;  %vm14329_vm2 = vmmov %vm14304_vm0 }
 0x5f9   : > { %7080 = vst.msk [vmem:[%s13554_s26 + $0x50] sm:$0xff] %vm14315_vm5, %v7048_v1  ;;  %v7018_v49 = vadd.f32 %v6986_v24, %v6954_v41  ;;  %v6917_v7 = vmul.f32 %v13535_v39, %v6775_v27  ;;  %v6999_v27 = vld [vmem:[%s11128_s23 + $0xc8] sm:$0xff]  ;;  %vm14330_vm5 = vmmov %vm14304_vm0 }
 0x5fa   : > { %v7051_v15 = vmax.f32 %v7019_v10, 0.0  ;;  %v6957_v32 = vadd.f32 %v13540_v26, %v6918_v4 }
 0x5fb   : > { %v7050_v50 = vmax.f32 %v7018_v49, 0.0  ;;  %v6956_v16 = vadd.f32 %v13540_v26, %v6917_v7  ;;  %v9904_v56 = vpop.f32.mrb[16].mxu1 }
 0x5fc   : > { %7083 = vst.msk [vmem:[%s13554_s26 + $0x68] sm:$0xff] %vm14316_vm4, %v7051_v15  ;;  %v7021_v63 = vadd.f32 %v6989_v5, %v6957_v32  ;;  %v6920_v34 = vmul.f32 %v9904_v56, %v13535_v39  ;;  %v6785_v58 = vpop.f32.mrb[17].mxu1  ;;  %v6998_v15 = vld [vmem:[%s11128_s23 + $0xc0] sm:$0xff]  ;;  %vm14331_vm4 = vmmov %vm14304_vm0 }
 0x5fd   : > { %7082 = vst.msk [vmem:[%s13554_s26 + $0x60] sm:$0xff] %vm14317_vm6, %v7050_v50  ;;  %v7020_v0 = vadd.f32 %v6988_v42, %v6956_v16  ;;  %v6919_v59 = vmul.f32 %v13535_v39, %v6785_v58  ;;  %v7001_v58 = vld [vmem:[%s11128_s23 + $0xd8] sm:$0xff]  ;;  %vm14332_vm6 = vmmov %vm14304_vm0 }
 0x5fe   : > { %v7053_v53 = vmax.f32 %v7021_v63, 0.0  ;;  %v6959_v46 = vadd.f32 %v13540_v26, %v6920_v34 }
 0x5ff   : > { %v7052_v9 = vmax.f32 %v7020_v0, 0.0  ;;  %v6958_v35 = vadd.f32 %v13540_v26, %v6919_v59  ;;  %v9907_v19 = vpop.f32.mrb[18].mxu1 }
 0x600   : > { %7085 = vst.msk [vmem:[%s13554_s26 + $0x78] sm:$0xff] %vm14318_vm7, %v7053_v53  ;;  %v7023_v61 = vadd.f32 %v6991_v13, %v6959_v46  ;;  %v6922_v23 = vmul.f32 %v9907_v19, %v13535_v39  ;;  %v6795_v55 = vpop.f32.mrb[19].mxu1  ;;  %v7000_v53 = vld [vmem:[%s11128_s23 + $0xd0] sm:$0xff]  ;;  %vm14333_vm7 = vmmov %vm14304_vm0 }
 0x601   : > { %7084 = vst.msk [vmem:[%s13554_s26 + $0x70] sm:$0xff] %vm14319_vm1, %v7052_v9  ;;  %v7022_v47 = vadd.f32 %v6990_v54, %v6958_v35  ;;  %v6921_v25 = vmul.f32 %v13535_v39, %v6795_v55  ;;  %v7003_v55 = vld [vmem:[%s11128_s23 + $0xe8] sm:$0xff]  ;;  %vm14334_vm1 = vmmov %vm14304_vm0 }
 0x602   : > { %v7055_v6 = vmax.f32 %v7023_v61, 0.0  ;;  %v6961_v18 = vadd.f32 %v13540_v26, %v6922_v23 }
 0x603   : > { %v7054_v11 = vmax.f32 %v7022_v47, 0.0  ;;  %v6960_v48 = vadd.f32 %v13540_v26, %v6921_v25  ;;  %v9910_v36 = vpop.f32.mrb[20].mxu1 }
 0x604   : > { %7087 = vst.msk [vmem:[%s13554_s26 + $0x88] sm:$0xff] %vm14304_vm0, %v7055_v6  ;;  %v7025_v14 = vadd.f32 %v6993_v28, %v6961_v18  ;;  %v6924_v20 = vmul.f32 %v9910_v36, %v13535_v39  ;;  %v6805_v40 = vpop.f32.mrb[21].mxu1  ;;  %v7002_v6 = vld [vmem:[%s11128_s23 + $0xe0] sm:$0xff] }
 0x605   : > { %7086 = vst.msk [vmem:[%s13554_s26 + $0x80] sm:$0xff] %vm14320_vm8, %v7054_v11  ;;  %v7024_v60 = vadd.f32 %v6992_v31, %v6960_v48  ;;  %v6923_v17 = vmul.f32 %v13535_v39, %v6805_v40  ;;  %v7005_v40 = vld [vmem:[%s11128_s23 + $0xf8] sm:$0xff] }
 0x606   : > { %v7057_v21 = vmax.f32 %v7025_v14, 0.0  ;;  %v6963_v12 = vadd.f32 %v13540_v26, %v6924_v20 }
 0x607   : > { %v7056_v29 = vmax.f32 %v7024_v60, 0.0  ;;  %v6962_v22 = vadd.f32 %v13540_v26, %v6923_v17  ;;  %v9913_v52 = vpop.f32.mrb[22].mxu1 }
 0x608   : > { %7089 = vst.msk [vmem:[%s13554_s26 + $0x98] sm:$0xff] %vm14321_vm9, %v7057_v21  ;;  %v7027_v3 = vadd.f32 %v6995_v51, %v6963_v12  ;;  %v6926_v45 = vmul.f32 %v9913_v52, %v13535_v39  ;;  %v6815_v30 = vpop.f32.mrb[23].mxu1  ;;  %v7004_v21 = vld [vmem:[%s11128_s23 + $0xf0] sm:$0xff] }
 0x609   : > { %7088 = vst.msk [vmem:[%s13554_s26 + $0x90] sm:$0xff] %vm14322_vm12, %v7056_v29  ;;  %v7026_v33 = vadd.f32 %v6994_v62, %v6962_v22  ;;  %v6925_v38 = vmul.f32 %v13535_v39, %v6815_v30 }
 0x60a   : > { %v7059_v8 = vmax.f32 %v7027_v3, 0.0  ;;  %v6965_v43 = vadd.f32 %v13540_v26, %v6926_v45 }
 0x60b   : > { %v7058_v2 = vmax.f32 %v7026_v33, 0.0  ;;  %v6964_v24 = vadd.f32 %v13540_v26, %v6925_v38  ;;  %v9916_v1 = vpop.f32.mrb[24].mxu1 }
 0x60c   : > { %7091 = vst.msk [vmem:[%s13554_s26 + $0xa8] sm:$0xff] %vm14323_vm13, %v7059_v8  ;;  %v7029_v41 = vadd.f32 %v6997_v44, %v6965_v43  ;;  %v6928_v37 = vmul.f32 %v9916_v1, %v13535_v39  ;;  %v6825_v10 = vpop.f32.mrb[25].mxu1 }
 0x60d   : > { %7090 = vst.msk [vmem:[%s13554_s26 + $0xa0] sm:$0xff] %vm14324_vm14, %v7058_v2  ;;  %v7028_v4 = vadd.f32 %v6996_v57, %v6964_v24  ;;  %v6927_v49 = vmul.f32 %v13535_v39, %v6825_v10 }
 0x60e   : > { %v7061_v5 = vmax.f32 %v7029_v41, 0.0  ;;  %v6967_v7 = vadd.f32 %v13540_v26, %v6928_v37 }
 0x60f   : > { %v7060_v32 = vmax.f32 %v7028_v4, 0.0  ;;  %v6966_v42 = vadd.f32 %v13540_v26, %v6927_v49  ;;  %v9919_v50 = vpop.f32.mrb[26].mxu1 }
 0x610   : > { %7093 = vst.msk [vmem:[%s13554_s26 + $0xb8] sm:$0xff] %vm14325_vm10, %v7061_v5  ;;  %v7031_v16 = vadd.f32 %v6999_v27, %v6967_v7  ;;  %v6930_v56 = vmul.f32 %v9919_v50, %v13535_v39  ;;  %v6835_v63 = vpop.f32.mrb[27].mxu1 }
 0x611   : > { %7092 = vst.msk [vmem:[%s13554_s26 + $0xb0] sm:$0xff] %vm14326_vm11, %v7060_v32  ;;  %v7030_v34 = vadd.f32 %v6998_v15, %v6966_v42  ;;  %v6929_v0 = vmul.f32 %v13535_v39, %v6835_v63 }
 0x612   : > { %v7063_v13 = vmax.f32 %v7031_v16, 0.0  ;;  %v6969_v59 = vadd.f32 %v13540_v26, %v6930_v56 }
 0x613   : > { %v7062_v46 = vmax.f32 %v7030_v34, 0.0  ;;  %v6968_v54 = vadd.f32 %v13540_v26, %v6929_v0  ;;  %v9922_v9 = vpop.f32.mrb[28].mxu1 }
 0x614   : > { %7095 = vst.msk [vmem:[%s13554_s26 + $0xc8] sm:$0xff] %vm14327_vm3, %v7063_v13  ;;  %v7033_v35 = vadd.f32 %v7001_v58, %v6969_v59  ;;  %v6932_v19 = vmul.f32 %v9922_v9, %v13535_v39  ;;  %v6845_v61 = vpop.f32.mrb[29].mxu1 }
 0x615   : > { %7094 = vst.msk [vmem:[%s13554_s26 + $0xc0] sm:$0xff] %vm14328_vm15, %v7062_v46  ;;  %v7032_v23 = vadd.f32 %v7000_v53, %v6968_v54  ;;  %v6931_v47 = vmul.f32 %v13535_v39, %v6845_v61 }
 0x616   : > { %v7065_v28 = vmax.f32 %v7033_v35, 0.0  ;;  %v6971_v25 = vadd.f32 %v13540_v26, %v6932_v19 }
 0x617   : > { %v7064_v18 = vmax.f32 %v7032_v23, 0.0  ;;  %v6970_v31 = vadd.f32 %v13540_v26, %v6931_v47  ;;  %v9925_v11 = vpop.f32.mrb[30].mxu1 }
 0x618   : > { %7097 = vst.msk [vmem:[%s13554_s26 + $0xd8] sm:$0xff] %vm14329_vm2, %v7065_v28  ;;  %v7035_v48 = vadd.f32 %v7003_v55, %v6971_v25  ;;  %v6934_v36 = vmul.f32 %v9925_v11, %v13535_v39  ;;  %v6855_v14 = vpop.f32.mrb[31].mxu1 }
 0x619   : > { %7096 = vst.msk [vmem:[%s13554_s26 + $0xd0] sm:$0xff] %vm14330_vm5, %v7064_v18  ;;  %v7034_v20 = vadd.f32 %v7002_v6, %v6970_v31  ;;  %v6933_v60 = vmul.f32 %v13535_v39, %v6855_v14 }
 0x61a   : > { %v7067_v51 = vmax.f32 %v7035_v48, 0.0  ;;  %v6973_v17 = vadd.f32 %v13540_v26, %v6934_v36 }
 0x61b   : > { %v7066_v12 = vmax.f32 %v7034_v20, 0.0  ;;  %v6972_v62 = vadd.f32 %v13540_v26, %v6933_v60 }
 0x61c   : > { %7099 = vst.msk [vmem:[%s13554_s26 + $0xe8] sm:$0xff] %vm14331_vm4, %v7067_v51  ;;  %v7037_v29 = vadd.f32 %v7005_v40, %v6973_v17 }
 0x61d   : > { %7098 = vst.msk [vmem:[%s13554_s26 + $0xe0] sm:$0xff] %vm14332_vm6, %v7066_v12  ;;  %v7036_v22 = vadd.f32 %v7004_v21, %v6972_v62 }
 0x61e   : > { %v7069_v52 = vmax.f32 %v7037_v29, 0.0 }
 0x61f   : > { %v7068_v3 = vmax.f32 %v7036_v22, 0.0 }
 0x620   : > { %7101 = vst.msk [vmem:[%s13554_s26 + $0xf8] sm:$0xff] %vm14333_vm7, %v7069_v52 }
 0x621   : > { %7100 = vst.msk [vmem:[%s13554_s26 + $0xf0] sm:$0xff] %vm14334_vm1, %v7068_v3 }
 0x622 PF: > { %s17_s24 = sadd.s32 1, %s11031_s24  }
 0x623   : > { %p14_p4 = scmp.ge.s32.totalorder %s17_s24, 4  }
 0x625   :  { %16 = sbr.rel (!%p14_p4) target bundleno = 1 (0x1), region = 94 }

</bundles_post_ra>
